<compile_context>
chip_gen: v7x
topology: tpu7x:2x2x1
jax: 0.10.0
libtpu: 0.0.40
codegen_flags: <defaults>
</compile_context>

<pallas_src>
import functools

import jax
import jax.numpy as jnp
import numpy as np
from jax import lax
from jax.experimental import pallas as pl
from jax.experimental.pallas import tpu as pltpu

_EPS = 1e-5
_LANE = 128


def _round_up(x, m):
    return (x + m - 1) // m * m


def _upsample2x(x):
    """Nearest-neighbour 2x upsample of (h, w, c); never touches the lane dim."""
    h, w, c = x.shape
    x = jnp.broadcast_to(x[:, :, None, :], (h, w, 2, c)).reshape(h, 2 * w, c)
    x = jnp.broadcast_to(x[:, None, :, :], (h, 2, 2 * w, c)).reshape(2 * h, 2 * w, c)
    return x


def _block_kernel(*args, n_seg, seg_pads, pool, upsample, hi, wi):
    """[2x upsample] -> conv3x3(pad=1) -> InstanceNorm(affine) -> ReLU [-> 2x2 avgpool].

    args = seg_refs (n_seg x (1, hi, wi, seg_pad)),
           w_ref (9*sum(seg_pads), Cout_pad), g_ref, bt_ref (1, Cout_pad),
           o_ref (1, Ho, Wo, Cout_pad), xpad_ref ((H+2, W+2, sum(seg_pads)) VMEM).
    """
    seg_refs = args[:n_seg]
    w_ref, g_ref, bt_ref, o_ref, xpad_ref = args[n_seg:]

    h = 2 * hi if upsample else hi
    w = 2 * wi if upsample else wi
    cpad = sum(seg_pads)
    coutp = o_ref.shape[-1]

    # --- build zero-padded (halo) conv input on-chip -------------------------
    xpad_ref[...] = jnp.zeros_like(xpad_ref)
    off = 0
    for s in range(n_seg):
        xs = seg_refs[s][0]                               # (hi, wi, seg_pad)
        if upsample:
            xs = _upsample2x(xs)                          # (h, w, seg_pad)
        xpad_ref[1:h + 1, 1:w + 1, off:off + seg_pads[s]] = xs
        off += seg_pads[s]

    # --- conv3x3 as ONE im2col matmul (K = 9 * cpad) --------------------------
    slabs = []
    for dy in range(3):
        for dx in range(3):
            slabs.append(xpad_ref[dy:dy + h, dx:dx + w, :].reshape(h * w, cpad))
    col = jnp.concatenate(slabs, axis=1)                  # (h*w, 9*cpad)
    acc = jnp.dot(col, w_ref[...], preferred_element_type=jnp.float32)
    # conv bias omitted: exactly cancelled by the InstanceNorm mean subtraction.

    # --- InstanceNorm2d (biased var, single pass) + affine + ReLU -------------
    inv_m = 1.0 / (h * w)
    mean = jnp.sum(acc, axis=0, keepdims=True) * inv_m
    var = jnp.maximum(
        jnp.sum(acc * acc, axis=0, keepdims=True) * inv_m - mean * mean, 0.0)
    y = (acc - mean) * lax.rsqrt(var + _EPS)
    y = jnp.maximum(y * g_ref[...] + bt_ref[...], 0.0)    # (h*w, coutp)

    if pool:
        # 2x2 average pool computed from registers (no VMEM round trip).
        t = y.reshape(h, w // 2, 2, coutp)
        t = t[:, :, 0, :] + t[:, :, 1, :]                  # (h, w//2, coutp)
        t = t.reshape(h // 2, 2, w // 2, coutp)
        t = 0.25 * (t[:, 0, :, :] + t[:, 1, :, :])         # (h//2, w//2, coutp)
        o_ref[0] = t.astype(o_ref.dtype)
    else:
        o_ref[0] = y.reshape(h, w, coutp).astype(o_ref.dtype)


def _block(segs, bp, *, pool, upsample):
    """One DownBlock2d (pool=True) or UpBlock2d (upsample=True) on padded NHWC segments."""
    b, hi, wi = segs[0].shape[:3]
    seg_pads = tuple(int(s.shape[-1]) for s in segs)
    cpad = sum(seg_pads)
    coutp = bp["w2"].shape[-1]
    h = 2 * hi if upsample else hi
    w = 2 * wi if upsample else wi
    ho, wo = (h // 2, w // 2) if pool else (h, w)

    kernel = functools.partial(
        _block_kernel, n_seg=len(segs), seg_pads=seg_pads,
        pool=pool, upsample=upsample, hi=hi, wi=wi)

    in_specs = [pl.BlockSpec((1, hi, wi, sp), lambda i: (i, 0, 0, 0))
                for sp in seg_pads]
    in_specs += [
        pl.BlockSpec((9 * cpad, coutp), lambda i: (0, 0)),   # packed weights
        pl.BlockSpec((1, coutp), lambda i: (0, 0)),          # IN gamma
        pl.BlockSpec((1, coutp), lambda i: (0, 0)),          # IN beta
    ]

    return pl.pallas_call(
        kernel,
        out_shape=jax.ShapeDtypeStruct((b, ho, wo, coutp), jnp.float32),
        grid_spec=pltpu.PrefetchScalarGridSpec(
            num_scalar_prefetch=0,
            grid=(b,),
            in_specs=in_specs,
            out_specs=pl.BlockSpec((1, ho, wo, coutp), lambda i: (i, 0, 0, 0)),
            scratch_shapes=[pltpu.VMEM((h + 2, w + 2, cpad), jnp.float32)],
        ),
        compiler_params=pltpu.CompilerParams(
            dimension_semantics=("parallel",),
            vmem_limit_bytes=32 * 1024 * 1024),
    )(*segs, bp["w2"], bp["g2"], bp["bt2"])


def hourglass_forward(x_nchw, packed):
    """Hourglass.forward: returns the 3 decoder feature maps (NCHW)."""
    x = jnp.transpose(x_nchw, (0, 2, 3, 1))                # NCHW -> NHWC (glue)
    cin0 = x.shape[-1]
    x = jnp.pad(x, ((0, 0), (0, 0), (0, 0), (0, _round_up(cin0, _LANE) - cin0)))

    # Encoder: DownBlock2d chain (channel-padded feature maps).
    feats = [(x, cin0)]
    for bp in packed["enc"]:
        y = _block([feats[-1][0]], bp, pool=True, upsample=False)
        feats.append((y, bp["cout"]))

    # Decoder: UpBlock2d; skip "concat" kept as separate padded segments.
    cur = [feats.pop()]                                    # list of (arr, real_c)
    results = []
    for bp in packed["dec"]:
        y = _block([a for a, _ in cur], bp, pool=False, upsample=True)
        skip = feats.pop()
        cur = [(y, bp["cout"]), skip]
        results.append(cur)

    outs = []
    for segs in results:                                   # strip pad, NHWC->NCHW
        real = jnp.concatenate([a[..., :r] for a, r in segs], axis=-1)
        outs.append(jnp.transpose(real, (0, 3, 1, 2)))
    return outs


# ---------------- parameter packing (layout plumbing, host side) -------------
def _pack_block(p, seg_reals):
    """Pack raw HWIO weights + IN affine into lane-dense slabs."""
    w = p["w"]                                             # (3, 3, Cin, Cout)
    cout = w.shape[-1]
    coutp = _round_up(cout, _LANE)
    pieces, off = [], 0
    for cr in seg_reals:
        cp = _round_up(cr, _LANE)
        wi = w[:, :, off:off + cr, :]
        wi = jnp.pad(wi, ((0, 0), (0, 0), (0, cp - cr), (0, coutp - cout)))
        pieces.append(wi)
        off += cr
    wp = jnp.concatenate(pieces, axis=2)                   # (3, 3, sum cp, coutp)
    w2 = wp.reshape(9 * wp.shape[2], coutp)                # (9*Cin_pad, Cout_pad)
    g2 = jnp.pad(p["g"].reshape(1, -1), ((0, 0), (0, coutp - cout)))
    bt2 = jnp.pad(p["bt"].reshape(1, -1), ((0, 0), (0, coutp - cout)))
    return {"w2": w2, "g2": g2, "bt2": bt2, "cout": cout}


def pack_hourglass_params(raw, block_expansion, in_features, num_blocks=3,
                          max_features=256):
    enc = []
    for i, p in enumerate(raw["enc"]):
        cin = in_features if i == 0 else min(max_features, block_expansion * 2 ** i)
        enc.append(_pack_block(p, [cin]))
    dec = []
    for k, i in enumerate(range(num_blocks)[::-1]):
        block_dim = min(max_features, block_expansion * 2 ** (i + 1))
        seg_reals = [block_dim] if i == num_blocks - 1 else [block_dim, block_dim]
        dec.append(_pack_block(raw["dec"][k], seg_reals))
    return {"enc": enc, "dec": dec}


# ---------------- pure-JAX reference (for correctness check) -----------------
def _ref_block(x, p, *, pool, upsample):
    if upsample:
        x = jnp.repeat(jnp.repeat(x, 2, axis=1), 2, axis=2)
    y = lax.conv_general_dilated(
        x, p["w"], (1, 1), "SAME",
        dimension_numbers=("NHWC", "HWIO", "NHWC"),
        precision=lax.Precision.HIGHEST)
    y = y + p["b"].reshape(1, 1, 1, -1)
    mean = y.mean(axis=(1, 2), keepdims=True)
    var = jnp.square(y - mean).mean(axis=(1, 2), keepdims=True)
    y = (y - mean) / jnp.sqrt(var + _EPS)
    y = y * p["g"].reshape(1, 1, 1, -1) + p["bt"].reshape(1, 1, 1, -1)
    y = jnp.maximum(y, 0.0)
    if pool:
        y = 0.25 * (y[:, 0::2, 0::2] + y[:, 0::2, 1::2] +
                    y[:, 1::2, 0::2] + y[:, 1::2, 1::2])
    return y


def hourglass_reference(x_nchw, params):
    x = jnp.transpose(x_nchw, (0, 2, 3, 1))
    feats = [x]
    for p in params["enc"]:
        feats.append(_ref_block(feats[-1], p, pool=True, upsample=False))
    out = feats.pop()
    results = []
    for p in params["dec"]:
        y = _ref_block(out, p, pool=False, upsample=True)
        out = jnp.concatenate([y, feats.pop()], axis=-1)
        results.append(out)
    return [jnp.transpose(r, (0, 3, 1, 2)) for r in results]


# ---------------- deterministic parameter construction -----------------------
def _init_block_params(key, cin, cout):
    k1, k2, k3, k4 = jax.random.split(key, 4)
    scale = 1.0 / np.sqrt(9.0 * cin)
    return {
        "w": scale * jax.random.normal(k1, (3, 3, cin, cout), jnp.float32),
        "b": 0.1 * jax.random.normal(k2, (1, cout), jnp.float32),
        "g": 1.0 + 0.1 * jax.random.normal(k3, (1, cout), jnp.float32),
        "bt": 0.1 * jax.random.normal(k4, (1, cout), jnp.float32),
    }


def init_hourglass_params(key, block_expansion, in_features,
                          num_blocks=3, max_features=256):
    enc, dec = [], []
    for i in range(num_blocks):
        cin = in_features if i == 0 else min(max_features,
                                             block_expansion * 2 ** i)
        cout = min(max_features, block_expansion * 2 ** (i + 1))
        key, sub = jax.random.split(key)
        enc.append(_init_block_params(sub, cin, cout))
    for i in range(num_blocks)[::-1]:
        in_filters = min(max_features, block_expansion * 2 ** (i + 1))
        if i < num_blocks - 1:
            in_filters *= 2
        out_filters = min(max_features, block_expansion * 2 ** i)
        key, sub = jax.random.split(key)
        dec.append(_init_block_params(sub, in_filters, out_filters))
    return {"enc": enc, "dec": dec}


if __name__ == "__main__":
    block_expansion, in_features, num_blocks, max_features = 8, 4, 3, 256

    key = jax.random.PRNGKey(0)
    kx, kp = jax.random.split(key)
    # PyTorch-style NCHW input: [batch=2, channels=4, 16, 16]
    x = jax.random.normal(kx, (2, in_features, 16, 16), jnp.float32)
    raw = init_hourglass_params(kp, block_expansion, in_features,
                                num_blocks, max_features)
    packed = pack_hourglass_params(raw, block_expansion, in_features,
                                   num_blocks, max_features)

    outs = jax.block_until_ready(hourglass_forward(x, packed))

    refs = hourglass_reference(x, raw)
    expected_shapes = [(2, 64, 4, 4), (2, 32, 8, 8), (2, 12, 16, 16)]
    for o, r, s in zip(outs, refs, expected_shapes):
        assert o.shape == s, (o.shape, s)
        np.testing.assert_allclose(np.asarray(o), np.asarray(r),
                                   rtol=1e-3, atol=1e-3)

    print("KERNEL_OK")
</pallas_src>

<mosaic_0001>
module attributes {stable_mosaic.version = 11 : i64} {
  func.func @_block_kernel(%arg0: i32, %arg1: memref<1x16x16x128xf32, #tpu.memory_space<vmem>>, %arg2: memref<1152x128xf32, #tpu.memory_space<vmem>>, %arg3: memref<1x128xf32, #tpu.memory_space<vmem>>, %arg4: memref<1x128xf32, #tpu.memory_space<vmem>>, %arg5: memref<1x8x8x128xf32, #tpu.memory_space<vmem>>, %arg6: memref<18x18x128xf32, #tpu.memory_space<vmem>>) attributes {dimension_semantics = [#tpu.dimension_semantics<parallel>], iteration_bounds = array<i64: 2>, scalar_prefetch = 0 : i64, scratch_operands = 1 : i64, tpu.core_type = #tpu.core_type<tc>, window_params = [{transform_indices = @transform_0, window_bounds = array<i64: 1, 16, 16, 128>}, {pipeline_mode = #tpu.pipeline_mode<synchronous>, transform_indices = @transform_1, window_bounds = array<i64: 1152, 128>}, {pipeline_mode = #tpu.pipeline_mode<synchronous>, transform_indices = @transform_2, window_bounds = array<i64: 1, 128>}, {pipeline_mode = #tpu.pipeline_mode<synchronous>, transform_indices = @transform_3, window_bounds = array<i64: 1, 128>}, {transform_indices = @transform_4, window_bounds = array<i64: 1, 8, 8, 128>}]} {
    %cst = arith.constant 0.000000e+00 : f32
    %0 = vector.broadcast %cst : f32 to vector<18x18x128xf32>
    %c0 = arith.constant 0 : index
    %c0_0 = arith.constant 0 : index
    %c0_1 = arith.constant 0 : index
    %1 = vector.load %arg6[%c0, %c0_0, %c0_1] : memref<18x18x128xf32, #tpu.memory_space<vmem>>, vector<18x18x128xf32>
    tpu.vector_store %arg6[%c0, %c0_0, %c0_1], %0 {strides = array<i32>} : memref<18x18x128xf32, #tpu.memory_space<vmem>>, vector<18x18x128xf32>,
    %c0_2 = arith.constant 0 : index
    %c0_3 = arith.constant 0 : index
    %c0_4 = arith.constant 0 : index
    %c0_5 = arith.constant 0 : index
    %2 = vector.load %arg1[%c0_2, %c0_3, %c0_4, %c0_5] : memref<1x16x16x128xf32, #tpu.memory_space<vmem>>, vector<1x16x16x128xf32>
    %3 = vector.shape_cast %2 : vector<1x16x16x128xf32> to vector<16x16x128xf32>
    %c1 = arith.constant 1 : index
    %c1_6 = arith.constant 1 : index
    %c0_7 = arith.constant 0 : index
    %4 = vector.load %arg6[%c1, %c1_6, %c0_7] : memref<18x18x128xf32, #tpu.memory_space<vmem>>, vector<16x16x128xf32>
    tpu.vector_store %arg6[%c1, %c1_6, %c0_7], %3 {strides = array<i32>} : memref<18x18x128xf32, #tpu.memory_space<vmem>>, vector<16x16x128xf32>,
    %c0_8 = arith.constant 0 : index
    %c0_9 = arith.constant 0 : index
    %c0_10 = arith.constant 0 : index
    %5 = vector.load %arg6[%c0_8, %c0_9, %c0_10] : memref<18x18x128xf32, #tpu.memory_space<vmem>>, vector<16x16x128xf32>
    %6 = vector.shape_cast %5 : vector<16x16x128xf32> to vector<256x128xf32>
    %c0_11 = arith.constant 0 : index
    %c1_12 = arith.constant 1 : index
    %c0_13 = arith.constant 0 : index
    %7 = vector.load %arg6[%c0_11, %c1_12, %c0_13] : memref<18x18x128xf32, #tpu.memory_space<vmem>>, vector<16x16x128xf32>
    %8 = vector.shape_cast %7 : vector<16x16x128xf32> to vector<256x128xf32>
    %c0_14 = arith.constant 0 : index
    %c2 = arith.constant 2 : index
    %c0_15 = arith.constant 0 : index
    %9 = vector.load %arg6[%c0_14, %c2, %c0_15] : memref<18x18x128xf32, #tpu.memory_space<vmem>>, vector<16x16x128xf32>
    %10 = vector.shape_cast %9 : vector<16x16x128xf32> to vector<256x128xf32>
    %c1_16 = arith.constant 1 : index
    %c0_17 = arith.constant 0 : index
    %c0_18 = arith.constant 0 : index
    %11 = vector.load %arg6[%c1_16, %c0_17, %c0_18] : memref<18x18x128xf32, #tpu.memory_space<vmem>>, vector<16x16x128xf32>
    %12 = vector.shape_cast %11 : vector<16x16x128xf32> to vector<256x128xf32>
    %c1_19 = arith.constant 1 : index
    %c1_20 = arith.constant 1 : index
    %c0_21 = arith.constant 0 : index
    %13 = vector.load %arg6[%c1_19, %c1_20, %c0_21] : memref<18x18x128xf32, #tpu.memory_space<vmem>>, vector<16x16x128xf32>
    %14 = vector.shape_cast %13 : vector<16x16x128xf32> to vector<256x128xf32>
    %c1_22 = arith.constant 1 : index
    %c2_23 = arith.constant 2 : index
    %c0_24 = arith.constant 0 : index
    %15 = vector.load %arg6[%c1_22, %c2_23, %c0_24] : memref<18x18x128xf32, #tpu.memory_space<vmem>>, vector<16x16x128xf32>
    %16 = vector.shape_cast %15 : vector<16x16x128xf32> to vector<256x128xf32>
    %c2_25 = arith.constant 2 : index
    %c0_26 = arith.constant 0 : index
    %c0_27 = arith.constant 0 : index
    %17 = vector.load %arg6[%c2_25, %c0_26, %c0_27] : memref<18x18x128xf32, #tpu.memory_space<vmem>>, vector<16x16x128xf32>
    %18 = vector.shape_cast %17 : vector<16x16x128xf32> to vector<256x128xf32>
    %c2_28 = arith.constant 2 : index
    %c1_29 = arith.constant 1 : index
    %c0_30 = arith.constant 0 : index
    %19 = vector.load %arg6[%c2_28, %c1_29, %c0_30] : memref<18x18x128xf32, #tpu.memory_space<vmem>>, vector<16x16x128xf32>
    %20 = vector.shape_cast %19 : vector<16x16x128xf32> to vector<256x128xf32>
    %c2_31 = arith.constant 2 : index
    %c2_32 = arith.constant 2 : index
    %c0_33 = arith.constant 0 : index
    %21 = vector.load %arg6[%c2_31, %c2_32, %c0_33] : memref<18x18x128xf32, #tpu.memory_space<vmem>>, vector<16x16x128xf32>
    %22 = vector.shape_cast %21 : vector<16x16x128xf32> to vector<256x128xf32>
    %23 = tpu.concatenate %6, %8, %10, %12, %14, %16, %18, %20, %22 in 1 : vector<256x128xf32>, vector<256x128xf32>, vector<256x128xf32>, vector<256x128xf32>, vector<256x128xf32>, vector<256x128xf32>, vector<256x128xf32>, vector<256x128xf32>, vector<256x128xf32> -> vector<256x1152xf32>
    %c0_34 = arith.constant 0 : index
    %c0_35 = arith.constant 0 : index
    %24 = vector.load %arg2[%c0_34, %c0_35] : memref<1152x128xf32, #tpu.memory_space<vmem>>, vector<1152x128xf32>
    %cst_36 = arith.constant dense<0.000000e+00> : vector<256x128xf32>
    %25 = tpu.matmul %23, %24, %cst_36 {dimension_numbers = #tpu.dot_dimension_numbers<[1], [0], [0], [1], [0, 0, 1, 1], [], []>} : vector<256x1152xf32>, vector<1152x128xf32>, vector<256x128xf32> -> vector<256x128xf32>
    %cst_37 = arith.constant dense<0.000000e+00> : vector<128xf32>
    %26 = vector.multi_reduction <add>, %25, %cst_37 [0] : vector<256x128xf32> to vector<128xf32>
    %27 = vector.shape_cast %26 : vector<128xf32> to vector<1x128xf32>
    %cst_38 = arith.constant 3.906250e-03 : f32
    %28 = vector.broadcast %cst_38 : f32 to vector<1x128xf32>
    %29 = arith.mulf %27, %28 : vector<1x128xf32>
    %30 = arith.mulf %25, %25 : vector<256x128xf32>
    %cst_39 = arith.constant dense<0.000000e+00> : vector<128xf32>
    %31 = vector.multi_reduction <add>, %30, %cst_39 [0] : vector<256x128xf32> to vector<128xf32>
    %32 = vector.shape_cast %31 : vector<128xf32> to vector<1x128xf32>
    %cst_40 = arith.constant 3.906250e-03 : f32
    %33 = vector.broadcast %cst_40 : f32 to vector<1x128xf32>
    %34 = arith.mulf %32, %33 : vector<1x128xf32>
    %35 = arith.mulf %29, %29 : vector<1x128xf32>
    %36 = arith.subf %34, %35 : vector<1x128xf32>
    %cst_41 = arith.constant 0.000000e+00 : f32
    %37 = vector.broadcast %cst_41 : f32 to vector<1x128xf32>
    %38 = arith.maximumf %36, %37 : vector<1x128xf32>
    %39 = vector.broadcast %29 : vector<1x128xf32> to vector<256x128xf32>
    %40 = arith.subf %25, %39 : vector<256x128xf32>
    %cst_42 = arith.constant 9.99999974E-6 : f32
    %41 = vector.broadcast %cst_42 : f32 to vector<1x128xf32>
    %42 = arith.addf %38, %41 : vector<1x128xf32>
    %43 = math.rsqrt %42 : vector<1x128xf32>
    %44 = vector.broadcast %43 : vector<1x128xf32> to vector<256x128xf32>
    %45 = arith.mulf %40, %44 : vector<256x128xf32>
    %c0_43 = arith.constant 0 : index
    %c0_44 = arith.constant 0 : index
    %46 = vector.load %arg3[%c0_43, %c0_44] : memref<1x128xf32, #tpu.memory_space<vmem>>, vector<1x128xf32>
    %47 = vector.broadcast %46 : vector<1x128xf32> to vector<256x128xf32>
    %48 = arith.mulf %45, %47 : vector<256x128xf32>
    %c0_45 = arith.constant 0 : index
    %c0_46 = arith.constant 0 : index
    %49 = vector.load %arg4[%c0_45, %c0_46] : memref<1x128xf32, #tpu.memory_space<vmem>>, vector<1x128xf32>
    %50 = vector.broadcast %49 : vector<1x128xf32> to vector<256x128xf32>
    %51 = arith.addf %48, %50 : vector<256x128xf32>
    %cst_47 = arith.constant 0.000000e+00 : f32
    %52 = vector.broadcast %cst_47 : f32 to vector<256x128xf32>
    %53 = arith.maximumf %51, %52 : vector<256x128xf32>
    %54 = vector.shape_cast %53 : vector<256x128xf32> to vector<16x8x2x128xf32>
    %55 = vector.extract_strided_slice %54 {offsets = [0, 0, 0, 0], sizes = [16, 8, 1, 128], strides = [1, 1, 1, 1]} : vector<16x8x2x128xf32> to vector<16x8x1x128xf32>
    %56 = vector.shape_cast %55 : vector<16x8x1x128xf32> to vector<16x8x128xf32>
    %57 = vector.extract_strided_slice %54 {offsets = [0, 0, 1, 0], sizes = [16, 8, 1, 128], strides = [1, 1, 1, 1]} : vector<16x8x2x128xf32> to vector<16x8x1x128xf32>
    %58 = vector.shape_cast %57 : vector<16x8x1x128xf32> to vector<16x8x128xf32>
    %59 = arith.addf %56, %58 : vector<16x8x128xf32>
    %60 = vector.shape_cast %59 : vector<16x8x128xf32> to vector<8x2x8x128xf32>
    %61 = vector.extract_strided_slice %60 {offsets = [0, 0, 0, 0], sizes = [8, 1, 8, 128], strides = [1, 1, 1, 1]} : vector<8x2x8x128xf32> to vector<8x1x8x128xf32>
    %62 = vector.shape_cast %61 : vector<8x1x8x128xf32> to vector<8x8x128xf32>
    %63 = vector.extract_strided_slice %60 {offsets = [0, 1, 0, 0], sizes = [8, 1, 8, 128], strides = [1, 1, 1, 1]} : vector<8x2x8x128xf32> to vector<8x1x8x128xf32>
    %64 = vector.shape_cast %63 : vector<8x1x8x128xf32> to vector<8x8x128xf32>
    %65 = arith.addf %62, %64 : vector<8x8x128xf32>
    %cst_48 = arith.constant 2.500000e-01 : f32
    %66 = vector.broadcast %cst_48 : f32 to vector<8x8x128xf32>
    %67 = arith.mulf %66, %65 : vector<8x8x128xf32>
    %c0_49 = arith.constant 0 : index
    %c0_50 = arith.constant 0 : index
    %c0_51 = arith.constant 0 : index
    %c0_52 = arith.constant 0 : index
    %68 = vector.load %arg5[%c0_49, %c0_50, %c0_51, %c0_52] : memref<1x8x8x128xf32, #tpu.memory_space<vmem>>, vector<1x8x8x128xf32>
    %69 = vector.shape_cast %68 : vector<1x8x8x128xf32> to vector<8x8x128xf32>
    %70 = vector.shape_cast %67 : vector<8x8x128xf32> to vector<1x8x8x128xf32>
    tpu.vector_store %arg5[%c0_49, %c0_50, %c0_51, %c0_52], %70 {strides = array<i32>} : memref<1x8x8x128xf32, #tpu.memory_space<vmem>>, vector<1x8x8x128xf32>,
    return
  }
  func.func @transform_0(%arg0: i32) -> (i32, i32, i32, i32) {
    %c0_i32 = arith.constant 0 : i32
    %c0_i32_0 = arith.constant 0 : i32
    %c0_i32_1 = arith.constant 0 : i32
    %c0_i32_2 = arith.constant 0 : i32
    return %arg0, %c0_i32, %c0_i32_0, %c0_i32_1 : i32, i32, i32, i32
  }
  func.func @transform_1(%arg0: i32) -> (i32, i32) {
    %c0_i32 = arith.constant 0 : i32
    %c0_i32_0 = arith.constant 0 : i32
    %c0_i32_1 = arith.constant 0 : i32
    return %c0_i32, %c0_i32_0 : i32, i32
  }
  func.func @transform_2(%arg0: i32) -> (i32, i32) {
    %c0_i32 = arith.constant 0 : i32
    %c0_i32_0 = arith.constant 0 : i32
    %c0_i32_1 = arith.constant 0 : i32
    return %c0_i32, %c0_i32_0 : i32, i32
  }
  func.func @transform_3(%arg0: i32) -> (i32, i32) {
    %c0_i32 = arith.constant 0 : i32
    %c0_i32_0 = arith.constant 0 : i32
    %c0_i32_1 = arith.constant 0 : i32
    return %c0_i32, %c0_i32_0 : i32, i32
  }
  func.func @transform_4(%arg0: i32) -> (i32, i32, i32, i32) {
    %c0_i32 = arith.constant 0 : i32
    %c0_i32_0 = arith.constant 0 : i32
    %c0_i32_1 = arith.constant 0 : i32
    %c0_i32_2 = arith.constant 0 : i32
    return %arg0, %c0_i32, %c0_i32_0, %c0_i32_1 : i32, i32, i32, i32
  }
}

</mosaic_0001>

<bundles_post_ra>
// kernel: tpu_custom_call.1
= control target key start
LH: loop header
LB: loop body
LE: loop exit
PB: predicated region body
PF: predicated region fallthrough
CT: control target
= control target key end

     0   :  { %9 = vsyncpa [#allocation4], 0  ;;  %s8004_s0 = inlined_call_operand.hbm [shape: f32[2,16,16,128], index: 0, kind: input, shape index: {}]   ;;  %s8005_s1 = inlined_call_operand.hbm [shape: f32[1152,128], index: 1, kind: input, shape index: {}]   ;;  %s8006_s2 = inlined_call_operand.vmem [shape: f32[1,128], index: 2, kind: input, shape index: {}]   ;;  %s8007_s3 = inlined_call_operand.vmem [shape: f32[1,128], index: 3, kind: input, shape index: {}]   ;;  %s8008_s4 = inlined_call_operand.hbm [shape: f32[2,8,8,128], index: 4, kind: output, shape index: {}]  }
   0x1   :  { %11 = vsyncpa [#allocation4 + $0x1], 0 }
   0x2   :  { %12 = vsyncpa [#allocation7], 0 }
   0x3   :  { %13 = vsyncpa [#allocation5], 0 }
   0x4   :  { %15 = vsyncpa [#allocation5 + $0x1], 0  ;;  %s4967_s15 = smov 0   ;;  %s4969_s16 = smov 0  }
   0x5   :  { %s4971_s17 = smov 0   ;;  %s4973_s18 = smov 0  }
   0x6 LB: > { %s4988_s19 = sadd.s32 4294967295, %s4930_s18   ;;  %s4035_s20 = sadd.s32 4294967294, %s4930_s18   ;;  %s4930_s18 = sphi %s4973_s18, %s8794_s18   ;;  %s4926_s17 = sphi %s4971_s17, %s8793_s17   ;;  %s4922_s16 = sphi %s4969_s16, %s8792_s16   ;;  %s4918_s15 = sphi %s4967_s15, %s8791_s15  }
   0x7   : > { %p41_p0 = scmp.ne.s32.totalorder %s4922_s16, %s4918_s15  ;;  %p8009_p1 = scmp.eq.s32.totalorder %s4988_s19, 0 }
   0x8   : > { %p134_p3 = scmp.eq.s32.totalorder %s4035_s20, 1  ;;  %p4036_p5 = scmp.ge.s32.totalorder %s4930_s18, 1 }
   0x9   : > { %p4997_p4 = por %p8009_p1, %p41_p0  ;;  %p141_p7 = scmp.lt.s32.totalorder %s4930_s18, 3 }
   0xa   : > { %p5002_p6 = por %p134_p3, %p41_p0  ;;  %s4932_s24 = smov [#allocation6]  }
   0xb   : > { %s8196_s21 = scalar_select %p4997_p4, 1, 0 }
   0xc   : > { %s8197_s22 = scalar_select %p5002_p6, 1, 0 }
   0xd   : > { %p5007_p8 = pnand %p4036_p5, %p141_p7  ;;  %s153_s25 = sshll.u32 %s4932_s24, 4  ;;  %s5011_s25 = int_to_ptr.vmem [resolvable:$true] %s153_s25 }
   0xe   : > { %s5023_s27 = sadd.s32 1, %s4930_s18   ;;  %s28_s28 = sadd.s32 1, %s4926_s17 }
   0xf   : > { %s8198_s23 = scalar_select %p5007_p8, 1, 0 }
  0x10   : > { %p4711_p9 = pneg %p5007_p8  ;;  %s25_s29 = ssub.s32 %s4930_s18, %s5023_s27 }
  0x11   : > { %s4802_s6 = scalar_lea.hbm %s8005_s1, 18432 }
  0x12   : > { %p5018_p11 = pnand %p4711_p9, %p8009_p1  ;;  %p4803_p12 = scmp.ne.s32.totalorder %s8005_s1, %s4802_s6 }
  0x13   : > { %p4809_p5 = scmp.lt.u32.totalorder %s4802_s6, %s8005_s1 }
  0x14   : > { %p4804_p13 = pneg %p5018_p11 }
  0x16   : > { %p4805_p0 = pnand %p4804_p13, %p4803_p12 }
  0x18   : > { %p4806_p3 = pneg %p4805_p0 }
  0x1a   : > { %p4811_p7 = pnand %p4809_p5, %p4806_p3 }
  0x1c   : > { %4814 = shalt.err (!%p4811_p7)
}
  0x1d   : > { %s4815_s11 = scalar_lea.vmem %s5011_s25, 18432  ;;  %p4823_p2 = scmp.lt.s32.totalorder %s5011_s25, %s5011_s25 }
  0x1e   : > { %p4816_p9 = scmp.ne.s32.totalorder %s5011_s25, %s4815_s11  ;;  %p4824_p6 = scmp.lt.s32.totalorder %s4815_s11, %s4815_s11 }
  0x20   : > { %p4818_p10 = pnand %p4816_p9, %p4804_p13  ;;  %p4825_p4 = por %p4824_p6, %p4823_p2 }
  0x22   : > { %p4819_p1 = pneg %p4818_p10 }
  0x24   : > { %p4826_p8 = pnand %p4825_p4, %p4819_p1 }
  0x26   : > { %4829 = shalt.err (!%p4826_p8)
}
  0x27   : > { %s4933_s12 = smov 128   ;;  %s4934_s13 = smov 8  }
  0x28   : > { %4714 = dma.hbm_to_vmem [thread:$0]  (!%p5018_p11), %s8005_s1, 18432, %s5011_s25, [#allocation7], %s4933_s12, %s4933_s12, %s4934_s13  }
  0x29   : > { %p26_p1 = scmp.eq.s32.totalorder %s25_s29, 0  ;;  %p35_p2 = scmp.ne.s32.totalorder %s4926_s17, %s4922_s16 }
  0x2a   : > { %p36_p4 = scmp.eq.s32.totalorder %s4930_s18, 0  ;;  %p4724_p6 = scmp.lt.s32.totalorder %s4930_s18, 2 }
  0x2b   : > { %s5057_s24 = scalar_select %p26_p1, %s4926_s17, %s28_s28  }
  0x2c   : > { %p37_p8 = por %p36_p4, %p35_p2  ;;  %p8200_p10 = scmp.eq.s32.totalorder %s4988_s19, 1 }
  0x2d   : > { %s173_s26 = sand.u32 1, %s4926_s17   ;;  %s4181_s5 = sshll.u32 %s4930_s18, 12 }
  0x2e   : > { %p5061_p12 = por %p8200_p10, %p35_p2  ;;  %s4039_s6 = sshll.u32 %s173_s26, 8 }
  0x2f   : > { %s5070_s9 = scalar_lea.hbm %s8004_s0, %s4181_s5  ;;  %s177_s25 = scalar_lea.vmem [#allocation3], %s4039_s6 }
  0x30   : > { %s184_s28 = sshll.u32 %s177_s25, 4  ;;  %p5072_p11 = pnand %p4724_p6, %p37_p8  ;;  %s5076_s28 = int_to_ptr.vmem [resolvable:$true] %s184_s28 }
  0x31   : > { %s5078_s10 = scalar_lea.sflag [#allocation4], %s173_s26  ;;  %s4830_s11 = scalar_lea.hbm %s5070_s9, 4096 }
  0x32   : > { %p4831_p13 = scmp.ne.s32.totalorder %s5070_s9, %s4830_s11  ;;  %p4832_p0 = pneg %p5072_p11 }
  0x33   : > { %s4835_s5 = scalar_lea.hbm %s8004_s0, 8192  ;;  %p4836_p7 = scmp.lt.u32.totalorder %s5070_s9, %s8004_s0 }
  0x34   : > { %p4833_p3 = pnand %p4832_p0, %p4831_p13  ;;  %p4837_p9 = scmp.lt.u32.totalorder %s4835_s5, %s4830_s11 }
  0x35   : > { %p4839_p2 = scmp.lt.u32.totalorder %s4830_s11, %s5070_s9 }
  0x36   : > { %p4834_p5 = pneg %p4833_p3  ;;  %p4838_p1 = por %p4837_p9, %p4836_p7 }
  0x38   : > { %p4840_p4 = por %p4839_p2, %p4838_p1 }
  0x3a   : > { %p4841_p6 = pnand %p4840_p4, %p4834_p5 }
  0x3c   : > { %4844 = shalt.err (!%p4841_p6)
}
  0x3d   : > { %s4845_s26 = scalar_lea.vmem %s5076_s28, 4096  ;;  %s4935_s8 = smov [#allocation3]  }
  0x3e   : > { %p4846_p8 = scmp.ne.s32.totalorder %s5076_s28, %s4845_s26  ;;  %s4850_s25 = sshll.u32 %s4935_s8, 4  ;;  %s4851_s25 = int_to_ptr.vmem [resolvable:$false] %s4850_s25 }
  0x3f   : > { %s4852_s14 = scalar_lea.vmem %s4851_s25, 8192  ;;  %p4853_p3 = scmp.lt.s32.totalorder %s5076_s28, %s4851_s25 }
  0x40   : > { %p4848_p10 = pnand %p4846_p8, %p4832_p0  ;;  %p4854_p7 = scmp.lt.s32.totalorder %s4852_s14, %s4845_s26 }
  0x42   : > { %p4849_p13 = pneg %p4848_p10  ;;  %p4855_p9 = por %p4854_p7, %p4853_p3 }
  0x44   : > { %p4856_p1 = pnand %p4855_p9, %p4849_p13 }
  0x46   : > { %4859 = shalt.err (!%p4856_p1)
}
  0x47   : > { %4718 = dma.hbm_to_vmem [thread:$0]  (!%p5072_p11), %s5070_s9, 4096, %s5076_s28, %s5078_s10, %s4933_s12, %s4933_s12, %s4934_s13  }
  0x48   : > { %p8203_p0 = scmp.ne.s32.totalorder %s8198_s23, 0 }
  0x4a   : > { %196 = sbr.rel (%p8203_p0) target bundleno = 992 (0x3e0), region = 36 }
  0x51   : > { %s5112_s11 = sand.u32 1, %s4922_s16   ;;  %p8204_p5 = scmp.ne.s32.totalorder %s8196_s21, 0 }
  0x52   : > { %s4043_s20 = sshll.u32 %s5112_s11, 8  ;;  %s199_s5 = scalar_lea.sflag [#allocation4], %s5112_s11 }
  0x53   : > { %s5116_s6 = scalar_lea.vmem [#allocation3], %s4043_s20 }
  0x54   : > { %4905 = dma.done.wait (%p8204_p5), %s199_s5, 4096  }
  0x55   : > { %4907 = vsyncadd (%p8204_p5), %s199_s5, 4294963200  ;;  %p8205_p11 = scmp.eq.s32.totalorder %s4988_s19, 0 }
  0x57   : > { %4909 = dma.done.wait (%p8205_p11), [#allocation7], 18432   ;;  %p8206_p2 = pmov %p8205_p11 }
  0x58   : > { %v8017_v0 = vmov 0.0|0.0   ;;  %v4937_v1 = vmov 0.0   ;;  %v639_v2 = vld [vmem:[#allocation6] sm:$0xff]  ;;  %v640_v3 = vld [vmem:[#allocation6 + $0x8] sm:$0xff]  ;;  %v641_v7 = vld [vmem:[#allocation6 + $0x10] sm:$0xff]  ;;  %vm3859_vm0 = vcmask 1041409  }
  0x59   : > { %4911 = vsyncadd (%p8206_p2), [#allocation7], 4294948864  ;;  %4311 = vmatprep.subr.bf16.mxu1 %v8017_v0  ;;  %4359 = vmatprep.subr.bf16.mxu0 %v8017_v0  ;;  %231 = vst [vmem:[#allocation2] sm:$0xff] %v4937_v1  ;;  %v671_v4 = vld [vmem:[#allocation6 + $0x100] sm:$0xff]  ;;  %v4312_v5 = vpack.c.bf16 %v640_v3, %v639_v2  ;;  %v672_v6 = vld [vmem:[#allocation6 + $0x108] sm:$0xff]  ;;  %vm3861_vm1 = vcmask 1042434  }
  0x5a   : > { %232 = vst [vmem:[#allocation2 + $0x8] sm:$0xff] %v4937_v1  ;;  %233 = vst [vmem:[#allocation2 + $0x10] sm:$0x3] %v4937_v1  ;;  %v642_v8 = vld [vmem:[#allocation6 + $0x18] sm:$0xff]  ;;  %v4360_v9 = vpack.c.bf16 %v672_v6, %v671_v4  ;;  %v673_v10 = vld [vmem:[#allocation6 + $0x110] sm:$0xff]  ;;  %vm3863_vm2 = vcmask 1043459  }
  0x5b   : > { %234 = vst [vmem:[#allocation2 + $0x18] sm:$0xff] %v4937_v1  ;;  %235 = vst [vmem:[#allocation2 + $0x20] sm:$0xff] %v4937_v1  ;;  %v674_v11 = vld [vmem:[#allocation6 + $0x118] sm:$0xff]  ;;  %4313 = vmatpush1.bf16.msra.mxu1 %v4312_v5  ;;  %v4315_v12 = vpack.c.bf16 %v642_v8, %v641_v7  ;;  %v643_v14 = vld [vmem:[#allocation6 + $0x20] sm:$0xff]  ;;  %vm3865_vm3 = vcmask 1044484   ;;  %vm3867_vm4 = vcmask 1045509  }
  0x5c   : > { %236 = vst [vmem:[#allocation2 + $0x28] sm:$0x3] %v4937_v1  ;;  %237 = vst [vmem:[#allocation2 + $0x30] sm:$0xff] %v4937_v1  ;;  %4361 = vmatpush1.bf16.msra.mxu0 %v4360_v9  ;;  %4314 = vmatprep.subr.bf16.mxu1 %v8017_v0  ;;  %v4363_v13 = vpack.c.bf16 %v674_v11, %v673_v10  ;;  %v644_v15 = vld [vmem:[#allocation6 + $0x28] sm:$0xff]  ;;  %v675_v16 = vld [vmem:[#allocation6 + $0x120] sm:$0xff]  ;;  %vm3869_vm5 = vcmask 1046534  }
  0x5d   : > { %238 = vst [vmem:[#allocation2 + $0x38] sm:$0xff] %v4937_v1  ;;  %239 = vst [vmem:[#allocation2 + $0x40] sm:$0x3] %v4937_v1  ;;  %4362 = vmatprep.subr.bf16.mxu0 %v8017_v0  ;;  %v676_v17 = vld [vmem:[#allocation6 + $0x128] sm:$0xff]  ;;  %v4318_v18 = vpack.c.bf16 %v644_v15, %v643_v14  ;;  %v645_v20 = vld [vmem:[#allocation6 + $0x30] sm:$0xff]  ;;  %vm3871_vm6 = vcmask 1047559  }
  0x5e   : > { %240 = vst [vmem:[#allocation2 + $0x48] sm:$0xff] %v4937_v1  ;;  %241 = vst [vmem:[#allocation2 + $0x50] sm:$0xff] %v4937_v1  ;;  %v4366_v19 = vpack.c.bf16 %v676_v17, %v675_v16  ;;  %v646_v21 = vld [vmem:[#allocation6 + $0x38] sm:$0xff]  ;;  %v677_v22 = vld [vmem:[#allocation6 + $0x130] sm:$0xff]  ;;  %s4045_s9 = sshll.u32 %s5112_s11, 6  ;;  %s4182_s29 = sshll.u32 %s4988_s19, 10 }
  0x5f   : > { %242 = vst [vmem:[#allocation2 + $0x58] sm:$0x3] %v4937_v1  ;;  %243 = vst [vmem:[#allocation2 + $0x60] sm:$0xff] %v4937_v1  ;;  %4316 = vmatpush1.bf16.msra.mxu1 %v4315_v12  ;;  %v678_v23 = vld [vmem:[#allocation6 + $0x138] sm:$0xff]  ;;  %v4321_v24 = vpack.c.bf16 %v646_v21, %v645_v20  ;;  %v647_v26 = vld [vmem:[#allocation6 + $0x40] sm:$0xff]  ;;  %s6346_s28 = scalar_lea.vmem [#allocation8], %s4045_s9  ;;  %s7944_s26 = scalar_lea.hbm %s8008_s4, %s4182_s29 }
  0x60   : > { %244 = vst [vmem:[#allocation2 + $0x68] sm:$0xff] %v4937_v1  ;;  %245 = vst [vmem:[#allocation2 + $0x70] sm:$0x3] %v4937_v1  ;;  %4364 = vmatpush1.bf16.msra.mxu0 %v4363_v13  ;;  %4317 = vmatprep.subr.bf16.mxu1 %v8017_v0  ;;  %v4369_v25 = vpack.c.bf16 %v678_v23, %v677_v22  ;;  %v648_v27 = vld [vmem:[#allocation6 + $0x48] sm:$0xff]  ;;  %v679_v28 = vld [vmem:[#allocation6 + $0x140] sm:$0xff]  ;;  %s3952_s10 = sshll.u32 %s6346_s28, 4  ;;  %s7946_s10 = int_to_ptr.vmem [resolvable:$true] %s3952_s10 }
  0x61   : > { %246 = vst [vmem:[#allocation2 + $0x78] sm:$0xff] %v4937_v1  ;;  %247 = vst [vmem:[#allocation2 + $0x80] sm:$0xff] %v4937_v1  ;;  %4365 = vmatprep.subr.bf16.mxu0 %v8017_v0  ;;  %v680_v29 = vld [vmem:[#allocation6 + $0x148] sm:$0xff]  ;;  %v4324_v30 = vpack.c.bf16 %v648_v27, %v647_v26  ;;  %v649_v32 = vld [vmem:[#allocation6 + $0x50] sm:$0xff]  ;;  %s3939_s8 = scalar_lea.sflag [#allocation5], %s5112_s11  ;;  %s4860_s25 = scalar_lea.vmem %s7946_s10, 1024 }
  0x62   : > { %248 = vst [vmem:[#allocation2 + $0x88] sm:$0x3] %v4937_v1  ;;  %249 = vst [vmem:[#allocation2 + $0x90] sm:$0xff] %v4937_v1  ;;  %v4372_v31 = vpack.c.bf16 %v680_v29, %v679_v28  ;;  %v650_v33 = vld [vmem:[#allocation6 + $0x58] sm:$0xff]  ;;  %v681_v34 = vld [vmem:[#allocation6 + $0x150] sm:$0xff]  ;;  %p4861_p4 = scmp.ne.s32.totalorder %s7946_s10, %s4860_s25  ;;  %s4939_s14 = smov [#allocation8]  }
  0x63   : > { %250 = vst [vmem:[#allocation2 + $0x98] sm:$0xff] %v4937_v1  ;;  %251 = vst [vmem:[#allocation2 + $0xa0] sm:$0x3] %v4937_v1  ;;  %4319 = vmatpush1.bf16.msra.mxu1 %v4318_v18  ;;  %v682_v35 = vld [vmem:[#allocation6 + $0x158] sm:$0xff]  ;;  %v4327_v36 = vpack.c.bf16 %v650_v33, %v649_v32  ;;  %v651_v38 = vld [vmem:[#allocation6 + $0x60] sm:$0xff]  ;;  %s4864_s20 = sshll.u32 %s4939_s14, 4  ;;  %s4865_s20 = int_to_ptr.vmem [resolvable:$false] %s4864_s20 }
  0x64   : > { %252 = vst [vmem:[#allocation2 + $0xa8] sm:$0xff] %v4937_v1  ;;  %253 = vst [vmem:[#allocation2 + $0xb0] sm:$0xff] %v4937_v1  ;;  %4367 = vmatpush1.bf16.msra.mxu0 %v4366_v19  ;;  %4320 = vmatprep.subr.bf16.mxu1 %v8017_v0  ;;  %v4375_v37 = vpack.c.bf16 %v682_v35, %v681_v34  ;;  %v652_v39 = vld [vmem:[#allocation6 + $0x68] sm:$0xff]  ;;  %v683_v40 = vld [vmem:[#allocation6 + $0x160] sm:$0xff]  ;;  %p4862_p6 = pnand %p4861_p4, %p5061_p12  ;;  %s4866_s5 = scalar_lea.vmem %s4865_s20, 2048 }
  0x65   : > { %254 = vst [vmem:[#allocation2 + $0xb8] sm:$0x3] %v4937_v1  ;;  %255 = vst [vmem:[#allocation2 + $0xc0] sm:$0xff] %v4937_v1  ;;  %4368 = vmatprep.subr.bf16.mxu0 %v8017_v0  ;;  %v684_v41 = vld [vmem:[#allocation6 + $0x168] sm:$0xff]  ;;  %v382_v42 = vld [vmem:[#allocation2 + $0x1] sm:$0xff]  ;;  %v4330_v44 = vpack.c.bf16 %v652_v39, %v651_v38  ;;  %p4867_p10 = scmp.lt.s32.totalorder %s7946_s10, %s4865_s20  ;;  %p4868_p13 = scmp.lt.s32.totalorder %s4866_s5, %s4860_s25 }
  0x66   : > { %256 = vst [vmem:[#allocation2 + $0xc8] sm:$0xff] %v4937_v1  ;;  %257 = vst [vmem:[#allocation2 + $0xd0] sm:$0x3] %v4937_v1  ;;  %v5193_v43 = vld [vmem:[%s5116_s6] sm:$0xff]  ;;  %847 = vmatprep.mubr.f32.mxu1 %v382_v42  ;;  %v653_v45 = vld [vmem:[#allocation6 + $0x70] sm:$0xff]  ;;  %v4378_v47 = vpack.c.bf16 %v684_v41, %v683_v40  ;;  %p4863_p8 = pneg %p4862_p6 }
  0x67   : > { %258 = vst [vmem:[#allocation2 + $0xd8] sm:$0xff] %v4937_v1  ;;  %259 = vst [vmem:[#allocation2 + $0xe0] sm:$0xff] %v4937_v1  ;;  %4322 = vmatpush1.bf16.msra.mxu1 %v4321_v24  ;;  %v5197_v46 = vld [vmem:[%s5116_s6 + $0x8] sm:$0xff]  ;;  %v654_v48 = vld [vmem:[#allocation6 + $0x78] sm:$0xff]  ;;  %p4869_p3 = por %p4868_p13, %p4867_p10 }
  0x68   : > { %260 = vst [vmem:[#allocation2 + $0xe8] sm:$0x3] %v4937_v1  ;;  %261 = vst [vmem:[#allocation2 + $0xf0] sm:$0xff] %v4937_v1  ;;  %4370 = vmatpush1.bf16.msra.mxu0 %v4369_v25  ;;  %4323 = vmatprep.subr.bf16.mxu1 %v8017_v0  ;;  %v685_v49 = vld [vmem:[#allocation6 + $0x170] sm:$0xff]  ;;  %v686_v51 = vld [vmem:[#allocation6 + $0x178] sm:$0xff]  ;;  %v4333_v56 = vpack.c.bf16 %v654_v48, %v653_v45 }
  0x69   : > { %262 = vst [vmem:[#allocation2 + $0xf8] sm:$0xff] %v4937_v1  ;;  %263 = vst [vmem:[#allocation2 + $0x100] sm:$0x3] %v4937_v1  ;;  %4371 = vmatprep.subr.bf16.mxu0 %v8017_v0  ;;  %v5202_v50 = vld [vmem:[%s5116_s6 + $0x10] sm:$0xff]  ;;  %v5207_v52 = vld [vmem:[%s5116_s6 + $0x18] sm:$0xff]  ;;  %v4381_v60 = vpack.c.bf16 %v686_v51, %v685_v49  ;;  %p4870_p7 = pnand %p4869_p3, %p4863_p8 }
  0x6a   : > { %264 = vst [vmem:[#allocation2 + $0x108] sm:$0xff] %v4937_v1  ;;  %265 = vst [vmem:[#allocation2 + $0x110] sm:$0xff] %v4937_v1  ;;  %v5210_v53 = vld [vmem:[%s5116_s6 + $0x20] sm:$0xff]  ;;  %v5215_v54 = vld [vmem:[%s5116_s6 + $0x28] sm:$0xff] }
  0x6b   : > { %266 = vst [vmem:[#allocation2 + $0x118] sm:$0x3] %v4937_v1  ;;  %267 = vst [vmem:[#allocation2 + $0x120] sm:$0xff] %v4937_v1  ;;  %4325 = vmatpush1.bf16.msra.mxu1 %v4324_v30  ;;  %v5218_v55 = vld [vmem:[%s5116_s6 + $0x30] sm:$0xff]  ;;  %v655_v57 = vld [vmem:[#allocation6 + $0x80] sm:$0xff] }
  0x6c   : > { %268 = vst [vmem:[#allocation2 + $0x128] sm:$0xff] %v4937_v1  ;;  %269 = vst [vmem:[#allocation2 + $0x130] sm:$0x3] %v4937_v1  ;;  %4373 = vmatpush1.bf16.msra.mxu0 %v4372_v31  ;;  %4326 = vmatprep.subr.bf16.mxu1 %v8017_v0  ;;  %v656_v58 = vld [vmem:[#allocation6 + $0x88] sm:$0xff]  ;;  %v5223_v59 = vld [vmem:[%s5116_s6 + $0x38] sm:$0xff] }
  0x6d   : > { %270 = vst [vmem:[#allocation2 + $0x138] sm:$0xff] %v4937_v1  ;;  %271 = vst [vmem:[#allocation2 + $0x140] sm:$0xff] %v4937_v1  ;;  %4374 = vmatprep.subr.bf16.mxu0 %v8017_v0  ;;  %v687_v61 = vld [vmem:[#allocation6 + $0x180] sm:$0xff]  ;;  %v688_v62 = vld [vmem:[#allocation6 + $0x188] sm:$0xff]  ;;  %v4336_v6 = vpack.c.bf16 %v656_v58, %v655_v57 }
  0x6e   : > { %272 = vst [vmem:[#allocation2 + $0x148] sm:$0x3] %v4937_v1  ;;  %273 = vst [vmem:[#allocation2 + $0x150] sm:$0xff] %v4937_v1  ;;  %v5228_v63 = vld [vmem:[%s5116_s6 + $0x40] sm:$0xff]  ;;  %v5235_v3 = vld [vmem:[%s5116_s6 + $0x48] sm:$0xff]  ;;  %v4384_v7 = vpack.c.bf16 %v688_v62, %v687_v61 }
  0x6f   : > { %274 = vst [vmem:[#allocation2 + $0x158] sm:$0xff] %v4937_v1  ;;  %275 = vst [vmem:[#allocation2 + $0x160] sm:$0x3] %v4937_v1  ;;  %4328 = vmatpush1.bf16.msra.mxu1 %v4327_v36  ;;  %v5238_v4 = vld [vmem:[%s5116_s6 + $0x50] sm:$0xff]  ;;  %v5244_v5 = vld [vmem:[%s5116_s6 + $0x58] sm:$0xff] }
  0x70   : > { %276 = vst [vmem:[#allocation2 + $0x168] sm:$0xff] %v4937_v1  ;;  %277 = vst [vmem:[#allocation2 + $0x170] sm:$0xff] %v4937_v1  ;;  %4376 = vmatpush1.bf16.msra.mxu0 %v4375_v37  ;;  %4329 = vmatprep.subr.bf16.mxu1 %v8017_v0  ;;  %v657_v8 = vld [vmem:[#allocation6 + $0x90] sm:$0xff]  ;;  %v658_v9 = vld [vmem:[#allocation6 + $0x98] sm:$0xff] }
  0x71   : > { %278 = vst [vmem:[#allocation2 + $0x178] sm:$0x3] %v4937_v1  ;;  %279 = vst [vmem:[#allocation2 + $0x180] sm:$0xff] %v4937_v1  ;;  %4377 = vmatprep.subr.bf16.mxu0 %v8017_v0  ;;  %v5249_v10 = vld [vmem:[%s5116_s6 + $0x60] sm:$0xff]  ;;  %v689_v11 = vld [vmem:[#allocation6 + $0x190] sm:$0xff]  ;;  %v4339_v13 = vpack.c.bf16 %v658_v9, %v657_v8 }
  0x72   : > { %280 = vst [vmem:[#allocation2 + $0x188] sm:$0xff] %v4937_v1  ;;  %281 = vst [vmem:[#allocation2 + $0x190] sm:$0x3] %v4937_v1  ;;  %v690_v12 = vld [vmem:[#allocation6 + $0x198] sm:$0xff]  ;;  %v659_v15 = vld [vmem:[#allocation6 + $0xa0] sm:$0xff] }
  0x73   : > { %282 = vst [vmem:[#allocation2 + $0x198] sm:$0xff] %v4937_v1  ;;  %283 = vst [vmem:[#allocation2 + $0x1a0] sm:$0xff] %v4937_v1  ;;  %4331 = vmatpush1.bf16.msra.mxu1 %v4330_v44  ;;  %v4387_v14 = vpack.c.bf16 %v690_v12, %v689_v11  ;;  %v660_v16 = vld [vmem:[#allocation6 + $0xa8] sm:$0xff]  ;;  %v691_v17 = vld [vmem:[#allocation6 + $0x1a0] sm:$0xff] }
  0x74   : > { %284 = vst [vmem:[#allocation2 + $0x1a8] sm:$0x3] %v4937_v1  ;;  %318 = vst [vmem:[#allocation2 + $0x19] sm:$0xff] %v5193_v43  ;;  %4379 = vmatpush1.bf16.msra.mxu0 %v4378_v47  ;;  %4332 = vmatprep.subr.bf16.mxu1 %v8017_v0  ;;  %v692_v18 = vld [vmem:[#allocation6 + $0x1a8] sm:$0xff]  ;;  %v4342_v19 = vpack.c.bf16 %v660_v16, %v659_v15  ;;  %v661_v21 = vld [vmem:[#allocation6 + $0xb0] sm:$0xff] }
  0x75   : > { %319 = vst [vmem:[#allocation2 + $0x21] sm:$0xff] %v5197_v46  ;;  %320 = vst [vmem:[#allocation2 + $0x31] sm:$0xff] %v5202_v50  ;;  %4380 = vmatprep.subr.bf16.mxu0 %v8017_v0  ;;  %v4390_v20 = vpack.c.bf16 %v692_v18, %v691_v17  ;;  %v662_v22 = vld [vmem:[#allocation6 + $0xb8] sm:$0xff]  ;;  %v5257_v23 = vld [vmem:[%s5116_s6 + $0x68] sm:$0xff] }
  0x76   : > { %321 = vst [vmem:[#allocation2 + $0x39] sm:$0xff] %v5207_v52  ;;  %322 = vst [vmem:[#allocation2 + $0x49] sm:$0xff] %v5210_v53  ;;  %v693_v24 = vld [vmem:[#allocation6 + $0x1b0] sm:$0xff]  ;;  %v694_v25 = vld [vmem:[#allocation6 + $0x1b8] sm:$0xff]  ;;  %v4345_v28 = vpack.c.bf16 %v662_v22, %v661_v21 }
  0x77   : > { %323 = vst [vmem:[#allocation2 + $0x51] sm:$0xff] %v5215_v54  ;;  %324 = vst [vmem:[#allocation2 + $0x61] sm:$0xff] %v5218_v55  ;;  %4334 = vmatpush1.bf16.msra.mxu1 %v4333_v56  ;;  %v5262_v26 = vld [vmem:[%s5116_s6 + $0x70] sm:$0xff]  ;;  %v5266_v27 = vld [vmem:[%s5116_s6 + $0x78] sm:$0xff]  ;;  %v4393_v30 = vpack.c.bf16 %v694_v25, %v693_v24 }
  0x78   : > { %325 = vst [vmem:[#allocation2 + $0x69] sm:$0xff] %v5223_v59  ;;  %326 = vst [vmem:[#allocation2 + $0x79] sm:$0xff] %v5228_v63  ;;  %4382 = vmatpush1.bf16.msra.mxu0 %v4381_v60  ;;  %4335 = vmatprep.subr.bf16.mxu1 %v8017_v0  ;;  %v5270_v29 = vld [vmem:[%s5116_s6 + $0x80] sm:$0xff]  ;;  %v664_v32 = vld [vmem:[#allocation6 + $0xc8] sm:$0xff] }
  0x79   : > { %327 = vst [vmem:[#allocation2 + $0x81] sm:$0xff] %v5235_v3  ;;  %328 = vst [vmem:[#allocation2 + $0x91] sm:$0xff] %v5238_v4  ;;  %4383 = vmatprep.subr.bf16.mxu0 %v8017_v0  ;;  %v663_v31 = vld [vmem:[#allocation6 + $0xc0] sm:$0xff]  ;;  %v5275_v33 = vld [vmem:[%s5116_s6 + $0x88] sm:$0xff] }
  0x7a   : > { %329 = vst [vmem:[#allocation2 + $0x99] sm:$0xff] %v5244_v5  ;;  %330 = vst [vmem:[#allocation2 + $0xa9] sm:$0xff] %v5249_v10  ;;  %v695_v34 = vld [vmem:[#allocation6 + $0x1c0] sm:$0xff]  ;;  %v696_v35 = vld [vmem:[#allocation6 + $0x1c8] sm:$0xff]  ;;  %v4348_v38 = vpack.c.bf16 %v664_v32, %v663_v31 }
  0x7b   : > { %v5231_v2 = vld [vmem:[#allocation2 + $0x18] sm:$0xff]  ;;  %4337 = vmatpush1.bf16.msra.mxu1 %v4336_v6  ;;  %331 = vst [vmem:[#allocation2 + $0xb1] sm:$0xff] %v5257_v23  ;;  %332 = vst [vmem:[#allocation2 + $0xc1] sm:$0xff] %v5262_v26  ;;  %v5280_v36 = vld [vmem:[%s5116_s6 + $0x90] sm:$0xff]  ;;  %v4396_v40 = vpack.c.bf16 %v696_v35, %v695_v34 }
  0x7c   : > { %1072 = vmatprep.mubr.f32.mxu0 %v5231_v2  ;;  %4385 = vmatpush1.bf16.msra.mxu0 %v4384_v7  ;;  %333 = vst [vmem:[#allocation2 + $0xc9] sm:$0xff] %v5266_v27  ;;  %334 = vst [vmem:[#allocation2 + $0xd9] sm:$0xff] %v5270_v29  ;;  %v5284_v37 = vld [vmem:[%s5116_s6 + $0x98] sm:$0xff]  ;;  %v5288_v39 = vld [vmem:[%s5116_s6 + $0xa0] sm:$0xff] }
  0x7d   : > { %4338 = vmatprep.subr.bf16.mxu1 %v8017_v0  ;;  %4386 = vmatprep.subr.bf16.mxu0 %v8017_v0  ;;  %335 = vst [vmem:[#allocation2 + $0xe1] sm:$0xff] %v5275_v33  ;;  %336 = vst [vmem:[#allocation2 + $0xf1] sm:$0xff] %v5280_v36  ;;  %v665_v41 = vld [vmem:[#allocation6 + $0xd0] sm:$0xff]  ;;  %v666_v42 = vld [vmem:[#allocation6 + $0xd8] sm:$0xff] }
  0x7e   : > { %337 = vst [vmem:[#allocation2 + $0xf9] sm:$0xff] %v5284_v37  ;;  %338 = vst [vmem:[#allocation2 + $0x109] sm:$0xff] %v5288_v39  ;;  %v697_v44 = vld [vmem:[#allocation6 + $0x1d0] sm:$0xff]  ;;  %v698_v45 = vld [vmem:[#allocation6 + $0x1d8] sm:$0xff]  ;;  %v4351_v47 = vpack.c.bf16 %v666_v42, %v665_v41 }
  0x7f   : > { %4340 = vmatpush1.bf16.msra.mxu1 %v4339_v13  ;;  %v5294_v48 = vld [vmem:[%s5116_s6 + $0xa8] sm:$0xff]  ;;  %v4399_v49 = vpack.c.bf16 %v698_v45, %v697_v44  ;;  %v667_v51 = vld [vmem:[#allocation6 + $0xe0] sm:$0xff]  ;;  %v5300_v60 = vld [vmem:[%s5116_s6 + $0xb0] sm:$0xff] }
  0x80   : > { %4388 = vmatpush1.bf16.msra.mxu0 %v4387_v14  ;;  %4341 = vmatprep.subr.bf16.mxu1 %v8017_v0  ;;  %v668_v56 = vld [vmem:[#allocation6 + $0xe8] sm:$0xff]  ;;  %339 = vst [vmem:[#allocation2 + $0x111] sm:$0xff] %v5294_v48  ;;  %v699_v57 = vld [vmem:[#allocation6 + $0x1e0] sm:$0xff]  ;;  %340 = vst [vmem:[#allocation2 + $0x121] sm:$0xff] %v5300_v60 }
  0x81   : > { %4389 = vmatprep.subr.bf16.mxu0 %v8017_v0  ;;  %v700_v58 = vld [vmem:[#allocation6 + $0x1e8] sm:$0xff]  ;;  %v4354_v61 = vpack.c.bf16 %v668_v56, %v667_v51  ;;  %v669_v6 = vld [vmem:[#allocation6 + $0xf0] sm:$0xff]  ;;  %v670_v7 = vld [vmem:[#allocation6 + $0xf8] sm:$0xff] }
  0x82   : > { %v4402_v62 = vpack.c.bf16 %v700_v58, %v699_v57  ;;  %v5305_v8 = vld [vmem:[%s5116_s6 + $0xb8] sm:$0xff]  ;;  %v701_v9 = vld [vmem:[#allocation6 + $0x1f0] sm:$0xff]  ;;  %v5310_v12 = vld [vmem:[%s5116_s6 + $0xc0] sm:$0xff]  ;;  %v4357_v13 = vpack.c.bf16 %v670_v7, %v669_v6 }
  0x83   : > { %4343 = vmatpush1.bf16.msra.mxu1 %v4342_v19  ;;  %v702_v11 = vld [vmem:[#allocation6 + $0x1f8] sm:$0xff]  ;;  %341 = vst [vmem:[#allocation2 + $0x129] sm:$0xff] %v5305_v8  ;;  %342 = vst [vmem:[#allocation2 + $0x139] sm:$0xff] %v5310_v12  ;;  %v5315_v15 = vld [vmem:[%s5116_s6 + $0xc8] sm:$0xff] }
  0x84   : > { %4391 = vmatpush1.bf16.msra.mxu0 %v4390_v20  ;;  %4344 = vmatprep.subr.bf16.mxu1 %v8017_v0  ;;  %v4405_v14 = vpack.c.bf16 %v702_v11, %v701_v9  ;;  %v703_v16 = vld [vmem:[#allocation6 + $0x200] sm:$0xff]  ;;  %v704_v17 = vld [vmem:[#allocation6 + $0x208] sm:$0xff]  ;;  %343 = vst [vmem:[#allocation2 + $0x141] sm:$0xff] %v5315_v15  ;;  %v5320_v18 = vld [vmem:[%s5116_s6 + $0xd0] sm:$0xff] }
  0x85   : > { %4392 = vmatprep.subr.bf16.mxu0 %v8017_v0  ;;  %v735_v19 = vld [vmem:[#allocation6 + $0x300] sm:$0xff]  ;;  %v736_v20 = vld [vmem:[#allocation6 + $0x308] sm:$0xff]  ;;  %344 = vst [vmem:[#allocation2 + $0x151] sm:$0xff] %v5320_v18  ;;  %v5324_v21 = vld [vmem:[%s5116_s6 + $0xd8] sm:$0xff]  ;;  %v4408_v24 = vpack.c.bf16 %v704_v17, %v703_v16 }
  0x86   : > { %v414_v22 = vld [vmem:[#allocation2 + $0x2] sm:$0xff]  ;;  %345 = vst [vmem:[#allocation2 + $0x159] sm:$0xff] %v5324_v21  ;;  %v5329_v32 = vpack.c.bf16 %v736_v20, %v735_v19  ;;  %v5332_v34 = vld [vmem:[%s5116_s6 + $0xe0] sm:$0xff]  ;;  %v740_v57 = vld [vmem:[#allocation6 + $0x328] sm:$0xff] }
  0x87   : > { %4346 = vmatpush1.bf16.msra.mxu1 %v4345_v28  ;;  %v383_v25 = vld [vmem:[#allocation2 + $0x9] sm:$0xff]  ;;  %v705_v28 = vld [vmem:[#allocation6 + $0x210] sm:$0xff]  ;;  %346 = vst [vmem:[#allocation2 + $0x169] sm:$0xff] %v5332_v34  ;;  %v449_v6 = vld [vmem:[#allocation2 + $0x38] sm:$0xff] }
  0x88   : > { %4394 = vmatpush1.bf16.msra.mxu0 %v4393_v30  ;;  %4347 = vmatprep.subr.bf16.mxu1 %v8017_v0  ;;  %v447_v30 = vld [vmem:[#allocation2 + $0x20] sm:$0xff]  ;;  %v706_v31 = vld [vmem:[#allocation6 + $0x218] sm:$0xff]  ;;  %v707_v44 = vld [vmem:[#allocation6 + $0x220] sm:$0xff] }
  0x89   : > { %4395 = vmatprep.subr.bf16.mxu0 %v8017_v0  ;;  %v737_v35 = vld [vmem:[#allocation6 + $0x310] sm:$0xff]  ;;  %v415_v41 = vld [vmem:[#allocation2 + $0xa] sm:$0xff]  ;;  %v4411_v42 = vpack.c.bf16 %v706_v31, %v705_v28  ;;  %v712_v19 = vld [vmem:[#allocation6 + $0x248] sm:$0xff] }
  0x8a   : > { %v448_v45 = vld [vmem:[#allocation2 + $0x30] sm:$0xff]  ;;  %v5345_v51 = vld [vmem:[%s5116_s6 + $0xf0] sm:$0xff]  ;;  %v710_v7 = vld [vmem:[#allocation6 + $0x238] sm:$0xff] }
  0x8b   : > { %4349 = vmatpush1.bf16.msra.mxu1 %v4348_v38  ;;  %v738_v38 = vld [vmem:[#allocation6 + $0x318] sm:$0xff]  ;;  %8208 = vst [vmem:[#allocation13_spill] sm:$0xff] %v5345_v51  ;;  %v739_v56 = vld [vmem:[#allocation6 + $0x320] sm:$0xff]  ;;  %348 = vst [vmem:[#allocation2 + $0x181] sm:$0xff] %v5345_v51 }
  0x8c   : > { %4397 = vmatpush1.bf16.msra.mxu0 %v4396_v40  ;;  %4350 = vmatprep.subr.bf16.mxu1 %v8017_v0  ;;  %v5337_v40 = vld [vmem:[%s5116_s6 + $0xe8] sm:$0xff]  ;;  %v5358_v9 = vpack.c.bf16 %v740_v57, %v739_v56  ;;  %v742_v11 = vld [vmem:[#allocation6 + $0x338] sm:$0xff]  ;;  %v711_v17 = vld [vmem:[#allocation6 + $0x240] sm:$0xff] }
  0x8d   : > { %4398 = vmatprep.subr.bf16.mxu0 %v8017_v0  ;;  %8207 = vst [vmem:[#allocation12_spill] sm:$0xff] %v5337_v40  ;;  %347 = vst [vmem:[#allocation2 + $0x171] sm:$0xff] %v5337_v40  ;;  %v5351_v58 = vld [vmem:[#allocation2 + $0x1a] sm:$0xff]  ;;  %v450_v16 = vld [vmem:[#allocation2 + $0x48] sm:$0xff] }
  0x8e   : > { %v743_v20 = vld [vmem:[#allocation6 + $0x340] sm:$0xff]  ;;  %v713_v28 = vld [vmem:[#allocation6 + $0x250] sm:$0xff]  ;;  %v714_v31 = vld [vmem:[#allocation6 + $0x258] sm:$0xff] }
  0x8f   : > { %4352 = vmatpush1.bf16.msra.mxu1 %v4351_v47  ;;  %v708_v47 = vld [vmem:[#allocation6 + $0x228] sm:$0xff]  ;;  %v747_v56 = vld [vmem:[#allocation6 + $0x360] sm:$0xff]  ;;  %v765_v51 = vld [vmem:[#allocation6 + $0x3f0] sm:$0xff] }
  0x90   : > { %4400 = vmatpush1.bf16.msra.mxu0 %v4399_v49  ;;  %4353 = vmatprep.subr.bf16.mxu1 %v8017_v0  ;;  %v5342_v49 = vpack.c.bf16 %v738_v38, %v737_v35  ;;  %v745_v35 = vld [vmem:[#allocation6 + $0x350] sm:$0xff]  ;;  %v746_v38 = vld [vmem:[#allocation6 + $0x358] sm:$0xff]  ;;  %v748_v57 = vld [vmem:[#allocation6 + $0x368] sm:$0xff] }
  0x91   : > { %4401 = vmatprep.subr.bf16.mxu0 %v8017_v0 }
  0x93   : > { %4355 = vmatpush1.bf16.msra.mxu1 %v4354_v61  ;;  %v4414_v61 = vpack.c.bf16 %v708_v47, %v707_v44  ;;  %v715_v44 = vld [vmem:[#allocation6 + $0x260] sm:$0xff]  ;;  %v716_v47 = vld [vmem:[#allocation6 + $0x268] sm:$0xff] }
  0x94   : > { %4403 = vmatpush1.bf16.msra.mxu0 %v4402_v62  ;;  %4356 = vmatprep.subr.bf16.mxu1 %v8017_v0  ;;  %v5354_v62 = vld [vmem:[%s5116_s6 + $0xf8] sm:$0xff] }
  0x95   : > { %4404 = vmatprep.subr.bf16.mxu0 %v8017_v0  ;;  %8209 = vst [vmem:[#allocation14_spill] sm:$0xff] %v5354_v62  ;;  %349 = vst [vmem:[#allocation2 + $0x189] sm:$0xff] %v5354_v62 }
  0x97   : > { %4358 = vmatpush1.bf16.msra.mxu1 %v4357_v13  ;;  %v5365_v13 = vld [vmem:[#allocation2 + $0x22] sm:$0xff] }
  0x98   : > { %4406 = vmatpush1.bf16.msra.mxu0 %v4405_v14  ;;  %4535 = vmatprep.subr.bf16.mxu1 %v8017_v0 }
  0x99   : > { %4407 = vmatprep.subr.bf16.mxu0 %v8017_v0 }
  0x9a   : > { %848 = vmatmul.mubr.f32.vlgmr.msra.gmra.mrb[0].mxu1 %v4937_v1 }
  0x9b   : > { %1073 = vmatmul.mubr.f32.vlgmr.msra.gmra.mrb[0].mxu0 %v414_v22  ;;  %852 = vmatprep.mubr.f32.mxu1 %v383_v25  ;;  %v744_v22 = vld [vmem:[#allocation6 + $0x348] sm:$0xff]  ;;  %v451_v25 = vld [vmem:[#allocation2 + $0x50] sm:$0xff] }
  0x9c   : > { %4409 = vmatpush1.bf16.msra.mxu0 %v4408_v24  ;;  %1077 = vmatprep.mubr.f32.mxu0 %v447_v30  ;;  %v4420_v24 = vpack.c.bf16 %v712_v19, %v711_v17  ;;  %v454_v19 = vld [vmem:[#allocation2 + $0x78] sm:$0xff] }
  0x9d   : > { %4410 = vmatprep.subr.bf16.mxu0 %v8017_v0  ;;  %4551 = vmatpush1.bf16.msra.mxu1 %v5329_v32 }
  0x9e   : > { %853 = vmatmul.mubr.f32.gmra.mrb[2].mxu1 %v4937_v1  ;;  %4536 = vmatprep.subr.bf16.mxu1 %v8017_v0  ;;  %v709_v1 = vld [vmem:[#allocation6 + $0x230] sm:$0xff] }
  0x9f   : > { %1078 = vmatmul.mubr.f32.gmra.mrb[2].mxu0 %v415_v41  ;;  %857 = vmatprep.mubr.f32.mxu1 %v5193_v43  ;;  %v741_v43 = vld [vmem:[#allocation6 + $0x330] sm:$0xff]  ;;  %v4417_v14 = vpack.c.bf16 %v710_v7, %v709_v1  ;;  %v4423_v41 = vpack.c.bf16 %v714_v31, %v713_v28  ;;  %v453_v1 = vld [vmem:[#allocation2 + $0x68] sm:$0xff]  ;;  %v752_v28 = vld [vmem:[#allocation6 + $0x388] sm:$0xff] }
  0xa0   : > { %1082 = vmatprep.mubr.f32.mxu0 %v448_v45  ;;  %4412 = vmatpush1.bf16.msra.mxu0 %v4411_v42  ;;  %v452_v42 = vld [vmem:[#allocation2 + $0x60] sm:$0xff] }
  0xa1   : > { %4413 = vmatprep.subr.bf16.mxu0 %v8017_v0  ;;  %4552 = vmatpush1.bf16.msra.mxu1 %v5342_v49  ;;  %v717_v7 = vld [vmem:[#allocation6 + $0x270] sm:$0xff] }
  0xa2   : > { %858 = vmatmul.mubr.f32.gmra.mrb[4].mxu1 %v5231_v2  ;;  %4537 = vmatprep.subr.bf16.mxu1 %v8017_v0  ;;  %v5369_v2 = vpack.c.bf16 %v742_v11, %v741_v43  ;;  %v718_v43 = vld [vmem:[#allocation6 + $0x278] sm:$0xff]  ;;  %v749_v11 = vld [vmem:[#allocation6 + $0x370] sm:$0xff] }
  0xa3   : > { %1083 = vmatmul.mubr.f32.gmra.mrb[4].mxu0 %v5351_v58  ;;  %862 = vmatprep.mubr.f32.mxu1 %v5197_v46  ;;  %v5374_v46 = vld [vmem:[#allocation2 + $0x32] sm:$0xff]  ;;  %v4429_v17 = vpack.c.bf16 %v718_v43, %v717_v7 }
  0xa4   : > { %1087 = vmatprep.mubr.f32.mxu0 %v449_v6  ;;  %4415 = vmatpush1.bf16.msra.mxu0 %v4414_v61  ;;  %v4426_v61 = vpack.c.bf16 %v716_v47, %v715_v44  ;;  %v753_v44 = vld [vmem:[#allocation6 + $0x390] sm:$0xff]  ;;  %v754_v47 = vld [vmem:[#allocation6 + $0x398] sm:$0xff]  ;;  %v724_v7 = vld [vmem:[#allocation6 + $0x2a8] sm:$0xff] }
  0xa5   : > { %4416 = vmatprep.subr.bf16.mxu0 %v8017_v0  ;;  %4553 = vmatpush1.bf16.msra.mxu1 %v5358_v9  ;;  %v755_v43 = vld [vmem:[#allocation6 + $0x3a0] sm:$0xff] }
  0xa6   : > { %863 = vmatmul.mubr.f32.gmra.mrb[6].mxu1 %v447_v30  ;;  %4538 = vmatprep.subr.bf16.mxu1 %v8017_v0  ;;  %v5378_v30 = vpack.c.bf16 %v744_v22, %v743_v20  ;;  %v719_v20 = vld [vmem:[#allocation6 + $0x280] sm:$0xff]  ;;  %v720_v22 = vld [vmem:[#allocation6 + $0x288] sm:$0xff] }
  0xa7   : > { %1088 = vmatmul.mubr.f32.gmra.mrb[6].mxu0 %v5365_v13  ;;  %867 = vmatprep.mubr.f32.mxu1 %v5202_v50  ;;  %v5383_v50 = vld [vmem:[#allocation2 + $0x3a] sm:$0xff]  ;;  %v4432_v31 = vpack.c.bf16 %v720_v22, %v719_v20 }
  0xa8   : > { %1092 = vmatprep.mubr.f32.mxu0 %v450_v16  ;;  %4418 = vmatpush1.bf16.msra.mxu0 %v4417_v14  ;;  %v750_v14 = vld [vmem:[#allocation6 + $0x378] sm:$0xff]  ;;  %v725_v20 = vld [vmem:[#allocation6 + $0x2b0] sm:$0xff] }
  0xa9   : > { %4419 = vmatprep.subr.bf16.mxu0 %v8017_v0  ;;  %4554 = vmatpush1.bf16.msra.mxu1 %v5369_v2 }
  0xaa   : > { %868 = vmatmul.mubr.f32.gmra.mrb[8].mxu1 %v448_v45  ;;  %4539 = vmatprep.subr.bf16.mxu1 %v8017_v0  ;;  %v5387_v45 = vpack.c.bf16 %v746_v38, %v745_v35  ;;  %v455_v35 = vld [vmem:[#allocation2 + $0x80] sm:$0xff] }
  0xab   : > { %1093 = vmatmul.mubr.f32.gmra.mrb[8].mxu0 %v5374_v46  ;;  %872 = vmatprep.mubr.f32.mxu1 %v5207_v52  ;;  %v5392_v52 = vld [vmem:[#allocation2 + $0x4a] sm:$0xff]  ;;  %v721_v38 = vld [vmem:[#allocation6 + $0x290] sm:$0xff] }
  0xac   : > { %1097 = vmatprep.mubr.f32.mxu0 %v451_v25  ;;  %4421 = vmatpush1.bf16.msra.mxu0 %v4420_v24  ;;  %v751_v24 = vld [vmem:[#allocation6 + $0x380] sm:$0xff] }
  0xad   : > { %4422 = vmatprep.subr.bf16.mxu0 %v8017_v0  ;;  %4555 = vmatpush1.bf16.msra.mxu1 %v5378_v30 }
  0xae   : > { %873 = vmatmul.mubr.f32.gmra.mrb[10].mxu1 %v449_v6  ;;  %4540 = vmatprep.subr.bf16.mxu1 %v8017_v0  ;;  %v5396_v6 = vpack.c.bf16 %v748_v57, %v747_v56  ;;  %v5421_v57 = vld [vmem:[#allocation2 + $0x90] sm:$0xff] }
  0xaf   : > { %1098 = vmatmul.mubr.f32.gmra.mrb[10].mxu0 %v5383_v50  ;;  %877 = vmatprep.mubr.f32.mxu1 %v5210_v53  ;;  %v5401_v53 = vld [vmem:[#allocation2 + $0x52] sm:$0xff] }
  0xb0   : > { %1102 = vmatprep.mubr.f32.mxu0 %v452_v42  ;;  %4424 = vmatpush1.bf16.msra.mxu0 %v4423_v41  ;;  %v722_v41 = vld [vmem:[#allocation6 + $0x298] sm:$0xff] }
  0xb1   : > { %4425 = vmatprep.subr.bf16.mxu0 %v8017_v0  ;;  %4556 = vmatpush1.bf16.msra.mxu1 %v5387_v45  ;;  %v4435_v56 = vpack.c.bf16 %v722_v41, %v721_v38  ;;  %v5445_v38 = vld [vmem:[#allocation2 + $0xa8] sm:$0xff]  ;;  %v727_v41 = vld [vmem:[#allocation6 + $0x2c0] sm:$0xff] }
  0xb2   : > { %878 = vmatmul.mubr.f32.gmra.mrb[12].mxu1 %v450_v16  ;;  %4541 = vmatprep.subr.bf16.mxu1 %v8017_v0  ;;  %v5405_v16 = vpack.c.bf16 %v750_v14, %v749_v11  ;;  %v5431_v11 = vld [vmem:[#allocation2 + $0x7a] sm:$0xff] }
  0xb3   : > { %1103 = vmatmul.mubr.f32.gmra.mrb[12].mxu0 %v5392_v52  ;;  %882 = vmatprep.mubr.f32.mxu1 %v5215_v54  ;;  %v5410_v54 = vld [vmem:[#allocation2 + $0x62] sm:$0xff] }
  0xb4   : > { %1107 = vmatprep.mubr.f32.mxu0 %v453_v1  ;;  %4427 = vmatpush1.bf16.msra.mxu0 %v4426_v61  ;;  %v723_v61 = vld [vmem:[#allocation6 + $0x2a0] sm:$0xff] }
  0xb5   : > { %4428 = vmatprep.subr.bf16.mxu0 %v8017_v0  ;;  %4557 = vmatpush1.bf16.msra.mxu1 %v5396_v6  ;;  %v4438_v14 = vpack.c.bf16 %v724_v7, %v723_v61  ;;  %v5457_v7 = vld [vmem:[#allocation2 + $0xb0] sm:$0xff] }
  0xb6   : > { %883 = vmatmul.mubr.f32.gmra.mrb[14].mxu1 %v451_v25  ;;  %4542 = vmatprep.subr.bf16.mxu1 %v8017_v0  ;;  %v5414_v25 = vpack.c.bf16 %v752_v28, %v751_v24  ;;  %v758_v24 = vld [vmem:[#allocation6 + $0x3b8] sm:$0xff] }
  0xb7   : > { %1108 = vmatmul.mubr.f32.gmra.mrb[14].mxu0 %v5401_v53  ;;  %887 = vmatprep.mubr.f32.mxu1 %v5218_v55  ;;  %v5419_v55 = vld [vmem:[#allocation2 + $0x6a] sm:$0xff]  ;;  %v5443_v28 = vld [vmem:[#allocation2 + $0x82] sm:$0xff] }
  0xb8   : > { %1112 = vmatprep.mubr.f32.mxu0 %v454_v19  ;;  %4430 = vmatpush1.bf16.msra.mxu0 %v4429_v17  ;;  %v5433_v17 = vld [vmem:[#allocation2 + $0x98] sm:$0xff] }
  0xb9   : > { %4431 = vmatprep.subr.bf16.mxu0 %v8017_v0  ;;  %4558 = vmatpush1.bf16.msra.mxu1 %v5405_v16 }
  0xba   : > { %888 = vmatmul.mubr.f32.gmra.mrb[16].mxu1 %v452_v42  ;;  %4543 = vmatprep.subr.bf16.mxu1 %v8017_v0  ;;  %v5425_v42 = vpack.c.bf16 %v754_v47, %v753_v44  ;;  %v760_v47 = vld [vmem:[#allocation6 + $0x3c8] sm:$0xff] }
  0xbb   : > { %1113 = vmatmul.mubr.f32.gmra.mrb[16].mxu0 %v5410_v54  ;;  %892 = vmatprep.mubr.f32.mxu1 %v5223_v59  ;;  %v756_v59 = vld [vmem:[#allocation6 + $0x3a8] sm:$0xff] }
  0xbc   : > { %1117 = vmatprep.mubr.f32.mxu0 %v455_v35  ;;  %4433 = vmatpush1.bf16.msra.mxu0 %v4432_v31  ;;  %v5437_v22 = vpack.c.bf16 %v756_v59, %v755_v43  ;;  %v729_v43 = vld [vmem:[#allocation6 + $0x2d0] sm:$0xff] }
  0xbd   : > { %4434 = vmatprep.subr.bf16.mxu0 %v8017_v0  ;;  %4559 = vmatpush1.bf16.msra.mxu1 %v5414_v25 }
  0xbe   : > { %893 = vmatmul.mubr.f32.gmra.mrb[18].mxu1 %v453_v1  ;;  %4544 = vmatprep.subr.bf16.mxu1 %v8017_v0  ;;  %v726_v1 = vld [vmem:[#allocation6 + $0x2b8] sm:$0xff] }
  0xbf   : > { %1118 = vmatmul.mubr.f32.gmra.mrb[18].mxu0 %v5419_v55  ;;  %897 = vmatprep.mubr.f32.mxu1 %v5228_v63  ;;  %v757_v63 = vld [vmem:[#allocation6 + $0x3b0] sm:$0xff]  ;;  %v4441_v31 = vpack.c.bf16 %v726_v1, %v725_v20  ;;  %v762_v20 = vld [vmem:[#allocation6 + $0x3d8] sm:$0xff] }
  0xc0   : > { %1122 = vmatprep.mubr.f32.mxu0 %v5421_v57  ;;  %4436 = vmatpush1.bf16.msra.mxu0 %v4435_v56  ;;  %v5449_v44 = vpack.c.bf16 %v758_v24, %v757_v63  ;;  %v5455_v56 = vld [vmem:[#allocation2 + $0x92] sm:$0xff]  ;;  %v5468_v1 = vld [vmem:[#allocation2 + $0x9a] sm:$0xff] }
  0xc1   : > { %4437 = vmatprep.subr.bf16.mxu0 %v8017_v0  ;;  %4560 = vmatpush1.bf16.msra.mxu1 %v5425_v42  ;;  %v5470_v24 = vld [vmem:[#allocation2 + $0xc0] sm:$0xff] }
  0xc2   : > { %898 = vmatmul.mubr.f32.gmra.mrb[20].mxu1 %v454_v19  ;;  %4545 = vmatprep.subr.bf16.mxu1 %v8017_v0  ;;  %v728_v19 = vld [vmem:[#allocation6 + $0x2c8] sm:$0xff]  ;;  %8210 = vst [vmem:[#allocation15_spill] sm:$0xff] %v5449_v44 }
  0xc3   : > { %1123 = vmatmul.mubr.f32.gmra.mrb[20].mxu0 %v5431_v11  ;;  %902 = vmatprep.mubr.f32.mxu1 %v5235_v3  ;;  %v759_v3 = vld [vmem:[#allocation6 + $0x3c0] sm:$0xff]  ;;  %v4444_v61 = vpack.c.bf16 %v728_v19, %v727_v41  ;;  %v732_v41 = vld [vmem:[#allocation6 + $0x2e8] sm:$0xff] }
  0xc4   : > { %1127 = vmatprep.mubr.f32.mxu0 %v5433_v17  ;;  %4439 = vmatpush1.bf16.msra.mxu0 %v4438_v14  ;;  %v5461_v59 = vpack.c.bf16 %v760_v47, %v759_v3  ;;  %v761_v14 = vld [vmem:[#allocation6 + $0x3d0] sm:$0xff]  ;;  %v763_v3 = vld [vmem:[#allocation6 + $0x3e0] sm:$0xff]  ;;  %v764_v47 = vld [vmem:[#allocation6 + $0x3e8] sm:$0xff] }
  0xc5   : > { %4440 = vmatprep.subr.bf16.mxu0 %v8017_v0  ;;  %4561 = vmatpush1.bf16.msra.mxu1 %v5437_v22  ;;  %v5474_v19 = vpack.c.bf16 %v762_v20, %v761_v14  ;;  %v733_v14 = vld [vmem:[#allocation6 + $0x2f0] sm:$0xff]  ;;  %v734_v20 = vld [vmem:[#allocation6 + $0x2f8] sm:$0xff]  ;;  %v5487_v62 = vpack.c.bf16 %v764_v47, %v763_v3  ;;  %v5496_v3 = vld [vmem:[#allocation2 + $0xd8] sm:$0xff] }
  0xc6   : > { %903 = vmatmul.mubr.f32.gmra.mrb[22].mxu1 %v455_v35  ;;  %4546 = vmatprep.subr.bf16.mxu1 %v8017_v0  ;;  %v730_v35 = vld [vmem:[#allocation6 + $0x2d8] sm:$0xff]  ;;  %8211 = vst [vmem:[#allocation16_spill] sm:$0xff] %v5461_v59 }
  0xc7   : > { %1128 = vmatmul.mubr.f32.gmra.mrb[22].mxu0 %v5443_v28  ;;  %907 = vmatprep.mubr.f32.mxu1 %v5238_v4  ;;  %v4447_v63 = vpack.c.bf16 %v730_v35, %v729_v43  ;;  %8212 = vst [vmem:[#allocation17_spill] sm:$0xff] %v5474_v19  ;;  %v5483_v35 = vld [vmem:[#allocation2 + $0xc8] sm:$0xff]  ;;  %8214 = vst [vmem:[#allocation19_spill] sm:$0xff] %v5487_v62 }
  0xc8   : > { %1132 = vmatprep.mubr.f32.mxu0 %v5445_v38  ;;  %4442 = vmatpush1.bf16.msra.mxu0 %v4441_v31  ;;  %v731_v31 = vld [vmem:[#allocation6 + $0x2e0] sm:$0xff] }
  0xc9   : > { %4443 = vmatprep.subr.bf16.mxu0 %v8017_v0  ;;  %4562 = vmatpush1.bf16.msra.mxu1 %v5449_v44  ;;  %v4450_v43 = vpack.c.bf16 %v732_v41, %v731_v31  ;;  %v768_v31 = vld [vmem:[#allocation6 + $0x408] sm:$0xff] }
  0xca   : > { %908 = vmatmul.mubr.f32.gmra.mrb[24].mxu1 %v5421_v57  ;;  %4547 = vmatprep.subr.bf16.mxu1 %v8017_v0  ;;  %v5494_v41 = vld [vmem:[#allocation2 + $0xb2] sm:$0xff] }
  0xcb   : > { %1133 = vmatmul.mubr.f32.gmra.mrb[24].mxu0 %v5455_v56  ;;  %912 = vmatprep.mubr.f32.mxu1 %v5244_v5  ;;  %8215 = vst [vmem:[#allocation20_spill] sm:$0xff] %v5494_v41 }
  0xcc   : > { %1137 = vmatprep.mubr.f32.mxu0 %v5457_v7  ;;  %4445 = vmatpush1.bf16.msra.mxu0 %v4444_v61  ;;  %v5481_v61 = vld [vmem:[#allocation2 + $0xaa] sm:$0xff] }
  0xcd   : > { %4446 = vmatprep.subr.bf16.mxu0 %v8017_v0  ;;  %4563 = vmatpush1.bf16.msra.mxu1 %v5461_v59  ;;  %8213 = vst [vmem:[#allocation18_spill] sm:$0xff] %v5481_v61  ;;  %v766_v59 = vld [vmem:[#allocation6 + $0x3f8] sm:$0xff] }
  0xce   : > { %913 = vmatmul.mubr.f32.gmra.mrb[26].mxu1 %v5433_v17  ;;  %4548 = vmatprep.subr.bf16.mxu1 %v8017_v0  ;;  %v5500_v47 = vpack.c.bf16 %v766_v59, %v765_v51  ;;  %v5520_v51 = vld [vmem:[#allocation2 + $0xca] sm:$0xff] }
  0xcf   : > { %1138 = vmatmul.mubr.f32.gmra.mrb[26].mxu0 %v5468_v1  ;;  %917 = vmatprep.mubr.f32.mxu1 %v5249_v10  ;;  %8218 = vst [vmem:[#allocation23_spill] sm:$0xff] %v5520_v51  ;;  %v5522_v59 = vld [vmem:[#allocation2 + $0xf0] sm:$0xff] }
  0xd0   : > { %1142 = vmatprep.mubr.f32.mxu0 %v5470_v24  ;;  %4448 = vmatpush1.bf16.msra.mxu0 %v4447_v63  ;;  %v767_v63 = vld [vmem:[#allocation6 + $0x400] sm:$0xff]  ;;  %8216 = vst [vmem:[#allocation21_spill] sm:$0xff] %v5500_v47 }
  0xd1   : > { %4449 = vmatprep.subr.bf16.mxu0 %v8017_v0  ;;  %4564 = vmatpush1.bf16.msra.mxu1 %v5474_v19  ;;  %v4453_v19 = vpack.c.bf16 %v734_v20, %v733_v14  ;;  %v5504_v44 = vpack.c.bf16 %v768_v31, %v767_v63  ;;  %v5511_v14 = vld [vmem:[#allocation2 + $0xe0] sm:$0xff]  ;;  %v5530_v20 = vld [vmem:[#allocation2 + $0xf8] sm:$0xff]  ;;  %v5538_v31 = vld [vmem:[#allocation2 + $0x108] sm:$0xff] }
  0xd2   : > { %918 = vmatmul.mubr.f32.gmra.mrb[28].mxu1 %v5445_v38  ;;  %4549 = vmatprep.subr.bf16.mxu1 %v8017_v0  ;;  %v5536_v63 = vld [vmem:[#allocation2 + $0xe2] sm:$0xff] }
  0xd3   : > { %1143 = vmatmul.mubr.f32.gmra.mrb[28].mxu0 %v5481_v61  ;;  %922 = vmatprep.mubr.f32.mxu1 %v5257_v23  ;;  %8220 = vst [vmem:[#allocation25_spill] sm:$0xff] %v5536_v63  ;;  %v5586_v61 = vld [vmem:[#allocation2 + $0x150] sm:$0xff] }
  0xd4   : > { %1147 = vmatprep.mubr.f32.mxu0 %v5483_v35  ;;  %4451 = vmatpush1.bf16.msra.mxu0 %v4450_v43  ;;  %v5509_v43 = vld [vmem:[#allocation2 + $0xc2] sm:$0xff]  ;;  %8231 = vst [vmem:[#allocation36_spill] sm:$0xff] %v5586_v61 }
  0xd5   : > { %4452 = vmatprep.subr.bf16.mxu0 %v8017_v0  ;;  %4565 = vmatpush1.bf16.msra.mxu1 %v5487_v62  ;;  %8217 = vst [vmem:[#allocation22_spill] sm:$0xff] %v5509_v43  ;;  %v5554_v62 = vld [vmem:[#allocation2 + $0x120] sm:$0xff] }
  0xd6   : > { %923 = vmatmul.mubr.f32.gmra.mrb[30].mxu1 %v5457_v7  ;;  %4550 = vmatprep.subr.bf16.mxu1 %v8017_v0  ;;  %8223 = vst [vmem:[#allocation28_spill] sm:$0xff] %v5554_v62 }
  0xd7   : > { %1148 = vmatmul.mubr.f32.gmra.mrb[30].mxu0 %v5494_v41  ;;  %927 = vmatprep.mubr.f32.mxu1 %v5262_v26  ;;  %v5578_v41 = vld [vmem:[#allocation2 + $0x140] sm:$0xff] }
  0xd8   : > { %1152 = vmatprep.mubr.f32.mxu0 %v5496_v3  ;;  %4454 = vmatpush1.bf16.msra.mxu0 %v4453_v19  ;;  %v5528_v19 = vld [vmem:[#allocation2 + $0xda] sm:$0xff]  ;;  %8229 = vst [vmem:[#allocation34_spill] sm:$0xff] %v5578_v41 }
  0xd9   : > { %4566 = vmatpush1.bf16.msra.mxu1 %v5500_v47  ;;  %4455 = vmatprep.subr.bf16.mxu0 %v8017_v0  ;;  %8219 = vst [vmem:[#allocation24_spill] sm:$0xff] %v5528_v19  ;;  %v5544_v0 = vld [vmem:[#allocation2 + $0xf2] sm:$0xff] }
  0xda   : > { %928 = vmatmul.mubr.f32.gmra.mrb[32].mxu1 %v5470_v24  ;;  %4504 = vmatprep.subr.bf16.mxu1 %v5504_v44  ;;  %8221 = vst [vmem:[#allocation26_spill] sm:$0xff] %v5544_v0  ;;  %v5546_v47 = vld [vmem:[#allocation2 + $0x110] sm:$0xff] }
  0xdb   : > { %1153 = vmatmul.mubr.f32.gmra.mrb[32].mxu0 %v5509_v43  ;;  %932 = vmatprep.mubr.f32.mxu1 %v5266_v27  ;;  %v5570_v43 = vld [vmem:[#allocation2 + $0x138] sm:$0xff] }
  0xdc   : > { %1157 = vmatprep.mubr.f32.mxu0 %v5511_v14  ;;  %8227 = vst [vmem:[#allocation32_spill] sm:$0xff] %v5570_v43 }
  0xde   : > { %933 = vmatmul.mubr.f32.gmra.mrb[34].mxu1 %v5483_v35 }
  0xdf   : > { %1158 = vmatmul.mubr.f32.gmra.mrb[34].mxu0 %v5520_v51  ;;  %937 = vmatprep.mubr.f32.mxu1 %v5270_v29  ;;  %v5562_v51 = vld [vmem:[#allocation2 + $0x128] sm:$0xff] }
  0xe0   : > { %1162 = vmatprep.mubr.f32.mxu0 %v5522_v59  ;;  %8225 = vst [vmem:[#allocation30_spill] sm:$0xff] %v5562_v51 }
  0xe2   : > { %938 = vmatmul.mubr.f32.gmra.mrb[36].mxu1 %v5496_v3 }
  0xe3   : > { %1163 = vmatmul.mubr.f32.gmra.mrb[36].mxu0 %v5528_v19  ;;  %942 = vmatprep.mubr.f32.mxu1 %v5275_v33  ;;  %v5552_v19 = vld [vmem:[#allocation2 + $0xfa] sm:$0xff] }
  0xe4   : > { %1167 = vmatprep.mubr.f32.mxu0 %v5530_v20  ;;  %8222 = vst [vmem:[#allocation27_spill] sm:$0xff] %v5552_v19 }
  0xe6   : > { %943 = vmatmul.mubr.f32.gmra.mrb[38].mxu1 %v5511_v14 }
  0xe7   : > { %1168 = vmatmul.mubr.f32.gmra.mrb[38].mxu0 %v5536_v63  ;;  %947 = vmatprep.mubr.f32.mxu1 %v5280_v36  ;;  %v5560_v63 = vld [vmem:[#allocation2 + $0x10a] sm:$0xff] }
  0xe8   : > { %1172 = vmatprep.mubr.f32.mxu0 %v5538_v31  ;;  %8224 = vst [vmem:[#allocation29_spill] sm:$0xff] %v5560_v63 }
  0xea   : > { %948 = vmatmul.mubr.f32.gmra.mrb[40].mxu1 %v5522_v59 }
  0xeb   : > { %1173 = vmatmul.mubr.f32.gmra.mrb[40].mxu0 %v5544_v0  ;;  %952 = vmatprep.mubr.f32.mxu1 %v5284_v37  ;;  %v5568_v0 = vld [vmem:[#allocation2 + $0x112] sm:$0xff] }
  0xec   : > { %1177 = vmatprep.mubr.f32.mxu0 %v5546_v47  ;;  %8226 = vst [vmem:[#allocation31_spill] sm:$0xff] %v5568_v0 }
  0xee   : > { %953 = vmatmul.mubr.f32.gmra.mrb[42].mxu1 %v5530_v20 }
  0xef   : > { %1178 = vmatmul.mubr.f32.gmra.mrb[42].mxu0 %v5552_v19  ;;  %957 = vmatprep.mubr.f32.mxu1 %v5288_v39  ;;  %v5576_v19 = vld [vmem:[#allocation2 + $0x122] sm:$0xff] }
  0xf0   : > { %1182 = vmatprep.mubr.f32.mxu0 %v5554_v62  ;;  %8228 = vst [vmem:[#allocation33_spill] sm:$0xff] %v5576_v19 }
  0xf2   : > { %958 = vmatmul.mubr.f32.gmra.mrb[44].mxu1 %v5538_v31 }
  0xf3   : > { %1183 = vmatmul.mubr.f32.gmra.mrb[44].mxu0 %v5560_v63  ;;  %962 = vmatprep.mubr.f32.mxu1 %v5294_v48  ;;  %v5584_v63 = vld [vmem:[#allocation2 + $0x12a] sm:$0xff] }
  0xf4   : > { %1187 = vmatprep.mubr.f32.mxu0 %v5562_v51  ;;  %8230 = vst [vmem:[#allocation35_spill] sm:$0xff] %v5584_v63 }
  0xf6   : > { %963 = vmatmul.mubr.f32.gmra.mrb[46].mxu1 %v5546_v47 }
  0xf7   : > { %1188 = vmatmul.mubr.f32.gmra.mrb[46].mxu0 %v5568_v0  ;;  %967 = vmatprep.mubr.f32.mxu1 %v5300_v60  ;;  %v5592_v0 = vld [vmem:[#allocation2 + $0x13a] sm:$0xff] }
  0xf8   : > { %1192 = vmatprep.mubr.f32.mxu0 %v5570_v43  ;;  %8232 = vst [vmem:[#allocation37_spill] sm:$0xff] %v5592_v0 }
  0xfa   : > { %968 = vmatmul.mubr.f32.gmra.mrb[48].mxu1 %v5554_v62  ;;  %v5594_v62 = vld [vmem:[#allocation2 + $0x158] sm:$0xff] }
  0xfb   : > { %1193 = vmatmul.mubr.f32.gmra.mrb[48].mxu0 %v5576_v19  ;;  %972 = vmatprep.mubr.f32.mxu1 %v5305_v8  ;;  %v5600_v19 = vld [vmem:[#allocation2 + $0x142] sm:$0xff] }
  0xfc   : > { %1197 = vmatprep.mubr.f32.mxu0 %v5578_v41  ;;  %8233 = vst [vmem:[#allocation38_spill] sm:$0xff] %v5600_v19 }
  0xfe   : > { %973 = vmatmul.mubr.f32.gmra.mrb[50].mxu1 %v5562_v51  ;;  %v5602_v51 = vld [vmem:[#allocation2 + $0x168] sm:$0xff] }
  0xff   : > { %1198 = vmatmul.mubr.f32.gmra.mrb[50].mxu0 %v5584_v63  ;;  %977 = vmatprep.mubr.f32.mxu1 %v5310_v12  ;;  %8234 = vst [vmem:[#allocation39_spill] sm:$0xff] %v5602_v51  ;;  %v5608_v63 = vld [vmem:[#allocation2 + $0x152] sm:$0xff] }
 0x100   : > { %1202 = vmatprep.mubr.f32.mxu0 %v5586_v61  ;;  %8235 = vst [vmem:[#allocation40_spill] sm:$0xff] %v5608_v63 }
 0x102   : > { %978 = vmatmul.mubr.f32.gmra.mrb[52].mxu1 %v5570_v43  ;;  %v5610_v43 = vld [vmem:[#allocation2 + $0x170] sm:$0xff] }
 0x103   : > { %1203 = vmatmul.mubr.f32.gmra.mrb[52].mxu0 %v5592_v0  ;;  %982 = vmatprep.mubr.f32.mxu1 %v5315_v15  ;;  %v5616_v0 = vld [vmem:[#allocation2 + $0x15a] sm:$0xff] }
 0x104   : > { %1207 = vmatprep.mubr.f32.mxu0 %v5594_v62  ;;  %8236 = vst [vmem:[#allocation41_spill] sm:$0xff] %v5616_v0 }
 0x106   : > { %983 = vmatmul.mubr.f32.gmra.mrb[54].mxu1 %v5578_v41  ;;  %v5618_v41 = vld [vmem:[#allocation2 + $0x180] sm:$0xff] }
 0x107   : > { %1208 = vmatmul.mubr.f32.gmra.mrb[54].mxu0 %v5600_v19  ;;  %987 = vmatprep.mubr.f32.mxu1 %v5320_v18  ;;  %8237 = vst [vmem:[#allocation42_spill] sm:$0xff] %v5618_v41  ;;  %v5624_v19 = vld [vmem:[#allocation2 + $0x16a] sm:$0xff] }
 0x108   : > { %1212 = vmatprep.mubr.f32.mxu0 %v5602_v51  ;;  %8238 = vst [vmem:[#allocation43_spill] sm:$0xff] %v5624_v19 }
 0x10a   : > { %988 = vmatmul.mubr.f32.gmra.mrb[56].mxu1 %v5586_v61  ;;  %v5626_v61 = vld [vmem:[#allocation2 + $0x188] sm:$0xff] }
 0x10b   : > { %1213 = vmatmul.mubr.f32.gmra.mrb[56].mxu0 %v5608_v63  ;;  %992 = vmatprep.mubr.f32.mxu1 %v5324_v21  ;;  %8239 = vst [vmem:[#allocation44_spill] sm:$0xff] %v5626_v61  ;;  %v5632_v63 = vld [vmem:[#allocation2 + $0x172] sm:$0xff] }
 0x10c   : > { %1217 = vmatprep.mubr.f32.mxu0 %v5610_v43  ;;  %8240 = vst [vmem:[#allocation45_spill] sm:$0xff] %v5632_v63 }
 0x10e   : > { %993 = vmatmul.mubr.f32.gmra.mrb[58].mxu1 %v5594_v62 }
 0x10f   : > { %1218 = vmatmul.mubr.f32.gmra.mrb[58].mxu0 %v5616_v0  ;;  %997 = vmatprep.mubr.f32.mxu1 %v5332_v34  ;;  %v769_v0 = vld [vmem:[#allocation6 + $0x410] sm:$0xff] }
 0x110   : > { %1222 = vmatprep.mubr.f32.mxu0 %v5618_v41  ;;  %v770_v41 = vld [vmem:[#allocation6 + $0x418] sm:$0xff] }
 0x112   : > { %998 = vmatmul.mubr.f32.gmra.mrb[60].mxu1 %v5602_v51  ;;  %v4507_v51 = vpack.c.bf16 %v770_v41, %v769_v0  ;;  %v773_v0 = vld [vmem:[#allocation6 + $0x430] sm:$0xff] }
 0x113   : > { %1223 = vmatmul.mubr.f32.gmra.mrb[60].mxu0 %v5624_v19  ;;  %1002 = vmatprep.mubr.f32.mxu1 %v5337_v40  ;;  %v4769_v19 = vld [vmem:[#allocation2 + $0x19] sm:$0xff] }
 0x114   : > { %1227 = vmatprep.mubr.f32.mxu0 %v5626_v61  ;;  %v771_v61 = vld [vmem:[#allocation6 + $0x420] sm:$0xff]  ;;  %v772_v40 = vld [vmem:[#allocation6 + $0x428] sm:$0xff]  ;;  %v8258_v41 = vld [vmem:[#allocation26_spill] sm:$0xff] }
 0x116   : > { %1003 = vmatmul.mubr.f32.gmra.mrb[62].mxu1 %v5610_v43 }
 0x117   : > { %1228 = vmatmul.mubr.f32.gmra.mrb[62].mxu0 %v5632_v63  ;;  %1562 = vmatprep.mubr.f32.mxu1 %v5238_v4  ;;  %v8241_v63 = vmov 0.0|0.0   ;;  %v4511_v4 = vpack.c.bf16 %v772_v40, %v771_v61  ;;  %v775_v40 = vld [vmem:[#allocation6 + $0x440] sm:$0xff]  ;;  %v4785_v61 = vld [vmem:[#allocation2 + $0xd9] sm:$0xff] }
 0x118   : > { %1297 = vmatprep.mubr.f32.mxu0 %v5351_v58  ;;  %v4770_v58 = vld [vmem:[#allocation2 + $0x21] sm:$0xff] }
 0x11a   : > { %1563 = vmatmul.mubr.f32.vlgmr.msra.gmra.mrb[64].mxu1 %v5421_v57  ;;  %v776_v57 = vld [vmem:[#allocation6 + $0x448] sm:$0xff] }
 0x11b   : > { %1298 = vmatmul.mubr.f32.vlgmr.msra.gmra.mrb[0].mxu0 %v4769_v19  ;;  %1567 = vmatprep.mubr.f32.mxu1 %v5244_v5  ;;  %v774_v5 = vld [vmem:[#allocation6 + $0x438] sm:$0xff]  ;;  %v8265_v19 = vld [vmem:[#allocation14_spill] sm:$0xff] }
 0x11c   : > { %4457 = vmatpush1.bf16.msra.mxu0 %v5329_v32  ;;  %1302 = vmatprep.mubr.f32.mxu0 %v5365_v13  ;;  %v4515_v32 = vpack.c.bf16 %v774_v5, %v773_v0  ;;  %v4771_v13 = vld [vmem:[#allocation2 + $0x31] sm:$0xff]  ;;  %v606_v5 = vld [vmem:[#allocation2 + $0x1a1] sm:$0xff] }
 0x11d   : > { %4458 = vmatprep.subr.bf16.mxu0 %v8241_v63  ;;  %4506 = vmatpush3.bf16.msra.mxu1 %v5504_v44  ;;  %v782_v44 = vld [vmem:[#allocation6 + $0x478] sm:$0xff]  ;;  %v8268_v0 = vld [vmem:[#allocation33_spill] sm:$0xff] }
 0x11e   : > { %1568 = vmatmul.mubr.f32.gmra.mrb[66].mxu1 %v5433_v17  ;;  %4508 = vmatprep.subr.bf16.mxu1 %v4507_v51  ;;  %v778_v17 = vld [vmem:[#allocation6 + $0x458] sm:$0xff] }
 0x11f   : > { %1303 = vmatmul.mubr.f32.gmra.mrb[2].mxu0 %v4770_v58  ;;  %1572 = vmatprep.mubr.f32.mxu1 %v5249_v10  ;;  %v4519_v10 = vpack.c.bf16 %v776_v57, %v775_v40  ;;  %v4790_v58 = vld [vmem:[#allocation2 + $0x111] sm:$0xff]  ;;  %v4792_v57 = vld [vmem:[#allocation2 + $0x121] sm:$0xff] }
 0x120   : > { %1307 = vmatprep.mubr.f32.mxu0 %v5374_v46  ;;  %4460 = vmatpush1.bf16.msra.mxu0 %v5342_v49  ;;  %v4772_v49 = vld [vmem:[#allocation2 + $0x39] sm:$0xff] }
 0x121   : > { %4461 = vmatprep.subr.bf16.mxu0 %v8241_v63  ;;  %4510 = vmatpush3.bf16.msra.mxu1 %v4507_v51  ;;  %v777_v46 = vld [vmem:[#allocation6 + $0x450] sm:$0xff]  ;;  %v8262_v51 = vld [vmem:[#allocation13_spill] sm:$0xff] }
 0x122   : > { %1573 = vmatmul.mubr.f32.gmra.mrb[68].mxu1 %v5445_v38  ;;  %4512 = vmatprep.subr.bf16.mxu1 %v4511_v4  ;;  %v780_v38 = vld [vmem:[#allocation6 + $0x468] sm:$0xff] }
 0x123   : > { %1308 = vmatmul.mubr.f32.gmra.mrb[4].mxu0 %v4771_v13  ;;  %1577 = vmatprep.mubr.f32.mxu1 %v5257_v23  ;;  %v4523_v23 = vpack.c.bf16 %v778_v17, %v777_v46  ;;  %v4791_v13 = vld [vmem:[#allocation2] sm:$0xff] }
 0x124   : > { %1312 = vmatprep.mubr.f32.mxu0 %v5383_v50  ;;  %4463 = vmatpush1.bf16.msra.mxu0 %v5358_v9  ;;  %v4773_v9 = vld [vmem:[#allocation2 + $0x49] sm:$0xff] }
 0x125   : > { %4464 = vmatprep.subr.bf16.mxu0 %v8241_v63  ;;  %4514 = vmatpush3.bf16.msra.mxu1 %v4511_v4  ;;  %v779_v50 = vld [vmem:[#allocation6 + $0x460] sm:$0xff] }
 0x126   : > { %1578 = vmatmul.mubr.f32.gmra.mrb[70].mxu1 %v5457_v7  ;;  %4516 = vmatprep.subr.bf16.mxu1 %v4515_v32  ;;  %v8254_v7 = vld [vmem:[#allocation24_spill] sm:$0xff] }
 0x127   : > { %1313 = vmatmul.mubr.f32.gmra.mrb[6].mxu0 %v4772_v49  ;;  %1582 = vmatprep.mubr.f32.mxu1 %v5262_v26  ;;  %v4527_v26 = vpack.c.bf16 %v780_v38, %v779_v50  ;;  %v8267_v4 = vld [vmem:[#allocation44_spill] sm:$0xff]  ;;  %v8270_v50 = vld [vmem:[#allocation37_spill] sm:$0xff] }
 0x128   : > { %1317 = vmatprep.mubr.f32.mxu0 %v5392_v52  ;;  %4466 = vmatpush1.bf16.msra.mxu0 %v5369_v2  ;;  %v4774_v2 = vld [vmem:[#allocation2 + $0x51] sm:$0xff]  ;;  %v781_v52 = vld [vmem:[#allocation6 + $0x470] sm:$0xff] }
 0x129   : > { %4467 = vmatprep.subr.bf16.mxu0 %v8241_v63  ;;  %4518 = vmatpush3.bf16.msra.mxu1 %v4515_v32  ;;  %v607_v49 = vld [vmem:[#allocation2 + $0x32] sm:$0xff]  ;;  %v609_v38 = vld [vmem:[#allocation2 + $0x4a] sm:$0xff] }
 0x12a   : > { %1583 = vmatmul.mubr.f32.gmra.mrb[72].mxu1 %v5470_v24  ;;  %4520 = vmatprep.subr.bf16.mxu1 %v4519_v10  ;;  %v8256_v24 = vld [vmem:[#allocation36_spill] sm:$0xff] }
 0x12b   : > { %1318 = vmatmul.mubr.f32.gmra.mrb[8].mxu0 %v4773_v9  ;;  %1587 = vmatprep.mubr.f32.mxu1 %v5266_v27  ;;  %v4531_v27 = vpack.c.bf16 %v782_v44, %v781_v52  ;;  %v608_v9 = vld [vmem:[#allocation2 + $0x3a] sm:$0xff]  ;;  %v610_v44 = vld [vmem:[#allocation2 + $0x52] sm:$0xff] }
 0x12c   : > { %1322 = vmatprep.mubr.f32.mxu0 %v5401_v53  ;;  %4469 = vmatpush1.bf16.msra.mxu0 %v5378_v30  ;;  %v4775_v30 = vld [vmem:[#allocation2 + $0x61] sm:$0xff]  ;;  %v8244_v53 = vld [vmem:[#allocation28_spill] sm:$0xff]  ;;  %v4794_v52 = vld [vmem:[#allocation2 + $0x139] sm:$0xff] }
 0x12d   : > { %4470 = vmatprep.subr.bf16.mxu0 %v8241_v63  ;;  %4522 = vmatpush3.bf16.msra.mxu1 %v4519_v10  ;;  %v8269_v10 = vld [vmem:[#allocation35_spill] sm:$0xff] }
 0x12e   : > { %1588 = vmatmul.mubr.f32.gmra.mrb[74].mxu1 %v5483_v35  ;;  %4524 = vmatprep.subr.bf16.mxu1 %v4523_v23  ;;  %v4786_v35 = vld [vmem:[#allocation2 + $0xe1] sm:$0xff] }
 0x12f   : > { %1323 = vmatmul.mubr.f32.gmra.mrb[10].mxu0 %v4774_v2  ;;  %1592 = vmatprep.mubr.f32.mxu1 %v5270_v29  ;;  %v4776_v29 = vld [vmem:[#allocation2 + $0x69] sm:$0xff] }
 0x130   : > { %1327 = vmatprep.mubr.f32.mxu0 %v5410_v54  ;;  %4472 = vmatpush1.bf16.msra.mxu0 %v5387_v45  ;;  %v8242_v45 = vld [vmem:[#allocation18_spill] sm:$0xff]  ;;  %v8246_v54 = vld [vmem:[#allocation16_spill] sm:$0xff] }
 0x131   : > { %4473 = vmatprep.subr.bf16.mxu0 %v8241_v63  ;;  %4526 = vmatpush3.bf16.msra.mxu1 %v4523_v23  ;;  %v4793_v23 = vld [vmem:[#allocation2 + $0x129] sm:$0xff] }
 0x132   : > { %1593 = vmatmul.mubr.f32.gmra.mrb[76].mxu1 %v5496_v3  ;;  %4528 = vmatprep.subr.bf16.mxu1 %v4527_v26  ;;  %v4787_v3 = vld [vmem:[#allocation2 + $0xf1] sm:$0xff] }
 0x133   : > { %1328 = vmatmul.mubr.f32.gmra.mrb[12].mxu0 %v4775_v30  ;;  %1597 = vmatprep.mubr.f32.mxu1 %v5275_v33  ;;  %v4777_v33 = vld [vmem:[#allocation2 + $0x79] sm:$0xff]  ;;  %v611_v30 = vld [vmem:[#allocation2 + $0x62] sm:$0xff] }
 0x134   : > { %1332 = vmatprep.mubr.f32.mxu0 %v5419_v55  ;;  %4475 = vmatpush1.bf16.msra.mxu0 %v5396_v6  ;;  %v8243_v6 = vld [vmem:[#allocation15_spill] sm:$0xff]  ;;  %v8248_v55 = vld [vmem:[#allocation22_spill] sm:$0xff] }
 0x135   : > { %4476 = vmatprep.subr.bf16.mxu0 %v8241_v63  ;;  %4530 = vmatpush3.bf16.msra.mxu1 %v4527_v26 }
 0x136   : > { %1598 = vmatmul.mubr.f32.gmra.mrb[78].mxu1 %v5511_v14  ;;  %4532 = vmatprep.subr.bf16.mxu1 %v4531_v27  ;;  %v8261_v14 = vld [vmem:[#allocation27_spill] sm:$0xff] }
 0x137   : > { %1333 = vmatmul.mubr.f32.gmra.mrb[14].mxu0 %v4776_v29  ;;  %1602 = vmatprep.mubr.f32.mxu1 %v5280_v36  ;;  %v4778_v36 = vld [vmem:[#allocation2 + $0x81] sm:$0xff] }
 0x138   : > { %1337 = vmatprep.mubr.f32.mxu0 %v5431_v11  ;;  %4478 = vmatpush1.bf16.msra.mxu0 %v5405_v16  ;;  %v8245_v16 = vld [vmem:[#allocation20_spill] sm:$0xff] }
 0x139   : > { %4479 = vmatprep.subr.bf16.mxu0 %v8241_v63  ;;  %4534 = vmatpush3.bf16.msra.mxu1 %v4531_v27  ;;  %v8250_v11 = vld [vmem:[#allocation32_spill] sm:$0xff]  ;;  %v8271_v27 = vld [vmem:[#allocation38_spill] sm:$0xff] }
 0x13a   : > { %1603 = vmatmul.mubr.f32.gmra.mrb[80].mxu1 %v5522_v59  ;;  %v8264_v59 = vld [vmem:[#allocation42_spill] sm:$0xff] }
 0x13b   : > { %1338 = vmatmul.mubr.f32.gmra.mrb[16].mxu0 %v4777_v33  ;;  %1607 = vmatprep.mubr.f32.mxu1 %v5284_v37  ;;  %v4779_v37 = vld [vmem:[#allocation2 + $0x91] sm:$0xff] }
 0x13c   : > { %1342 = vmatprep.mubr.f32.mxu0 %v5443_v28  ;;  %4481 = vmatpush1.bf16.msra.mxu0 %v5414_v25  ;;  %v8247_v25 = vld [vmem:[#allocation30_spill] sm:$0xff]  ;;  %v8252_v28 = vld [vmem:[#allocation19_spill] sm:$0xff] }
 0x13d   : > { %4482 = vmatprep.subr.bf16.mxu0 %v8241_v63 }
 0x13e   : > { %1608 = vmatmul.mubr.f32.gmra.mrb[82].mxu1 %v5530_v20  ;;  %v8266_v20 = vld [vmem:[#allocation31_spill] sm:$0xff] }
 0x13f   : > { %1343 = vmatmul.mubr.f32.gmra.mrb[18].mxu0 %v4778_v36  ;;  %1612 = vmatprep.mubr.f32.mxu1 %v5288_v39  ;;  %v4780_v39 = vld [vmem:[#allocation2 + $0x99] sm:$0xff]  ;;  %v4795_v36 = vld [vmem:[#allocation2 + $0x141] sm:$0xff] }
 0x140   : > { %1347 = vmatprep.mubr.f32.mxu0 %v5455_v56  ;;  %4484 = vmatpush1.bf16.msra.mxu0 %v5425_v42  ;;  %v8249_v42 = vld [vmem:[#allocation17_spill] sm:$0xff]  ;;  %v8253_v56 = vld [vmem:[#allocation34_spill] sm:$0xff] }
 0x141   : > { %4485 = vmatprep.subr.bf16.mxu0 %v8241_v63 }
 0x142   : > { %1613 = vmatmul.mubr.f32.gmra.mrb[84].mxu1 %v5538_v31 }
 0x143   : > { %1348 = vmatmul.mubr.f32.gmra.mrb[20].mxu0 %v4779_v37  ;;  %1617 = vmatprep.mubr.f32.mxu1 %v5294_v48  ;;  %v4781_v48 = vld [vmem:[#allocation2 + $0xa9] sm:$0xff] }
 0x144   : > { %1352 = vmatprep.mubr.f32.mxu0 %v5468_v1  ;;  %4487 = vmatpush1.bf16.msra.mxu0 %v5437_v22  ;;  %v8251_v22 = vld [vmem:[#allocation23_spill] sm:$0xff]  ;;  %v8255_v1 = vld [vmem:[#allocation21_spill] sm:$0xff] }
 0x145   : > { %4488 = vmatprep.subr.bf16.mxu0 %v8241_v63  ;;  %v612_v37 = vld [vmem:[#allocation2 + $0x6a] sm:$0xff] }
 0x146   : > { %1618 = vmatmul.mubr.f32.gmra.mrb[86].mxu1 %v5546_v47  ;;  %v8260_v47 = vld [vmem:[#allocation12_spill] sm:$0xff] }
 0x147   : > { %1353 = vmatmul.mubr.f32.gmra.mrb[22].mxu0 %v4780_v39  ;;  %1622 = vmatprep.mubr.f32.mxu1 %v5300_v60  ;;  %v4782_v60 = vld [vmem:[#allocation2 + $0xb1] sm:$0xff] }
 0x148   : > { %1357 = vmatprep.mubr.f32.mxu0 %v8242_v45  ;;  %4490 = vmatpush1.bf16.msra.mxu0 %v8243_v6  ;;  %v8272_v39 = vld [vmem:[#allocation40_spill] sm:$0xff]  ;;  %v613_v45 = vld [vmem:[#allocation2 + $0x7a] sm:$0xff] }
 0x149   : > { %4491 = vmatprep.subr.bf16.mxu0 %v8241_v63 }
 0x14a   : > { %1623 = vmatmul.mubr.f32.gmra.mrb[88].mxu1 %v8244_v53 }
 0x14b   : > { %1358 = vmatmul.mubr.f32.gmra.mrb[24].mxu0 %v4781_v48  ;;  %1627 = vmatprep.mubr.f32.mxu1 %v5305_v8  ;;  %v4783_v8 = vld [vmem:[#allocation2 + $0xc1] sm:$0xff]  ;;  %v4796_v48 = vld [vmem:[#allocation2 + $0x151] sm:$0xff] }
 0x14c   : > { %1362 = vmatprep.mubr.f32.mxu0 %v8245_v16  ;;  %4493 = vmatpush1.bf16.msra.mxu0 %v8246_v54  ;;  %v614_v16 = vld [vmem:[#allocation2 + $0x82] sm:$0xff]  ;;  %v8273_v54 = vld [vmem:[#allocation41_spill] sm:$0xff] }
 0x14d   : > { %4494 = vmatprep.subr.bf16.mxu0 %v8241_v63 }
 0x14e   : > { %1628 = vmatmul.mubr.f32.gmra.mrb[90].mxu1 %v8247_v25  ;;  %v615_v25 = vld [vmem:[#allocation2 + $0x92] sm:$0xff] }
 0x14f   : > { %1363 = vmatmul.mubr.f32.gmra.mrb[26].mxu0 %v4782_v60  ;;  %1632 = vmatprep.mubr.f32.mxu1 %v5310_v12  ;;  %v4784_v12 = vld [vmem:[#allocation2 + $0xc9] sm:$0xff] }
 0x150   : > { %1367 = vmatprep.mubr.f32.mxu0 %v8248_v55  ;;  %4496 = vmatpush1.bf16.msra.mxu0 %v8249_v42  ;;  %v4797_v42 = vld [vmem:[#allocation2 + $0x159] sm:$0xff] }
 0x151   : > { %4497 = vmatprep.subr.bf16.mxu0 %v8241_v63 }
 0x152   : > { %1633 = vmatmul.mubr.f32.gmra.mrb[92].mxu1 %v8250_v11  ;;  %v616_v11 = vld [vmem:[#allocation2 + $0x9a] sm:$0xff] }
 0x153   : > { %1368 = vmatmul.mubr.f32.gmra.mrb[28].mxu0 %v4783_v8  ;;  %1637 = vmatprep.mubr.f32.mxu1 %v5315_v15  ;;  %v8257_v15 = vld [vmem:[#allocation25_spill] sm:$0xff]  ;;  %v8274_v8 = vld [vmem:[#allocation43_spill] sm:$0xff] }
 0x154   : > { %1372 = vmatprep.mubr.f32.mxu0 %v8251_v22  ;;  %4499 = vmatpush1.bf16.msra.mxu0 %v8252_v28  ;;  %v617_v22 = vld [vmem:[#allocation2 + $0xaa] sm:$0xff] }
 0x155   : > { %4500 = vmatprep.subr.bf16.mxu0 %v8241_v63  ;;  %v605_v63 = vld [vmem:[#allocation2 + $0x199] sm:$0xff] }
 0x156   : > { %1638 = vmatmul.mubr.f32.gmra.mrb[94].mxu1 %v8253_v56 }
 0x157   : > { %1373 = vmatmul.mubr.f32.gmra.mrb[30].mxu0 %v4784_v12  ;;  %1642 = vmatprep.mubr.f32.mxu1 %v5320_v18  ;;  %v8259_v18 = vld [vmem:[#allocation39_spill] sm:$0xff] }
 0x158   : > { %1377 = vmatprep.mubr.f32.mxu0 %v8254_v7  ;;  %4502 = vmatpush1.bf16.msra.mxu0 %v8255_v1  ;;  %v4798_v12 = vld [vmem:[#allocation2 + $0x169] sm:$0xff]  ;;  %v618_v7 = vld [vmem:[#allocation2 + $0xb2] sm:$0xff] }
 0x159   : > { %v8275_v1 = vld [vmem:[#allocation45_spill] sm:$0xff] }
 0x15a   : > { %1643 = vmatmul.mubr.f32.gmra.mrb[96].mxu1 %v8256_v24  ;;  %v619_v24 = vld [vmem:[#allocation2 + $0xc2] sm:$0xff] }
 0x15b   : > { %1378 = vmatmul.mubr.f32.gmra.mrb[32].mxu0 %v4785_v61  ;;  %1647 = vmatprep.mubr.f32.mxu1 %v5324_v21  ;;  %v4788_v21 = vld [vmem:[#allocation2 + $0xf9] sm:$0xff]  ;;  %v5758_v61 = vld [vmem:[#allocation2 + $0x182] sm:$0xff] }
 0x15c   : > { %1382 = vmatprep.mubr.f32.mxu0 %v8257_v15 }
 0x15e   : > { %1648 = vmatmul.mubr.f32.gmra.mrb[98].mxu1 %v5594_v62  ;;  %v8263_v62 = vld [vmem:[#allocation29_spill] sm:$0xff] }
 0x15f   : > { %1383 = vmatmul.mubr.f32.gmra.mrb[34].mxu0 %v4786_v35  ;;  %1652 = vmatprep.mubr.f32.mxu1 %v5332_v34  ;;  %v4789_v34 = vld [vmem:[#allocation2 + $0x109] sm:$0xff] }
 0x160   : > { %1387 = vmatprep.mubr.f32.mxu0 %v8258_v41  ;;  %v4799_v41 = vld [vmem:[#allocation2 + $0x171] sm:$0xff] }
 0x162   : > { %1653 = vmatmul.mubr.f32.gmra.mrb[100].mxu1 %v8259_v18  ;;  %v620_v18 = vld [vmem:[#allocation2 + $0xca] sm:$0xff] }
 0x163   : > { %1388 = vmatmul.mubr.f32.gmra.mrb[36].mxu0 %v4787_v3  ;;  %1657 = vmatprep.mubr.f32.mxu1 %v8260_v47  ;;  %v621_v3 = vld [vmem:[#allocation2 + $0xda] sm:$0xff]  ;;  %v5763_v47 = vld [vmem:[#allocation2 + $0x18a] sm:$0xff] }
 0x164   : > { %1392 = vmatprep.mubr.f32.mxu0 %v8261_v14 }
 0x166   : > { %1658 = vmatmul.mubr.f32.gmra.mrb[102].mxu1 %v5610_v43 }
 0x167   : > { %1393 = vmatmul.mubr.f32.gmra.mrb[38].mxu0 %v4788_v21  ;;  %1662 = vmatprep.mubr.f32.mxu1 %v8262_v51  ;;  %v4800_v51 = vld [vmem:[#allocation2 + $0x181] sm:$0xff] }
 0x168   : > { %1397 = vmatprep.mubr.f32.mxu0 %v8263_v62 }
 0x16a   : > { %1663 = vmatmul.mubr.f32.gmra.mrb[104].mxu1 %v8264_v59  ;;  %v622_v59 = vld [vmem:[#allocation2 + $0xe2] sm:$0xff] }
 0x16b   : > { %1398 = vmatmul.mubr.f32.gmra.mrb[40].mxu0 %v4789_v34  ;;  %1667 = vmatprep.mubr.f32.mxu1 %v8265_v19  ;;  %v623_v34 = vld [vmem:[#allocation2 + $0xf2] sm:$0xff] }
 0x16c   : > { %1402 = vmatprep.mubr.f32.mxu0 %v8266_v20  ;;  %v575_v19 = vld [vmem:[#allocation2 + $0x31] sm:$0xff] }
 0x16d   : > { %v5733_v31 = vpop.f32.mrb[0].mxu1 }
 0x16e   : > { %1668 = vmatmul.mubr.f32.gmra.mrb[106].mxu1 %v8267_v4  ;;  %v851_v43 = vpop.f32.mrb[1].mxu1 }
 0x16f   : > { %1403 = vmatmul.mubr.f32.gmra.mrb[42].mxu0 %v4790_v58  ;;  %1672 = vmatprep.mubr.f32.mxu1 %v605_v63  ;;  %v4801_v43 = vld [vmem:[#allocation2 + $0x189] sm:$0xff]  ;;  %v624_v58 = vld [vmem:[#allocation2 + $0xfa] sm:$0xff] }
 0x170   : > { %1407 = vmatprep.mubr.f32.mxu0 %v8268_v0 }
 0x171   : > { %v5737_v32 = vpop.f32.mrb[2].mxu1 }
 0x172   : > { %1673 = vmatmul.mubr.f32.gmra.mrb[108].mxu1 %v4791_v13  ;;  %v856_v40 = vpop.f32.mrb[3].mxu1 }
 0x173   : > { %1408 = vmatmul.mubr.f32.gmra.mrb[44].mxu0 %v4792_v57  ;;  %1677 = vmatprep.mubr.f32.mxu1 %v606_v5  ;;  %v543_v5 = vld [vmem:[#allocation2 + $0x30] sm:$0xff] }
 0x174   : > { %1412 = vmatprep.mubr.f32.mxu0 %v8269_v10 }
 0x175   : > { %v5740_v46 = vpop.f32.mrb[4].mxu1 }
 0x176   : > { %1678 = vmatmul.mubr.f32.gmra.mrb[110].mxu1 %v4791_v13  ;;  %v861_v17 = vpop.f32.mrb[5].mxu1  ;;  %v576_v13 = vld [vmem:[#allocation2 + $0x39] sm:$0xff] }
 0x177   : > { %1413 = vmatmul.mubr.f32.gmra.mrb[46].mxu0 %v4793_v23  ;;  %4263 = vmatprep.mubr.f32.mxu1 %v607_v49  ;;  %v544_v49 = vld [vmem:[#allocation2 + $0x38] sm:$0xff]  ;;  %v577_v17 = vld [vmem:[#allocation2 + $0x49] sm:$0xff] }
 0x178   : > { %1417 = vmatprep.mubr.f32.mxu0 %v8270_v50 }
 0x179   : > { %v5743_v26 = vpop.f32.mrb[6].mxu1 }
 0x17a   : > { %4264 = vmatmul.mubr.f32.vlgmr.msra.gmra.mrb[112].mxu1 %v608_v9  ;;  %v866_v2 = vpop.f32.mrb[7].mxu1 }
 0x17b   : > { %1418 = vmatmul.mubr.f32.gmra.mrb[48].mxu0 %v4794_v52  ;;  %4266 = vmatprep.mubr.f32.mxu1 %v609_v38  ;;  %v545_v38 = vld [vmem:[#allocation2 + $0x48] sm:$0xff]  ;;  %v578_v2 = vld [vmem:[#allocation2 + $0x51] sm:$0xff] }
 0x17c   : > { %1422 = vmatprep.mubr.f32.mxu0 %v8271_v27 }
 0x17d   : > { %v5746_v29 = vpop.f32.mrb[8].mxu1 }
 0x17e   : > { %4267 = vmatmul.mubr.f32.gmra.mrb[114].mxu1 %v610_v44  ;;  %v871_v33 = vpop.f32.mrb[9].mxu1 }
 0x17f   : > { %1423 = vmatmul.mubr.f32.gmra.mrb[50].mxu0 %v4795_v36  ;;  %4269 = vmatprep.mubr.f32.mxu1 %v611_v30  ;;  %v579_v30 = vld [vmem:[#allocation2 + $0x61] sm:$0xff]  ;;  %v580_v36 = vld [vmem:[#allocation2 + $0x69] sm:$0xff] }
 0x180   : > { %1427 = vmatprep.mubr.f32.mxu0 %v8272_v39 }
 0x181   : > { %v5749_v6 = vpop.f32.mrb[10].mxu1 }
 0x182   : > { %4270 = vmatmul.mubr.f32.gmra.mrb[116].mxu1 %v612_v37  ;;  %v876_v53 = vpop.f32.mrb[11].mxu1 }
 0x183   : > { %1428 = vmatmul.mubr.f32.gmra.mrb[52].mxu0 %v4796_v48  ;;  %4272 = vmatprep.mubr.f32.mxu1 %v613_v45  ;;  %v581_v45 = vld [vmem:[#allocation2 + $0x79] sm:$0xff] }
 0x184   : > { %1432 = vmatprep.mubr.f32.mxu0 %v8273_v54  ;;  %v637_v48 = vld [vmem:[#allocation2 + $0x19a] sm:$0xff] }
 0x185   : > { %v5752_v60 = vpop.f32.mrb[12].mxu1 }
 0x186   : > { %4273 = vmatmul.mubr.f32.gmra.mrb[118].mxu1 %v614_v16  ;;  %v881_v55 = vpop.f32.mrb[13].mxu1  ;;  %v582_v16 = vld [vmem:[#allocation2 + $0x81] sm:$0xff] }
 0x187   : > { %1433 = vmatmul.mubr.f32.gmra.mrb[54].mxu0 %v4797_v42  ;;  %4275 = vmatprep.mubr.f32.mxu1 %v615_v25  ;;  %v638_v55 = vld [vmem:[#allocation2 + $0x1a2] sm:$0xff] }
 0x188   : > { %1437 = vmatprep.mubr.f32.mxu0 %v8274_v8  ;;  %v550_v42 = vld [vmem:[#allocation2 + $0x80] sm:$0xff] }
 0x189   : > { %v5755_v28 = vpop.f32.mrb[14].mxu1 }
 0x18a   : > { %4276 = vmatmul.mubr.f32.gmra.mrb[120].mxu1 %v616_v11  ;;  %v886_v56 = vpop.f32.mrb[15].mxu1 }
 0x18b   : > { %1438 = vmatmul.mubr.f32.gmra.mrb[56].mxu0 %v4798_v12  ;;  %4278 = vmatprep.mubr.f32.mxu1 %v617_v22 }
 0x18c   : > { %1442 = vmatprep.mubr.f32.mxu0 %v8275_v1 }
 0x18d   : > { %v5760_v15 = vpop.f32.mrb[16].mxu1 }
 0x18e   : > { %4279 = vmatmul.mubr.f32.gmra.mrb[122].mxu1 %v618_v7  ;;  %v891_v35 = vpop.f32.mrb[17].mxu1 }
 0x18f   : > { %1443 = vmatmul.mubr.f32.gmra.mrb[58].mxu0 %v4799_v41  ;;  %4281 = vmatprep.mubr.f32.mxu1 %v619_v24 }
 0x190   : > { %1447 = vmatprep.mubr.f32.mxu0 %v5758_v61 }
 0x191   : > { %v5765_v14 = vpop.f32.mrb[18].mxu1 }
 0x192   : > { %4282 = vmatmul.mubr.f32.gmra.mrb[124].mxu1 %v620_v18  ;;  %v896_v21 = vpop.f32.mrb[19].mxu1 }
 0x193   : > { %1448 = vmatmul.mubr.f32.gmra.mrb[60].mxu0 %v4800_v51  ;;  %4284 = vmatprep.mubr.f32.mxu1 %v621_v3 }
 0x194   : > { %1452 = vmatprep.mubr.f32.mxu0 %v5763_v47 }
 0x195   : > { %v5768_v63 = vpop.f32.mrb[20].mxu1 }
 0x196   : > { %4285 = vmatmul.mubr.f32.gmra.mrb[126].mxu1 %v622_v59  ;;  %v901_v4 = vpop.f32.mrb[21].mxu1 }
 0x197   : > { %1453 = vmatmul.mubr.f32.gmra.mrb[62].mxu0 %v4801_v43  ;;  %4287 = vmatprep.mubr.f32.mxu1 %v623_v34 }
 0x198   : > { %1522 = vmatprep.mubr.f32.mxu0 %v575_v19 }
 0x199   : > { %v5770_v40 = vpop.f32.mrb[22].mxu1 }
 0x19a   : > { %4288 = vmatmul.mubr.f32.gmra.mrb[128].mxu1 %v624_v58  ;;  %v906_v57 = vpop.f32.mrb[23].mxu1 }
 0x19b   : > { %1523 = vmatmul.mubr.f32.vlgmr.msra.gmra.mrb[0].mxu0 %v543_v5  ;;  %4290 = vmatprep.mubr.f32.mxu1 %v8263_v62  ;;  %v546_v62 = vld [vmem:[#allocation2 + $0x50] sm:$0xff] }
 0x19c   : > { %1527 = vmatprep.mubr.f32.mxu0 %v576_v13 }
 0x19d   : > { %v5773_v23 = vpop.f32.mrb[24].mxu1 }
 0x19e   : > { %4291 = vmatmul.mubr.f32.gmra.mrb[130].mxu1 %v8266_v20  ;;  %v911_v9 = vpop.f32.mrb[25].mxu1 }
 0x19f   : > { %1528 = vmatmul.mubr.f32.gmra.mrb[2].mxu0 %v544_v49  ;;  %4293 = vmatprep.mubr.f32.mxu1 %v8268_v0  ;;  %v547_v0 = vld [vmem:[#allocation2 + $0x60] sm:$0xff] }
 0x1a0   : > { %1532 = vmatprep.mubr.f32.mxu0 %v577_v17 }
 0x1a1   : > { %v5777_v52 = vpop.f32.mrb[26].mxu1 }
 0x1a2   : > { %4294 = vmatmul.mubr.f32.gmra.mrb[132].mxu1 %v8269_v10  ;;  %v916_v44 = vpop.f32.mrb[27].mxu1 }
 0x1a3   : > { %1533 = vmatmul.mubr.f32.gmra.mrb[4].mxu0 %v545_v38  ;;  %4296 = vmatprep.mubr.f32.mxu1 %v8270_v50  ;;  %v548_v50 = vld [vmem:[#allocation2 + $0x68] sm:$0xff] }
 0x1a4   : > { %1537 = vmatprep.mubr.f32.mxu0 %v578_v2 }
 0x1a5   : > { %v5781_v33 = vpop.f32.mrb[28].mxu1 }
 0x1a6   : > { %4297 = vmatmul.mubr.f32.gmra.mrb[134].mxu1 %v8271_v27  ;;  %v921_v20 = vpop.f32.mrb[29].mxu1 }
 0x1a7   : > { %1538 = vmatmul.mubr.f32.gmra.mrb[6].mxu0 %v546_v62  ;;  %4299 = vmatprep.mubr.f32.mxu1 %v8272_v39  ;;  %v549_v39 = vld [vmem:[#allocation2 + $0x78] sm:$0xff] }
 0x1a8   : > { %1542 = vmatprep.mubr.f32.mxu0 %v579_v30 }
 0x1a9   : > { %v5785_v37 = vpop.f32.mrb[30].mxu1 }
 0x1aa   : > { %4300 = vmatmul.mubr.f32.gmra.mrb[136].mxu1 %v8273_v54  ;;  %v926_v10 = vpop.f32.mrb[31].mxu1 }
 0x1ab   : > { %1543 = vmatmul.mubr.f32.gmra.mrb[8].mxu0 %v547_v0  ;;  %4302 = vmatprep.mubr.f32.mxu1 %v8274_v8 }
 0x1ac   : > { %1547 = vmatprep.mubr.f32.mxu0 %v580_v36 }
 0x1ad   : > { %v5789_v53 = vpop.f32.mrb[32].mxu1 }
 0x1ae   : > { %4303 = vmatmul.mubr.f32.gmra.mrb[138].mxu1 %v8275_v1  ;;  %v931_v27 = vpop.f32.mrb[33].mxu1 }
 0x1af   : > { %1548 = vmatmul.mubr.f32.gmra.mrb[10].mxu0 %v548_v50  ;;  %4305 = vmatprep.mubr.f32.mxu1 %v5758_v61 }
 0x1b0   : > { %1552 = vmatprep.mubr.f32.mxu0 %v581_v45 }
 0x1b1   : > { %v5793_v54 = vpop.f32.mrb[34].mxu1 }
 0x1b2   : > { %4306 = vmatmul.mubr.f32.gmra.mrb[140].mxu1 %v5763_v47  ;;  %v936_v25 = vpop.f32.mrb[35].mxu1 }
 0x1b3   : > { %1553 = vmatmul.mubr.f32.gmra.mrb[12].mxu0 %v549_v39  ;;  %4308 = vmatprep.mubr.f32.mxu1 %v637_v48 }
 0x1b4   : > { %1557 = vmatprep.mubr.f32.mxu0 %v582_v16 }
 0x1b5   : > { %v5796_v11 = vpop.f32.mrb[36].mxu1 }
 0x1b6   : > { %4309 = vmatmul.mubr.f32.gmra.mrb[142].mxu1 %v638_v55  ;;  %v941_v8 = vpop.f32.mrb[37].mxu1 }
 0x1b7   : > { %1558 = vmatmul.mubr.f32.gmra.mrb[14].mxu0 %v550_v42 }
 0x1b9   : > { %v5798_v22 = vpop.f32.mrb[38].mxu1 }
 0x1ba   : > { %v946_v56 = vpop.f32.mrb[39].mxu1 }
 0x1bd   : > { %v5800_v12 = vpop.f32.mrb[40].mxu1 }
 0x1be   : > { %v951_v7 = vpop.f32.mrb[41].mxu1 }
 0x1c1   : > { %v5802_v1 = vpop.f32.mrb[42].mxu1 }
 0x1c2   : > { %v956_v24 = vpop.f32.mrb[43].mxu1 }
 0x1c5   : > { %v5804_v61 = vpop.f32.mrb[44].mxu1 }
 0x1c6   : > { %v961_v35 = vpop.f32.mrb[45].mxu1 }
 0x1c9   : > { %v5806_v41 = vpop.f32.mrb[46].mxu1 }
 0x1ca   : > { %v966_v18 = vpop.f32.mrb[47].mxu1 }
 0x1cd   : > { %v5808_v3 = vpop.f32.mrb[48].mxu1 }
 0x1ce   : > { %v971_v47 = vpop.f32.mrb[49].mxu1 }
 0x1d1   : > { %v5810_v21 = vpop.f32.mrb[50].mxu1 }
 0x1d2   : > { %v976_v51 = vpop.f32.mrb[51].mxu1 }
 0x1d5   : > { %v5812_v59 = vpop.f32.mrb[52].mxu1 }
 0x1d6   : > { %v981_v34 = vpop.f32.mrb[53].mxu1 }
 0x1d9   : > { %v5814_v19 = vpop.f32.mrb[54].mxu1 }
 0x1da   : > { %v986_v4 = vpop.f32.mrb[55].mxu1 }
 0x1dd   : > { %v5816_v43 = vpop.f32.mrb[56].mxu1 }
 0x1de   : > { %v991_v58 = vpop.f32.mrb[57].mxu1 }
 0x1e1   : > { %v5818_v5 = vpop.f32.mrb[58].mxu1 }
 0x1e2   : > { %v996_v13 = vpop.f32.mrb[59].mxu1 }
 0x1e5   : > { %v5820_v57 = vpop.f32.mrb[60].mxu1 }
 0x1e6   : > { %v1001_v49 = vpop.f32.mrb[61].mxu1 }
 0x1e9   : > { %v5822_v17 = vpop.f32.mrb[62].mxu1 }
 0x1ea   : > { %v1006_v9 = vpop.f32.mrb[63].mxu1 }
 0x1ed   : > { %v1564_v38 = vpop.f32.mrb[64].mxu1 }
 0x1ee   : > { %v1566_v2 = vpop.f32.mrb[65].mxu1 }
 0x1f1   : > { %v1569_v44 = vpop.f32.mrb[66].mxu1 }
 0x1f2   : > { %v1571_v62 = vpop.f32.mrb[67].mxu1 }
 0x1f5   : > { %v1574_v30 = vpop.f32.mrb[68].mxu1 }
 0x1f6   : > { %v1576_v20 = vpop.f32.mrb[69].mxu1 }
 0x1f9   : > { %v1579_v0 = vpop.f32.mrb[70].mxu1 }
 0x1fa   : > { %v1581_v36 = vpop.f32.mrb[71].mxu1 }
 0x1fd   : > { %v1584_v10 = vpop.f32.mrb[72].mxu1 }
 0x1fe   : > { %v1586_v50 = vpop.f32.mrb[73].mxu1 }
 0x201   : > { %v1589_v45 = vpop.f32.mrb[74].mxu1 }
 0x202   : > { %v1591_v27 = vpop.f32.mrb[75].mxu1 }
 0x205   : > { %v1594_v39 = vpop.f32.mrb[76].mxu1 }
 0x206   : > { %v1596_v48 = vpop.f32.mrb[77].mxu1 }
 0x209   : > { %v1599_v16 = vpop.f32.mrb[78].mxu1 }
 0x20a   : > { %v1601_v25 = vpop.f32.mrb[79].mxu1 }
 0x20d   : > { %v1604_v55 = vpop.f32.mrb[80].mxu1 }
 0x20e   : > { %v1339_v42 = vpop.f32.mrb[16].mxu0  ;;  %v1606_v8 = vpop.f32.mrb[81].mxu1 }
 0x20f   : > { %v4575_v56 = vadd.f32 %v1339_v42, %v5760_v15  ;;  %v1341_v7 = vpop.f32.mrb[17].mxu0 }
 0x211   : > { %v5825_v24 = vadd.f32 %v4575_v56, %v1564_v38  ;;  %v1609_v35 = vpop.f32.mrb[82].mxu1 }
 0x212   : > { %v1344_v18 = vpop.f32.mrb[18].mxu0  ;;  %v1611_v47 = vpop.f32.mrb[83].mxu1 }
 0x213   : > { %v4577_v51 = vadd.f32 %v1344_v18, %v5765_v14  ;;  %v1346_v34 = vpop.f32.mrb[19].mxu0 }
 0x215   : > { %v5828_v4 = vadd.f32 %v4577_v51, %v1569_v44  ;;  %v1614_v58 = vpop.f32.mrb[84].mxu1 }
 0x216   : > { %v1349_v13 = vpop.f32.mrb[20].mxu0  ;;  %v1616_v49 = vpop.f32.mrb[85].mxu1 }
 0x217   : > { %v4579_v9 = vadd.f32 %v1349_v13, %v5768_v63  ;;  %v1351_v2 = vpop.f32.mrb[21].mxu0 }
 0x219   : > { %v5831_v62 = vadd.f32 %v4579_v9, %v1574_v30  ;;  %v1619_v15 = vpop.f32.mrb[86].mxu1 }
 0x21a   : > { %v1354_v20 = vpop.f32.mrb[22].mxu0  ;;  %v1621_v38 = vpop.f32.mrb[87].mxu1 }
 0x21b   : > { %v4581_v36 = vadd.f32 %v1354_v20, %v5770_v40  ;;  %v1356_v50 = vpop.f32.mrb[23].mxu0 }
 0x21d   : > { %v5834_v27 = vadd.f32 %v4581_v36, %v1579_v0  ;;  %v1624_v14 = vpop.f32.mrb[88].mxu1 }
 0x21e   : > { %v1359_v48 = vpop.f32.mrb[24].mxu0  ;;  %v1626_v44 = vpop.f32.mrb[89].mxu1 }
 0x21f   : > { %v4583_v25 = vadd.f32 %v1359_v48, %v5773_v23  ;;  %v1361_v42 = vpop.f32.mrb[25].mxu0 }
 0x221   : > { %v5837_v8 = vadd.f32 %v4583_v25, %v1584_v10  ;;  %v1629_v63 = vpop.f32.mrb[90].mxu1 }
 0x222   : > { %v1364_v56 = vpop.f32.mrb[26].mxu0  ;;  %v1631_v30 = vpop.f32.mrb[91].mxu1 }
 0x223   : > { %v4585_v7 = vadd.f32 %v1364_v56, %v5777_v52  ;;  %v1366_v18 = vpop.f32.mrb[27].mxu0 }
 0x225   : > { %v5840_v47 = vadd.f32 %v4585_v7, %v1589_v45  ;;  %v1634_v40 = vpop.f32.mrb[92].mxu1 }
 0x226   : > { %v1369_v51 = vpop.f32.mrb[28].mxu0  ;;  %v1636_v0 = vpop.f32.mrb[93].mxu1 }
 0x227   : > { %v4587_v34 = vadd.f32 %v1369_v51, %v5781_v33  ;;  %v1371_v13 = vpop.f32.mrb[29].mxu0 }
 0x229   : > { %v5843_v49 = vadd.f32 %v4587_v34, %v1594_v39  ;;  %v1639_v23 = vpop.f32.mrb[94].mxu1 }
 0x22a   : > { %v1374_v9 = vpop.f32.mrb[30].mxu0  ;;  %v1641_v10 = vpop.f32.mrb[95].mxu1 }
 0x22b   : > { %v4589_v2 = vadd.f32 %v1374_v9, %v5785_v37  ;;  %v1376_v20 = vpop.f32.mrb[31].mxu0 }
 0x22d   : > { %v5846_v38 = vadd.f32 %v4589_v2, %v1599_v16  ;;  %v1644_v52 = vpop.f32.mrb[96].mxu1 }
 0x22e   : > { %v1379_v36 = vpop.f32.mrb[32].mxu0  ;;  %v1646_v45 = vpop.f32.mrb[97].mxu1 }
 0x22f   : > { %v4591_v50 = vadd.f32 %v1379_v36, %v5789_v53  ;;  %v1381_v48 = vpop.f32.mrb[33].mxu0 }
 0x231   : > { %v5849_v44 = vadd.f32 %v4591_v50, %v1604_v55  ;;  %v1649_v33 = vpop.f32.mrb[98].mxu1 }
 0x232   : > { %v1384_v25 = vpop.f32.mrb[34].mxu0  ;;  %v1651_v39 = vpop.f32.mrb[99].mxu1 }
 0x233   : > { %v4593_v42 = vadd.f32 %v1384_v25, %v5793_v54  ;;  %v1386_v56 = vpop.f32.mrb[35].mxu0 }
 0x235   : > { %v5852_v30 = vadd.f32 %v4593_v42, %v1609_v35  ;;  %v1654_v37 = vpop.f32.mrb[100].mxu1 }
 0x236   : > { %v1389_v7 = vpop.f32.mrb[36].mxu0  ;;  %v1656_v16 = vpop.f32.mrb[101].mxu1 }
 0x237   : > { %v4595_v18 = vadd.f32 %v1389_v7, %v5796_v11  ;;  %v1391_v51 = vpop.f32.mrb[37].mxu0 }
 0x239   : > { %v5855_v0 = vadd.f32 %v4595_v18, %v1614_v58  ;;  %v1659_v53 = vpop.f32.mrb[102].mxu1 }
 0x23a   : > { %v1394_v34 = vpop.f32.mrb[38].mxu0  ;;  %v1661_v55 = vpop.f32.mrb[103].mxu1 }
 0x23b   : > { %v4597_v13 = vadd.f32 %v1394_v34, %v5798_v22  ;;  %v1396_v9 = vpop.f32.mrb[39].mxu0 }
 0x23d   : > { %v5858_v10 = vadd.f32 %v4597_v13, %v1619_v15  ;;  %v1664_v54 = vpop.f32.mrb[104].mxu1 }
 0x23e   : > { %v1399_v2 = vpop.f32.mrb[40].mxu0  ;;  %v1666_v35 = vpop.f32.mrb[105].mxu1 }
 0x23f   : > { %v4599_v20 = vadd.f32 %v1399_v2, %v5800_v12  ;;  %v1401_v36 = vpop.f32.mrb[41].mxu0 }
 0x241   : > { %v5861_v45 = vadd.f32 %v4599_v20, %v1624_v14  ;;  %v1669_v11 = vpop.f32.mrb[106].mxu1 }
 0x242   : > { %v1404_v50 = vpop.f32.mrb[42].mxu0  ;;  %v1671_v58 = vpop.f32.mrb[107].mxu1 }
 0x243   : > { %v4601_v48 = vadd.f32 %v1404_v50, %v5802_v1  ;;  %v1406_v25 = vpop.f32.mrb[43].mxu0 }
 0x245   : > { %v1674_v39 = vpop.f32.mrb[108].mxu1  ;;  %v5864_v42 = vadd.f32 %v4601_v48, %v1629_v63 }
 0x246   : > { %v1409_v22 = vpop.f32.mrb[44].mxu0  ;;  %v1676_v15 = vpop.f32.mrb[109].mxu1 }
 0x247   : > { %v4603_v56 = vadd.f32 %v1409_v22, %v5804_v61  ;;  %v1411_v7 = vpop.f32.mrb[45].mxu0 }
 0x249   : > { %v5867_v16 = vpop.f32.mrb[110].mxu1  ;;  %v5869_v12 = vadd.f32 %v4603_v56, %v1634_v40 }
 0x24a   : > { %v1414_v14 = vpop.f32.mrb[46].mxu0  ;;  %v1681_v18 = vpop.f32.mrb[111].mxu1 }
 0x24b   : > { %v4605_v51 = vadd.f32 %v1414_v14, %v5806_v41  ;;  %v1416_v34 = vpop.f32.mrb[47].mxu0 }
 0x24d   : > { %v5872_v55 = vpop.f32.mrb[112].mxu1  ;;  %v5874_v1 = vadd.f32 %v4605_v51, %v1639_v23 }
 0x24e   : > { %v1419_v63 = vpop.f32.mrb[48].mxu0  ;;  %v1749_v13 = vpop.f32.mrb[113].mxu1 }
 0x24f   : > { %v4607_v9 = vadd.f32 %v1419_v63, %v5808_v3  ;;  %v1421_v2 = vpop.f32.mrb[49].mxu0 }
 0x251   : > { %v5877_v61 = vpop.f32.mrb[114].mxu1  ;;  %v5879_v35 = vadd.f32 %v4607_v9, %v1644_v52 }
 0x252   : > { %v1424_v40 = vpop.f32.mrb[50].mxu0  ;;  %v5881_v20 = vpop.f32.mrb[115].mxu1 }
 0x253   : > { %v4609_v36 = vadd.f32 %v1424_v40, %v5810_v21  ;;  %v1426_v41 = vpop.f32.mrb[51].mxu0 }
 0x255   : > { %v5884_v50 = vpop.f32.mrb[116].mxu1  ;;  %v5886_v58 = vadd.f32 %v4609_v36, %v1649_v33 }
 0x256   : > { %v1429_v23 = vpop.f32.mrb[52].mxu0  ;;  %v5888_v48 = vpop.f32.mrb[117].mxu1 }
 0x257   : > { %v4611_v3 = vadd.f32 %v1429_v23, %v5812_v59  ;;  %v1431_v25 = vpop.f32.mrb[53].mxu0 }
 0x259   : > { %v5891_v22 = vpop.f32.mrb[118].mxu1  ;;  %v5893_v52 = vadd.f32 %v4611_v3, %v1654_v37 }
 0x25a   : > { %v1434_v15 = vpop.f32.mrb[54].mxu0  ;;  %v5895_v56 = vpop.f32.mrb[119].mxu1 }
 0x25b   : > { %v4613_v21 = vadd.f32 %v1434_v15, %v5814_v19  ;;  %v1436_v7 = vpop.f32.mrb[55].mxu0 }
 0x25d   : > { %v4277_v14 = vpop.f32.mrb[120].mxu1  ;;  %v5898_v18 = vadd.f32 %v4613_v21, %v1659_v53 }
 0x25e   : > { %v1439_v33 = vpop.f32.mrb[56].mxu0  ;;  %v5901_v51 = vadd.f32 %v5828_v4, %v4277_v14  ;;  %v1789_v34 = vpop.f32.mrb[121].mxu1 }
 0x25f   : > { %v4615_v59 = vadd.f32 %v1439_v33, %v5816_v43  ;;  %v1441_v63 = vpop.f32.mrb[57].mxu0  ;;  %v5905_v37 = vadd.f32 %v5825_v24, %v1789_v34 }
 0x261   : > { %v4280_v9 = vpop.f32.mrb[122].mxu1  ;;  %v5907_v2 = vadd.f32 %v4615_v59, %v1664_v54 }
 0x262   : > { %v1444_v40 = vpop.f32.mrb[58].mxu0  ;;  %v5910_v19 = vadd.f32 %v5834_v27, %v4280_v9  ;;  %v1799_v53 = vpop.f32.mrb[123].mxu1 }
 0x263   : > { %v4617_v36 = vadd.f32 %v1444_v40, %v5818_v5  ;;  %v1446_v41 = vpop.f32.mrb[59].mxu0  ;;  %v5914_v4 = vadd.f32 %v5831_v62, %v1799_v53 }
 0x265   : > { %v4283_v23 = vpop.f32.mrb[124].mxu1  ;;  %v5916_v43 = vadd.f32 %v4617_v36, %v1669_v11 }
 0x266   : > { %v1449_v3 = vpop.f32.mrb[60].mxu0  ;;  %v5919_v24 = vadd.f32 %v5840_v47, %v4283_v23  ;;  %v1809_v54 = vpop.f32.mrb[125].mxu1 }
 0x267   : > { %v4619_v25 = vadd.f32 %v1449_v3, %v5820_v57  ;;  %v1451_v15 = vpop.f32.mrb[61].mxu0  ;;  %v5923_v27 = vadd.f32 %v5837_v8, %v1809_v54 }
 0x269   : > { %v4286_v21 = vpop.f32.mrb[126].mxu1  ;;  %v5925_v5 = vadd.f32 %v4619_v25, %v1674_v39 }
 0x26a   : > { %v1454_v7 = vpop.f32.mrb[62].mxu0  ;;  %v5928_v62 = vadd.f32 %v5846_v38, %v4286_v21  ;;  %v1819_v11 = vpop.f32.mrb[127].mxu1 }
 0x26b   : > { %v4621_v14 = vadd.f32 %v1454_v7, %v5822_v17  ;;  %v1456_v33 = vpop.f32.mrb[63].mxu0  ;;  %v5932_v47 = vadd.f32 %v5843_v49, %v1819_v11 }
 0x26d   : > { %v4289_v34 = vpop.f32.mrb[128].mxu1  ;;  %v5935_v57 = vadd.f32 %v4621_v14, %v5867_v16 }
 0x26e   : > { %v1524_v8 = vpop.f32.mrb[0].mxu0  ;;  %v5938_v59 = vadd.f32 %v5852_v30, %v4289_v34  ;;  %v1829_v39 = vpop.f32.mrb[129].mxu1 }
 0x26f   : > { %v4567_v63 = vadd.f32 %v1524_v8, %v5733_v31  ;;  %v1526_v38 = vpop.f32.mrb[1].mxu0  ;;  %v5942_v9 = vadd.f32 %v5849_v44, %v1829_v39 }
 0x271   : > { %v5944_v17 = vadd.f32 %v4567_v63, %v1749_v13  ;;  %v4292_v40 = vpop.f32.mrb[130].mxu1 }
 0x272   : > { %v1529_v49 = vpop.f32.mrb[2].mxu0  ;;  %v5947_v53 = vadd.f32 %v5858_v10, %v4292_v40  ;;  %v1839_v16 = vpop.f32.mrb[131].mxu1 }
 0x273   : > { %v4568_v36 = vadd.f32 %v1529_v49, %v5737_v32  ;;  %v1531_v41 = vpop.f32.mrb[3].mxu0  ;;  %v5951_v30 = vadd.f32 %v5855_v0, %v1839_v16  ;;  %v1946_v39 = vmul.f32 %v5944_v17, %v5944_v17 }
 0x275   : > { %v5954_v31 = vadd.f32 %v4568_v36, %v5872_v55  ;;  %v4295_v23 = vpop.f32.mrb[132].mxu1 }
 0x276   : > { %v1534_v44 = vpop.f32.mrb[4].mxu0  ;;  %v5957_v13 = vadd.f32 %v5864_v42, %v4295_v23  ;;  %v1849_v3 = vpop.f32.mrb[133].mxu1 }
 0x277   : > { %v4569_v54 = vadd.f32 %v1534_v44, %v5740_v46  ;;  %v1536_v10 = vpop.f32.mrb[5].mxu0  ;;  %v5961_v25 = vadd.f32 %v5861_v45, %v1849_v3 }
 0x279   : > { %v5964_v32 = vadd.f32 %v4569_v54, %v5881_v20  ;;  %v4298_v0 = vpop.f32.mrb[134].mxu1 }
 0x27a   : > { %v1539_v15 = vpop.f32.mrb[6].mxu0  ;;  %v5967_v55 = vadd.f32 %v5874_v1, %v4298_v0  ;;  %v1859_v21 = vpop.f32.mrb[135].mxu1 }
 0x27b   : > { %v4570_v7 = vadd.f32 %v1539_v15, %v5743_v26  ;;  %v1541_v42 = vpop.f32.mrb[7].mxu0  ;;  %v5971_v11 = vadd.f32 %v5869_v12, %v1859_v21  ;;  %v1947_v26 = vmul.f32 %v5954_v31, %v5954_v31 }
 0x27d   : > { %v5974_v46 = vadd.f32 %v4570_v7, %v5877_v61  ;;  %v4301_v45 = vpop.f32.mrb[136].mxu1  ;;  %v1978_v16 = vadd.f32 %v1947_v26, %v1946_v39 }
 0x27e   : > { %v1544_v14 = vpop.f32.mrb[8].mxu0  ;;  %v5977_v20 = vadd.f32 %v5886_v58, %v4301_v45  ;;  %v1869_v33 = vpop.f32.mrb[137].mxu1  ;;  %v1948_v58 = vmul.f32 %v5964_v32, %v5964_v32 }
 0x27f   : > { %v4571_v34 = vadd.f32 %v1544_v14, %v5746_v29  ;;  %v1546_v1 = vpop.f32.mrb[9].mxu0  ;;  %v5981_v8 = vadd.f32 %v5879_v35, %v1869_v33  ;;  %v1908_v35 = vadd.f32 %v5954_v31, %v5944_v17  ;;  %v1949_v36 = vmul.f32 %v5974_v46, %v5974_v46 }
 0x280   : > { %v1979_v44 = vadd.f32 %v1978_v16, %v1948_v58 }
 0x281   : > { %v5986_v12 = vadd.f32 %v4571_v34, %v5888_v48  ;;  %v4304_v61 = vpop.f32.mrb[138].mxu1  ;;  %v1909_v41 = vadd.f32 %v1908_v35, %v5964_v32 }
 0x282   : > { %v1549_v63 = vpop.f32.mrb[10].mxu0  ;;  %v5993_v29 = vadd.f32 %v5898_v18, %v4304_v61  ;;  %v1879_v38 = vpop.f32.mrb[139].mxu1 }
 0x283   : > { %v4572_v40 = vadd.f32 %v1549_v63, %v5749_v6  ;;  %v1551_v49 = vpop.f32.mrb[11].mxu0  ;;  %v5999_v48 = vadd.f32 %v5893_v52, %v1879_v38  ;;  %v1950_v3 = vmul.f32 %v5986_v12, %v5986_v12  ;;  %v1910_v10 = vadd.f32 %v1909_v41, %v5974_v46 }
 0x285   : > { %v6005_v23 = vadd.f32 %v4572_v40, %v5884_v50  ;;  %v4307_v18 = vpop.f32.mrb[140].mxu1  ;;  %v1980_v50 = vadd.f32 %v1979_v44, %v1949_v36  ;;  %v1911_v7 = vadd.f32 %v1910_v10, %v5986_v12  ;;  %v1954_v40 = vmul.f32 %v5905_v37, %v5905_v37 }
 0x286   : > { %v1554_v54 = vpop.f32.mrb[12].mxu0  ;;  %v6010_v6 = vadd.f32 %v5916_v43, %v4307_v18  ;;  %v1889_v52 = vpop.f32.mrb[141].mxu1  ;;  %v1957_v44 = vmul.f32 %v5910_v19, %v5910_v19 }
 0x287   : > { %v4573_v0 = vadd.f32 %v1554_v54, %v5752_v60  ;;  %v1556_v15 = vpop.f32.mrb[13].mxu0  ;;  %v6015_v21 = vadd.f32 %v5907_v2, %v1889_v52  ;;  %v1951_v42 = vmul.f32 %v6005_v23, %v6005_v23  ;;  %v1981_v14 = vadd.f32 %v1980_v50, %v1950_v3 }
 0x288   : > { %v1912_v1 = vadd.f32 %v1911_v7, %v6005_v23  ;;  %v1958_v52 = vmul.f32 %v5923_v27, %v5923_v27  ;;  %v1959_v15 = vmul.f32 %v5919_v24, %v5919_v24 }
 0x289   : > { %v6021_v45 = vadd.f32 %v4573_v0, %v5895_v56  ;;  %v4310_v43 = vpop.f32.mrb[142].mxu1  ;;  %v1982_v56 = vadd.f32 %v1981_v14, %v1951_v42  ;;  %v1960_v42 = vmul.f32 %v5932_v47, %v5932_v47 }
 0x28a   : > { %v1559_v33 = vpop.f32.mrb[14].mxu0  ;;  %v6024_v34 = vadd.f32 %v5935_v57, %v4310_v43  ;;  %v1899_v60 = vpop.f32.mrb[143].mxu1 }
 0x28b   : > { %v1952_v2 = vmul.f32 %v6021_v45, %v6021_v45  ;;  %v4574_v26 = vadd.f32 %v1559_v33, %v5755_v28  ;;  %v1561_v61 = vpop.f32.mrb[15].mxu0  ;;  %v6031_v39 = vadd.f32 %v5925_v5, %v1899_v60  ;;  %v1913_v58 = vadd.f32 %v1912_v1, %v6021_v45 }
 0x28c   : > { %v1955_v5 = vmul.f32 %v5901_v51, %v5901_v51  ;;  %v1961_v33 = vmul.f32 %v5928_v62, %v5928_v62 }
 0x28d   : > { %v6035_v63 = vadd.f32 %v4574_v26, %v5891_v22  ;;  %v1983_v57 = vadd.f32 %v1982_v56, %v1952_v2  ;;  %v1956_v22 = vmul.f32 %v5914_v4, %v5914_v4  ;;  %v1962_v2 = vmul.f32 %v5942_v9, %v5942_v9 }
 0x28e   : > { %v1963_v56 = vmul.f32 %v5938_v59, %v5938_v59 }
 0x28f   : > { %v1914_v38 = vadd.f32 %v1913_v58, %v6035_v63  ;;  %v1953_v35 = vmul.f32 %v6035_v63, %v6035_v63 }
 0x291   : > { %v1915_v28 = vadd.f32 %v1914_v38, %v5905_v37  ;;  %v1984_v49 = vadd.f32 %v1983_v57, %v1953_v35  ;;  %v1964_v38 = vmul.f32 %v5951_v30, %v5951_v30 }
 0x293   : > { %v1916_v16 = vadd.f32 %v1915_v28, %v5901_v51  ;;  %v1985_v36 = vadd.f32 %v1984_v49, %v1954_v40  ;;  %v1965_v28 = vmul.f32 %v5947_v53, %v5947_v53 }
 0x295   : > { %v1917_v41 = vadd.f32 %v1916_v16, %v5914_v4  ;;  %v1986_v18 = vadd.f32 %v1985_v36, %v1955_v5  ;;  %v1966_v16 = vmul.f32 %v5961_v25, %v5961_v25 }
 0x297   : > { %v1918_v3 = vadd.f32 %v1917_v41, %v5910_v19  ;;  %v1987_v54 = vadd.f32 %v1986_v18, %v1956_v22  ;;  %v1967_v41 = vmul.f32 %v5957_v13, %v5957_v13 }
 0x299   : > { %v1919_v10 = vadd.f32 %v1918_v3, %v5923_v27  ;;  %v1988_v0 = vadd.f32 %v1987_v54, %v1957_v44  ;;  %v1968_v3 = vmul.f32 %v5971_v11, %v5971_v11 }
 0x29b   : > { %v1920_v50 = vadd.f32 %v1919_v10, %v5919_v24  ;;  %v1989_v7 = vadd.f32 %v1988_v0, %v1958_v52  ;;  %v1969_v10 = vmul.f32 %v5967_v55, %v5967_v55 }
 0x29d   : > { %v1921_v43 = vadd.f32 %v1920_v50, %v5932_v47  ;;  %v1990_v14 = vadd.f32 %v1989_v7, %v1959_v15  ;;  %v1970_v50 = vmul.f32 %v5981_v8, %v5981_v8 }
 0x29f   : > { %v1922_v60 = vadd.f32 %v1921_v43, %v5928_v62  ;;  %v1991_v1 = vadd.f32 %v1990_v14, %v1960_v42  ;;  %v1971_v43 = vmul.f32 %v5977_v20, %v5977_v20 }
 0x2a1   : > { %v1923_v26 = vadd.f32 %v1922_v60, %v5942_v9  ;;  %v1992_v61 = vadd.f32 %v1991_v1, %v1961_v33  ;;  %v1972_v60 = vmul.f32 %v5999_v48, %v5999_v48 }
 0x2a3   : > { %v1924_v58 = vadd.f32 %v1923_v26, %v5938_v59  ;;  %v1993_v57 = vadd.f32 %v1992_v61, %v1962_v2  ;;  %v1973_v26 = vmul.f32 %v5993_v29, %v5993_v29 }
 0x2a5   : > { %v1994_v35 = vadd.f32 %v1993_v57, %v1963_v56  ;;  %v1925_v40 = vadd.f32 %v1924_v58, %v5951_v30  ;;  %v1974_v58 = vmul.f32 %v6015_v21, %v6015_v21 }
 0x2a7   : > { %v1926_v49 = vadd.f32 %v1925_v40, %v5947_v53  ;;  %v1995_v5 = vadd.f32 %v1994_v35, %v1964_v38  ;;  %v1975_v35 = vmul.f32 %v6010_v6, %v6010_v6 }
 0x2a9   : > { %v1927_v36 = vadd.f32 %v1926_v49, %v5961_v25  ;;  %v1996_v22 = vadd.f32 %v1995_v5, %v1965_v28  ;;  %v1976_v5 = vmul.f32 %v6031_v39, %v6031_v39 }
 0x2ab   : > { %v1928_v18 = vadd.f32 %v1927_v36, %v5957_v13  ;;  %v1997_v44 = vadd.f32 %v1996_v22, %v1966_v16  ;;  %v1977_v36 = vmul.f32 %v6024_v34, %v6024_v34 }
 0x2ad   : > { %v1929_v54 = vadd.f32 %v1928_v18, %v5971_v11  ;;  %v1998_v52 = vadd.f32 %v1997_v44, %v1967_v41 }
 0x2af   : > { %v1930_v0 = vadd.f32 %v1929_v54, %v5967_v55  ;;  %v1999_v15 = vadd.f32 %v1998_v52, %v1968_v3 }
 0x2b1   : > { %v1931_v7 = vadd.f32 %v1930_v0, %v5981_v8  ;;  %v2000_v42 = vadd.f32 %v1999_v15, %v1969_v10 }
 0x2b3   : > { %v1932_v14 = vadd.f32 %v1931_v7, %v5977_v20  ;;  %v2001_v33 = vadd.f32 %v2000_v42, %v1970_v50 }
 0x2b5   : > { %v1933_v1 = vadd.f32 %v1932_v14, %v5999_v48  ;;  %v2002_v2 = vadd.f32 %v2001_v33, %v1971_v43 }
 0x2b7   : > { %v1934_v61 = vadd.f32 %v1933_v1, %v5993_v29  ;;  %v2003_v56 = vadd.f32 %v2002_v2, %v1972_v60 }
 0x2b9   : > { %v1935_v57 = vadd.f32 %v1934_v61, %v6015_v21  ;;  %v2004_v38 = vadd.f32 %v2003_v56, %v1973_v26 }
 0x2bb   : > { %v1936_v40 = vadd.f32 %v1935_v57, %v6010_v6  ;;  %v2005_v28 = vadd.f32 %v2004_v38, %v1974_v58  ;;  %v4938_v57 = vmov 1983009808  }
 0x2bc   : > { %v2229_v38 = vunpack.c.l.s4 %v4938_v57 }
 0x2bd   : > { %v1937_v49 = vadd.f32 %v1936_v40, %v6031_v39  ;;  %v2006_v16 = vadd.f32 %v2005_v28, %v1975_v35  ;;  %v2231_v35 = vlaneseq }
 0x2bf   : > { %v1938_v22 = vadd.f32 %v1937_v49, %v6024_v34  ;;  %v2007_v41 = vadd.f32 %v2006_v16, %v1976_v5  ;;  %v2230_v49 = vunpack.c.0.s8 %v2229_v38  ;;  %v2232_v5 = vshrl.u32 %v2231_v35, 7 }
 0x2c1   : > { %v1939_v18 = vrot.slane %v1938_v22, 4  ;;  %v2008_v44 = vadd.f32 %v2007_v41, %v1977_v36  ;;  %v6124_v16 = vsub.s32 %v2230_v49, %v2232_v5 }
 0x2c3   : > { %v1940_v3 = vadd.f32 %v1939_v18, %v1938_v22  ;;  %v2009_v54 = vrot.slane %v2008_v44, 4  ;;  %8276 = vst [vmem:[#allocation18_spill] sm:$0xff] %v6124_v16 }
 0x2c5   : > { %v1941_v52 = vrot.slane %v1940_v3, 2  ;;  %v2010_v10 = vadd.f32 %v2009_v54, %v2008_v44  ;;  %v6181_v54 = vld [vmem:[%s8006_s2] ss:$0 sm:$0xff] }
 0x2c6   : > { %8278 = vst [vmem:[#allocation28_spill] sm:$0xff] %v6181_v54 }
 0x2c7   : > { %v1942_v0 = vadd.f32 %v1941_v52, %v1940_v3  ;;  %v2011_v15 = vrot.slane %v2010_v10, 2 }
 0x2c9   : > { %v1943_v50 = vrot.slane %v1942_v0, 1  ;;  %v2012_v7 = vadd.f32 %v2011_v15, %v2010_v10 }
 0x2cb   : > { %v1944_v42 = vadd.f32 %v1943_v50, %v1942_v0  ;;  %v2013_v43 = vrot.slane %v2012_v7, 1 }
 0x2cd   : > { %v6112_v14 = vmul.f32 0.00390625, %v1944_v42  ;;  %v2014_v33 = vadd.f32 %v2013_v43, %v2012_v7 }
 0x2cf   : > { %v2015_v60 = vmul.f32 0.00390625, %v2014_v33  ;;  %v2016_v1 = vmul.f32 %v6112_v14, %v6112_v14  ;;  %v2047_v2 = vsub.f32 %v6015_v21, %v6112_v14  ;;  %v2048_v26 = vsub.f32 %v6010_v6, %v6112_v14  ;;  %v6198_v33 = vld [vmem:[%s8007_s3] ss:$0 sm:$0xff] }
 0x2d0   : > { %v2049_v61 = vsub.f32 %v6031_v39, %v6112_v14  ;;  %v2050_v56 = vsub.f32 %v6024_v34, %v6112_v14  ;;  %v6126_v21 = vsub.s32 0, %v2232_v5  ;;  %v2019_v6 = vsub.f32 %v5944_v17, %v6112_v14  ;;  %8279 = vst [vmem:[#allocation20_spill] sm:$0xff] %v6198_v33 }
 0x2d1   : > { %v2017_v58 = vsub.f32 %v2015_v60, %v2016_v1  ;;  %v2020_v39 = vsub.f32 %v5954_v31, %v6112_v14  ;;  %v2021_v34 = vsub.f32 %v5964_v32, %v6112_v14  ;;  %v2022_v36 = vsub.f32 %v5974_v46, %v6112_v14 }
 0x2d2   : > { %8277 = vst [vmem:[#allocation15_spill] sm:$0xff] %v6126_v21  ;;  %v2023_v22 = vsub.f32 %v5986_v12, %v6112_v14  ;;  %v2024_v41 = vsub.f32 %v6005_v23, %v6112_v14  ;;  %v2025_v18 = vsub.f32 %v6021_v45, %v6112_v14  ;;  %v2026_v17 = vsub.f32 %v6035_v63, %v6112_v14 }
 0x2d3   : > { %v2018_v40 = vmax.f32 %v2017_v58, 0.0  ;;  %v2027_v31 = vsub.f32 %v5905_v37, %v6112_v14  ;;  %v2028_v32 = vsub.f32 %v5901_v51, %v6112_v14  ;;  %v2029_v46 = vsub.f32 %v5914_v4, %v6112_v14 }
 0x2d4   : > { %v2030_v12 = vsub.f32 %v5910_v19, %v6112_v14  ;;  %v2031_v23 = vsub.f32 %v5923_v27, %v6112_v14  ;;  %v2032_v45 = vsub.f32 %v5919_v24, %v6112_v14  ;;  %v2033_v63 = vsub.f32 %v5932_v47, %v6112_v14 }
 0x2d5   : > { %v2051_v28 = vadd.f32 1e-05, %v2018_v40  ;;  %v2034_v37 = vsub.f32 %v5928_v62, %v6112_v14 }
 0x2d7   : > { %4767 = vrsqrt.f32 %v2051_v28 }
 0x2e1   : > { %v6176_v3 = vpop.eup %4767 }
 0x2e2   : > { %v2081_v50 = vmul.f32 %v6176_v3, %v2047_v2  ;;  %v2082_v7 = vmul.f32 %v6176_v3, %v2048_v26  ;;  %v2083_v42 = vmul.f32 %v6176_v3, %v2049_v61  ;;  %v2084_v43 = vmul.f32 %v6176_v3, %v2050_v56 }
 0x2e3   : > { %v6201_v60 = vmul.f32 %v6176_v3, %v2019_v6  ;;  %v6204_v1 = vmul.f32 %v6176_v3, %v2020_v39  ;;  %v6207_v58 = vmul.f32 %v6176_v3, %v2021_v34  ;;  %v6210_v2 = vmul.f32 %v6176_v3, %v2022_v36 }
 0x2e4   : > { %v2120_v26 = vmul.f32 %v6181_v54, %v2081_v50  ;;  %v2121_v61 = vmul.f32 %v6181_v54, %v2082_v7  ;;  %v2122_v56 = vmul.f32 %v6181_v54, %v2083_v42  ;;  %v2123_v57 = vmul.f32 %v6181_v54, %v2084_v43 }
 0x2e5   : > { %8280 = vst [vmem:[#allocation16_spill] sm:$0xff] %v6204_v1  ;;  %8281 = vst [vmem:[#allocation30_spill] sm:$0xff] %v6207_v58  ;;  %v6217_v38 = vmul.f32 %v6176_v3, %v2023_v22  ;;  %v6220_v35 = vmul.f32 %v6176_v3, %v2024_v41  ;;  %v6223_v40 = vmul.f32 %v6176_v3, %v2025_v18 }
 0x2e6   : > { %8282 = vst [vmem:[#allocation22_spill] sm:$0xff] %v6210_v2  ;;  %v6226_v28 = vmul.f32 %v6176_v3, %v2026_v17  ;;  %v2159_v49 = vadd.f32 %v6198_v33, %v2120_v26  ;;  %v2160_v5 = vadd.f32 %v6198_v33, %v2121_v61  ;;  %v2161_v6 = vadd.f32 %v6198_v33, %v2122_v56 }
 0x2e7   : > { %8283 = vst [vmem:[#allocation17_spill] sm:$0xff] %v6217_v38  ;;  %8284 = vst [vmem:[#allocation32_spill] sm:$0xff] %v6220_v35  ;;  %v2162_v39 = vadd.f32 %v6198_v33, %v2123_v57  ;;  %v6233_v34 = vmul.f32 %v6176_v3, %v2027_v31  ;;  %v6236_v36 = vmul.f32 %v6176_v3, %v2028_v32 }
 0x2e8   : > { %8285 = vst [vmem:[#allocation23_spill] sm:$0xff] %v6223_v40  ;;  %8286 = vst [vmem:[#allocation19_spill] sm:$0xff] %v6226_v28  ;;  %v6239_v22 = vmul.f32 %v6176_v3, %v2029_v46  ;;  %v6242_v41 = vmul.f32 %v6176_v3, %v2030_v12  ;;  %v2191_v18 = vmax.f32 %v2159_v49, 0.0  ;;  %v2192_v17 = vmax.f32 %v2160_v5, 0.0 }
 0x2e9   : > { %8287 = vst [vmem:[#allocation34_spill] sm:$0xff] %v6233_v34  ;;  %8288 = vst [vmem:[#allocation24_spill] sm:$0xff] %v6236_v36  ;;  %v2193_v50 = vmax.f32 %v2161_v6, 0.0  ;;  %v2194_v7 = vmax.f32 %v2162_v39, 0.0  ;;  %v6245_v42 = vmul.f32 %v6176_v3, %v2031_v23  ;;  %v6248_v43 = vmul.f32 %v6176_v3, %v2032_v45 }
 0x2ea   : > { %8289 = vst [vmem:[#allocation21_spill] sm:$0xff] %v6239_v22  ;;  %8290 = vst [vmem:[#allocation36_spill] sm:$0xff] %v6242_v41  ;;  %v6251_v31 = vmul.f32 %v6176_v3, %v2033_v63  ;;  %v6254_v32 = vmul.f32 %v6176_v3, %v2034_v37  ;;  %v2703_v46 = vcombine.high %v2191_v18, %v2191_v18 }
 0x2eb   : > { %8291 = vst [vmem:[#allocation25_spill] sm:$0xff] %v6245_v42  ;;  %8292 = vst [vmem:[#allocation26_spill] sm:$0xff] %v6248_v43  ;;  %v2710_v12 = vrot.slane %v2191_v18, %v6124_v16  ;;  %v2720_v26 = vcombine.high %v2192_v17, %v2192_v17  ;;  %v2727_v61 = vrot.slane %v2192_v17, %v6124_v16 }
 0x2ec   : > { %8293 = vst [vmem:[#allocation39_spill] sm:$0xff] %v6251_v31  ;;  %8294 = vst [vmem:[#allocation12_spill] sm:$0xff] %v6254_v32  ;;  %v2737_v56 = vcombine.high %v2193_v50, %v2193_v50  ;;  %v2744_v57 = vrot.slane %v2193_v50, %v6124_v16  ;;  %v2754_v23 = vcombine.high %v2194_v7, %v2194_v7 }
 0x2ed   : > { %v2761_v49 = vrot.slane %v2194_v7, %v6124_v16  ;;  %v2717_v45 = vrot.slane %v2703_v46, %v6124_v16  ;;  %v2718_v5 = vcombine.high %v2710_v12, %v2710_v12  ;;  %v2734_v63 = vrot.slane %v2720_v26, %v6124_v16 }
 0x2ee   : > { %v2735_v6 = vcombine.high %v2727_v61, %v2727_v61  ;;  %v2751_v37 = vrot.slane %v2737_v56, %v6124_v16  ;;  %v2752_v39 = vcombine.high %v2744_v57, %v2744_v57  ;;  %v2768_v18 = vrot.slane %v2754_v23, %v6124_v16 }
 0x2ef   : > { %v2769_v15 = vcombine.high %v2761_v49, %v2761_v49  ;;  %v2719_v0 = vcombine.high %v2717_v45, %v2717_v45  ;;  %v2736_v17 = vcombine.high %v2734_v63, %v2734_v63  ;;  %v4160_v10 = vrot.slane %v2710_v12, 9 }
 0x2f0   : > { %v4161_v52 = vrot.slane %v2718_v5, 9  ;;  %v2753_v50 = vcombine.high %v2751_v37, %v2751_v37  ;;  %v2770_v44 = vcombine.high %v2768_v18, %v2768_v18  ;;  %v4162_v62 = vrot.slane %v2717_v45, 9 }
 0x2f1   : > { %v4164_v7 = vrot.slane %v2727_v61, 9  ;;  %v4163_v47 = vrot.slane %v2719_v0, 9  ;;  %v4165_v46 = vrot.slane %v2735_v6, 9  ;;  %v4166_v24 = vrot.slane %v2734_v63, 9 }
 0x2f2   : > { %v4167_v27 = vrot.slane %v2736_v17, 9  ;;  %v4168_v26 = vrot.slane %v2744_v57, 9  ;;  %v4169_v19 = vrot.slane %v2752_v39, 9  ;;  %v4170_v4 = vrot.slane %v2751_v37, 9 }
 0x2f3   : > { %v4171_v56 = vrot.slane %v2753_v50, 9  ;;  %v4172_v51 = vrot.slane %v2761_v49, 9  ;;  %v4173_v23 = vrot.slane %v2769_v15, 9  ;;  %v4174_v16 = vrot.slane %v2768_v18, 9 }
 0x2f4   : > { %v4175_v33 = vrot.slane %v2770_v44, 9  ;;  %v3395_v32 = vadd.f32 %v4160_v10, %v2710_v12  ;;  %v3396_v31 = vadd.f32 %v4161_v52, %v2718_v5  ;;  %v3397_v43 = vadd.f32 %v4162_v62, %v2717_v45 }
 0x2f5   : > { %v3398_v42 = vadd.f32 %v4163_v47, %v2719_v0  ;;  %v3399_v41 = vadd.f32 %v4164_v7, %v2727_v61  ;;  %v3400_v22 = vadd.f32 %v4165_v46, %v2735_v6  ;;  %v3401_v36 = vadd.f32 %v4166_v24, %v2734_v63  ;;  %v8307_v46 = vld [vmem:[#allocation28_spill] sm:$0xff] }
 0x2f6   : > { %v3402_v34 = vadd.f32 %v4167_v27, %v2736_v17  ;;  %v3403_v28 = vadd.f32 %v4168_v26, %v2744_v57  ;;  %v3404_v40 = vadd.f32 %v4169_v19, %v2752_v39  ;;  %v3405_v35 = vadd.f32 %v4170_v4, %v2751_v37 }
 0x2f7   : > { %v3406_v38 = vadd.f32 %v4171_v56, %v2753_v50  ;;  %v3407_v2 = vadd.f32 %v4172_v51, %v2761_v49  ;;  %v3408_v58 = vadd.f32 %v4173_v23, %v2769_v15  ;;  %v3409_v1 = vadd.f32 %v4174_v16, %v2768_v18  ;;  %v8308_v56 = vld [vmem:[#allocation16_spill] sm:$0xff]  ;;  %v8309_v23 = vld [vmem:[#allocation30_spill] sm:$0xff] }
 0x2f8   : > { %v3410_v54 = vadd.f32 %v4175_v33, %v2770_v44  ;;  %v3467_v10 = vadd.f32 %v3403_v28, %v3395_v32  ;;  %v3468_v52 = vadd.f32 %v3404_v40, %v3396_v31  ;;  %v3469_v62 = vadd.f32 %v3405_v35, %v3397_v43 }
 0x2f9   : > { %v3470_v47 = vadd.f32 %v3406_v38, %v3398_v42  ;;  %v3471_v0 = vadd.f32 %v3407_v2, %v3399_v41  ;;  %v3472_v12 = vadd.f32 %v3408_v58, %v3400_v22  ;;  %v3473_v24 = vadd.f32 %v3409_v1, %v3401_v36 }
 0x2fa   : > { %v3474_v27 = vadd.f32 %v3410_v54, %v3402_v34  ;;  %v3531_v61 = vmul.f32 0.25, %v3467_v10  ;;  %v3532_v57 = vmul.f32 0.25, %v3468_v52  ;;  %v3533_v19 = vmul.f32 0.25, %v3469_v62  ;;  %v8310_v52 = vld [vmem:[#allocation22_spill] sm:$0xff] }
 0x2fb   : > { %v3534_v4 = vmul.f32 0.25, %v3470_v47  ;;  %v3535_v45 = vmul.f32 0.25, %v3471_v0  ;;  %v3536_v51 = vmul.f32 0.25, %v3472_v12  ;;  %v3537_v15 = vmul.f32 0.25, %v3473_v24  ;;  %v8311_v47 = vld [vmem:[#allocation17_spill] sm:$0xff]  ;;  %v8314_v24 = vld [vmem:[#allocation19_spill] sm:$0xff] }
 0x2fc   : > { %v3538_v16 = vmul.f32 0.25, %v3474_v27  ;;  %v3830_v44 = vrot.slane %v3531_v61, %v6126_v21  ;;  %v3834_v33 = vrot.slane %v3532_v57, %v6126_v21  ;;  %v3838_v38 = vrot.slane %v3533_v19, %v6126_v21  ;;  %v8315_v61 = vld [vmem:[#allocation34_spill] sm:$0xff]  ;;  %v8316_v19 = vld [vmem:[#allocation24_spill] sm:$0xff] }
 0x2fd   : > { %v3842_v2 = vrot.slane %v3534_v4, %v6126_v21  ;;  %v3846_v1 = vrot.slane %v3535_v45, %v6126_v21  ;;  %v3850_v54 = vrot.slane %v3536_v51, %v6126_v21  ;;  %v3854_v58 = vrot.slane %v3537_v15, %v6126_v21  ;;  %v8317_v45 = vld [vmem:[#allocation21_spill] sm:$0xff]  ;;  %v8318_v15 = vld [vmem:[#allocation36_spill] sm:$0xff] }
 0x2fe   : > { %v3858_v35 = vrot.slane %v3538_v16, %v6126_v21  ;;  %v3915_v40 = vsel %vm3859_vm0, %v3834_v33, %v3830_v44  ;;  %v8295_v28 = vsub.f32 %v5942_v9, %v6112_v14  ;;  %v8296_v36 = vsub.f32 %v5938_v59, %v6112_v14  ;;  %v8319_v44 = vld [vmem:[#allocation25_spill] sm:$0xff] }
 0x2ff   : > { %v8297_v41 = vsub.f32 %v5951_v30, %v6112_v14  ;;  %v3916_v43 = vsel %vm3861_vm1, %v3838_v38, %v3915_v40  ;;  %v8298_v31 = vsub.f32 %v5947_v53, %v6112_v14  ;;  %v8299_v32 = vsub.f32 %v5961_v25, %v6112_v14  ;;  %v8320_v38 = vld [vmem:[#allocation26_spill] sm:$0xff] }
 0x300   : > { %v2069_v34 = vmul.f32 %v6176_v3, %v8295_v28  ;;  %v2070_v22 = vmul.f32 %v6176_v3, %v8296_v36  ;;  %v8300_v49 = vsub.f32 %v5957_v13, %v6112_v14  ;;  %v3917_v5 = vsel %vm3863_vm2, %v3842_v2, %v3916_v43 }
 0x301   : > { %v2071_v42 = vmul.f32 %v6176_v3, %v8297_v41  ;;  %v2072_v9 = vmul.f32 %v6176_v3, %v8298_v31  ;;  %v2073_v59 = vmul.f32 %v6176_v3, %v8299_v32  ;;  %v8301_v63 = vsub.f32 %v5971_v11, %v6112_v14 }
 0x302   : > { %v2074_v30 = vmul.f32 %v6176_v3, %v8300_v49  ;;  %v8302_v53 = vsub.f32 %v5967_v55, %v6112_v14  ;;  %v8303_v25 = vsub.f32 %v5981_v8, %v6112_v14  ;;  %v3918_v13 = vsel %vm3865_vm3, %v3846_v1, %v3917_v5  ;;  %v8321_v1 = vld [vmem:[#allocation39_spill] sm:$0xff] }
 0x303   : > { %v2075_v6 = vmul.f32 %v6176_v3, %v8301_v63  ;;  %v8304_v18 = vsub.f32 %v5977_v20, %v6112_v14  ;;  %v8305_v11 = vsub.f32 %v5999_v48, %v6112_v14  ;;  %v8306_v55 = vsub.f32 %v5993_v29, %v6112_v14  ;;  %v8312_v14 = vld [vmem:[#allocation32_spill] sm:$0xff] }
 0x304   : > { %v2076_v37 = vmul.f32 %v6176_v3, %v8302_v53  ;;  %v2077_v39 = vmul.f32 %v6176_v3, %v8303_v25  ;;  %v3919_v8 = vsel %vm3867_vm4, %v3850_v54, %v3918_v13  ;;  %v2092_v26 = vmul.f32 %v8307_v46, %v6201_v60  ;;  %v8313_v60 = vld [vmem:[#allocation23_spill] sm:$0xff]  ;;  %v8323_v53 = vld [vmem:[#allocation20_spill] sm:$0xff] }
 0x305   : > { %v2078_v17 = vmul.f32 %v6176_v3, %v8304_v18  ;;  %v2079_v50 = vmul.f32 %v6176_v3, %v8305_v11  ;;  %v2080_v7 = vmul.f32 %v6176_v3, %v8306_v55  ;;  %v2093_v20 = vmul.f32 %v8307_v46, %v8308_v56 }
 0x306   : > { %v2094_v10 = vmul.f32 %v8307_v46, %v8309_v23  ;;  %v3920_v48 = vsel %vm3869_vm5, %v3854_v58, %v3919_v8  ;;  %v2095_v62 = vmul.f32 %v8307_v46, %v8310_v52  ;;  %v2096_v29 = vmul.f32 %v8307_v46, %v8311_v47  ;;  %v8322_v58 = vld [vmem:[#allocation12_spill] sm:$0xff] }
 0x307   : > { %v2097_v3 = vmul.f32 %v8307_v46, %v8312_v14  ;;  %v3921_v0 = vsel %vm3871_vm6, %v3858_v35, %v3920_v48  ;;  %v2098_v12 = vmul.f32 %v8307_v46, %v8313_v60  ;;  %v2099_v27 = vmul.f32 %v8307_v46, %v8314_v24 }
 0x308   : > { %v2100_v57 = vmul.f32 %v8307_v46, %v8315_v61  ;;  %3937 = vst [vmem:[%s6346_s28 + $0x38] sm:$0xff] %v3921_v0  ;;  %v2101_v4 = vmul.f32 %v8307_v46, %v8316_v19  ;;  %v2102_v51 = vmul.f32 %v8307_v46, %v8317_v45  ;;  %v2103_v16 = vmul.f32 %v8307_v46, %v8318_v15 }
 0x309   : > { %v2104_v33 = vmul.f32 %v8307_v46, %v8319_v44  ;;  %v2105_v2 = vmul.f32 %v8307_v46, %v8320_v38  ;;  %v2106_v54 = vmul.f32 %v8307_v46, %v8321_v1  ;;  %v2107_v35 = vmul.f32 %v8307_v46, %v8322_v58 }
 0x30a   : > { %v2108_v40 = vmul.f32 %v8307_v46, %v2069_v34  ;;  %v2109_v28 = vmul.f32 %v8307_v46, %v2070_v22  ;;  %v2110_v36 = vmul.f32 %v8307_v46, %v2071_v42  ;;  %v2111_v41 = vmul.f32 %v8307_v46, %v2072_v9 }
 0x30b   : > { %v2112_v43 = vmul.f32 %v8307_v46, %v2073_v59  ;;  %v2113_v31 = vmul.f32 %v8307_v46, %v2074_v30  ;;  %v2114_v32 = vmul.f32 %v8307_v46, %v2075_v6  ;;  %v2115_v49 = vmul.f32 %v8307_v46, %v2076_v37 }
 0x30c   : > { %v2116_v5 = vmul.f32 %v8307_v46, %v2077_v39  ;;  %v2117_v63 = vmul.f32 %v8307_v46, %v2078_v17  ;;  %v2118_v34 = vmul.f32 %v8307_v46, %v2079_v50  ;;  %v2119_v22 = vmul.f32 %v8307_v46, %v2080_v7 }
 0x30d   : > { %v2131_v42 = vadd.f32 %v8323_v53, %v2092_v26  ;;  %v2132_v9 = vadd.f32 %v8323_v53, %v2093_v20  ;;  %v2133_v59 = vadd.f32 %v8323_v53, %v2094_v10  ;;  %v2134_v30 = vadd.f32 %v8323_v53, %v2095_v62 }
 0x30e   : > { %v2135_v6 = vadd.f32 %v8323_v53, %v2096_v29  ;;  %v2136_v37 = vadd.f32 %v8323_v53, %v2097_v3  ;;  %v2137_v25 = vadd.f32 %v8323_v53, %v2098_v12  ;;  %v2138_v39 = vadd.f32 %v8323_v53, %v2099_v27 }
 0x30f   : > { %v2139_v13 = vadd.f32 %v8323_v53, %v2100_v57  ;;  %v2140_v18 = vadd.f32 %v8323_v53, %v2101_v4  ;;  %v2141_v17 = vadd.f32 %v8323_v53, %v2102_v51  ;;  %v2142_v11 = vadd.f32 %v8323_v53, %v2103_v16 }
 0x310   : > { %v2143_v50 = vadd.f32 %v8323_v53, %v2104_v33  ;;  %v2144_v55 = vadd.f32 %v8323_v53, %v2105_v2  ;;  %v2145_v7 = vadd.f32 %v8323_v53, %v2106_v54  ;;  %v2146_v8 = vadd.f32 %v8323_v53, %v2107_v35 }
 0x311   : > { %v2147_v46 = vadd.f32 %v8323_v53, %v2108_v40  ;;  %v2148_v26 = vadd.f32 %v8323_v53, %v2109_v28  ;;  %v2149_v56 = vadd.f32 %v8323_v53, %v2110_v36  ;;  %v2150_v20 = vadd.f32 %v8323_v53, %v2111_v41 }
 0x312   : > { %v2151_v23 = vadd.f32 %v8323_v53, %v2112_v43  ;;  %v2152_v10 = vadd.f32 %v8323_v53, %v2113_v31  ;;  %v2153_v48 = vadd.f32 %v8323_v53, %v2114_v32  ;;  %v2154_v52 = vadd.f32 %v8323_v53, %v2115_v49  ;;  %v8324_v49 = vld [vmem:[#allocation18_spill] sm:$0xff] }
 0x313   : > { %v2155_v62 = vadd.f32 %v8323_v53, %v2116_v5  ;;  %v2156_v47 = vadd.f32 %v8323_v53, %v2117_v63  ;;  %v2157_v29 = vadd.f32 %v8323_v53, %v2118_v34  ;;  %v2158_v14 = vadd.f32 %v8323_v53, %v2119_v22 }
 0x314   : > { %v2163_v3 = vmax.f32 %v2131_v42, 0.0  ;;  %v2164_v0 = vmax.f32 %v2132_v9, 0.0  ;;  %v2165_v60 = vmax.f32 %v2133_v59, 0.0  ;;  %v2166_v12 = vmax.f32 %v2134_v30, 0.0 }
 0x315   : > { %v2167_v24 = vmax.f32 %v2135_v6, 0.0  ;;  %v2168_v27 = vmax.f32 %v2136_v37, 0.0  ;;  %v2169_v61 = vmax.f32 %v2137_v25, 0.0  ;;  %v2170_v57 = vmax.f32 %v2138_v39, 0.0 }
 0x316   : > { %v6403_v19 = vmax.f32 %v2139_v13, 0.0  ;;  %v6405_v4 = vmax.f32 %v2140_v18, 0.0  ;;  %v6407_v45 = vmax.f32 %v2141_v17, 0.0  ;;  %v6409_v51 = vmax.f32 %v2142_v11, 0.0 }
 0x317   : > { %v6411_v15 = vmax.f32 %v2143_v50, 0.0  ;;  %v6413_v16 = vmax.f32 %v2144_v55, 0.0  ;;  %v6415_v44 = vmax.f32 %v2145_v7, 0.0  ;;  %v6417_v33 = vmax.f32 %v2146_v8, 0.0 }
 0x318   : > { %v6419_v38 = vmax.f32 %v2147_v46, 0.0  ;;  %v6421_v2 = vmax.f32 %v2148_v26, 0.0  ;;  %v6423_v1 = vmax.f32 %v2149_v56, 0.0  ;;  %v6425_v54 = vmax.f32 %v2150_v20, 0.0 }
 0x319   : > { %v6427_v58 = vmax.f32 %v2151_v23, 0.0  ;;  %v6429_v35 = vmax.f32 %v2152_v10, 0.0  ;;  %v6431_v40 = vmax.f32 %v2153_v48, 0.0  ;;  %v6433_v28 = vmax.f32 %v2154_v52, 0.0 }
 0x31a   : > { %v6435_v36 = vmax.f32 %v2155_v62, 0.0  ;;  %v6437_v41 = vmax.f32 %v2156_v47, 0.0  ;;  %v6439_v43 = vmax.f32 %v2157_v29, 0.0  ;;  %v6441_v31 = vmax.f32 %v2158_v14, 0.0 }
 0x31b   : > { %v2227_v32 = vcombine.high %v2163_v3, %v2163_v3  ;;  %v6444_v5 = vrot.slane %v2163_v3, %v8324_v49  ;;  %v2244_v63 = vcombine.high %v2164_v0, %v2164_v0  ;;  %v6447_v34 = vrot.slane %v2164_v0, %v8324_v49 }
 0x31c   : > { %v2261_v22 = vcombine.high %v2165_v60, %v2165_v60  ;;  %v6453_v42 = vrot.slane %v2165_v60, %v8324_v49  ;;  %v2278_v9 = vcombine.high %v2166_v12, %v2166_v12  ;;  %v6456_v59 = vrot.slane %v2166_v12, %v8324_v49 }
 0x31d   : > { %8325 = vst [vmem:[#allocation27_spill] sm:$0xff] %v6444_v5  ;;  %8326 = vst [vmem:[#allocation13_spill] sm:$0xff] %v6447_v34  ;;  %v6450_v53 = vrot.slane %v2227_v32, %v8324_v49  ;;  %v6460_v30 = vcombine.high %v6444_v5, %v6444_v5  ;;  %v6463_v6 = vrot.slane %v2244_v63, %v8324_v49 }
 0x31e   : > { %v6467_v37 = vcombine.high %v6447_v34, %v6447_v34  ;;  %v6470_v25 = vrot.slane %v2261_v22, %v8324_v49  ;;  %v6478_v13 = vcombine.high %v6453_v42, %v6453_v42  ;;  %v6481_v18 = vrot.slane %v2278_v9, %v8324_v49 }
 0x31f   : > { %8327 = vst [vmem:[#allocation29_spill] sm:$0xff] %v6450_v53  ;;  %v6474_v39 = vcombine.high %v6450_v53, %v6450_v53  ;;  %v6485_v17 = vcombine.high %v6456_v59, %v6456_v59  ;;  %v6489_v11 = vcombine.high %v6463_v6, %v6463_v6  ;;  %v2295_v55 = vcombine.high %v2167_v24, %v2167_v24 }
 0x320   : > { %8328 = vst [vmem:[#allocation42_spill] sm:$0xff] %v6467_v37  ;;  %v6493_v50 = vcombine.high %v6470_v25, %v6470_v25  ;;  %v6496_v7 = vrot.slane %v2167_v24, %v8324_v49  ;;  %v6500_v8 = vcombine.high %v6481_v18, %v6481_v18  ;;  %v2312_v46 = vcombine.high %v2168_v27, %v2168_v27 }
 0x321   : > { %v6503_v26 = vrot.slane %v2168_v27, %v8324_v49  ;;  %v2329_v56 = vcombine.high %v2169_v61, %v2169_v61  ;;  %v6506_v20 = vrot.slane %v2295_v55, %v8324_v49  ;;  %v6513_v10 = vrot.slane %v2169_v61, %v8324_v49 }
 0x322   : > { %v6510_v23 = vcombine.high %v6496_v7, %v6496_v7  ;;  %v2346_v48 = vcombine.high %v2170_v57, %v2170_v57  ;;  %v6516_v52 = vrot.slane %v2312_v46, %v8324_v49  ;;  %v6526_v29 = vrot.slane %v2170_v57, %v8324_v49 }
 0x323   : > { %8329 = vst [vmem:[#allocation14_spill] sm:$0xff] %v6513_v10  ;;  %v6520_v62 = vcombine.high %v6503_v26, %v6503_v26  ;;  %v6523_v47 = vrot.slane %v2329_v56, %v8324_v49  ;;  %v6530_v14 = vcombine.high %v6506_v20, %v6506_v20  ;;  %v6534_v3 = vcombine.high %v6513_v10, %v6513_v10 }
 0x324   : > { %8331 = vst [vmem:[#allocation44_spill] sm:$0xff] %v6526_v29  ;;  %v6537_v0 = vrot.slane %v2346_v48, %v8324_v49  ;;  %v2363_v60 = vcombine.high %v6403_v19, %v6403_v19  ;;  %v6543_v12 = vcombine.high %v6516_v52, %v6516_v52  ;;  %v6551_v27 = vcombine.high %v6526_v29, %v6526_v29 }
 0x325   : > { %8330 = vst [vmem:[#allocation31_spill] sm:$0xff] %v6523_v47  ;;  %v6547_v24 = vcombine.high %v6523_v47, %v6523_v47  ;;  %v6555_v61 = vrot.slane %v6403_v19, %v8324_v49  ;;  %v2380_v63 = vcombine.high %v6405_v4, %v6405_v4  ;;  %v6568_v22 = vrot.slane %v6405_v4, %v8324_v49 }
 0x326   : > { %8332 = vst [vmem:[#allocation33_spill] sm:$0xff] %v6537_v0  ;;  %8333 = vst [vmem:[#allocation35_spill] sm:$0xff] %v6551_v27  ;;  %v6559_v57 = vcombine.high %v6537_v0, %v6537_v0  ;;  %v6562_v32 = vrot.slane %v2363_v60, %v8324_v49  ;;  %v2397_v19 = vcombine.high %v6407_v45, %v6407_v45  ;;  %v8464_v34 = vrot.slane %v6460_v30, 9 }
 0x327   : > { %8334 = vst [vmem:[#allocation37_spill] sm:$0xff] %v6555_v61  ;;  %8336 = vst [vmem:[#allocation40_spill] sm:$0xff] %v6568_v22  ;;  %v6572_v9 = vcombine.high %v6555_v61, %v6555_v61  ;;  %v6578_v55 = vrot.slane %v6407_v45, %v8324_v49  ;;  %v2414_v46 = vcombine.high %v6409_v51, %v6409_v51 }
 0x328   : > { %8335 = vst [vmem:[#allocation38_spill] sm:$0xff] %v6562_v32  ;;  %v6584_v56 = vcombine.high %v6562_v32, %v6562_v32  ;;  %v6587_v4 = vrot.slane %v2380_v63, %v8324_v49  ;;  %v6591_v48 = vcombine.high %v6568_v22, %v6568_v22  ;;  %v6595_v60 = vrot.slane %v6409_v51, %v8324_v49 }
 0x329   : > { %8337 = vst [vmem:[#allocation41_spill] sm:$0xff] %v6572_v9  ;;  %8338 = vst [vmem:[#allocation43_spill] sm:$0xff] %v6578_v55  ;;  %v6598_v45 = vrot.slane %v2397_v19, %v8324_v49  ;;  %v6602_v21 = vcombine.high %v6578_v55, %v6578_v55  ;;  %v2431_v63 = vcombine.high %v6411_v15, %v6411_v15 }
 0x32a   : > { %8339 = vst [vmem:[#allocation45_spill] sm:$0xff] %v6584_v56  ;;  %8340 = vst [vmem:[#allocation28_spill] sm:$0xff] %v6587_v4  ;;  %v6605_v56 = vrot.slane %v2414_v46, %v8324_v49  ;;  %v6615_v51 = vcombine.high %v6595_v60, %v6595_v60  ;;  %v6619_v19 = vrot.slane %v6411_v15, %v8324_v49 }
 0x32b   : > { %8341 = vst [vmem:[#allocation16_spill] sm:$0xff] %v6591_v48  ;;  %8342 = vst [vmem:[#allocation30_spill] sm:$0xff] %v6595_v60  ;;  %v6611_v48 = vcombine.high %v6587_v4, %v6587_v4  ;;  %v6625_v46 = vcombine.high %v6598_v45, %v6598_v45  ;;  %v7015_v37 = vadd.f32 %v8464_v34, %v6460_v30  ;;  %v8472_v30 = vrot.slane %v6463_v6, 9 }
 0x32c   : > { %8343 = vst [vmem:[#allocation22_spill] sm:$0xff] %v6598_v45  ;;  %8344 = vst [vmem:[#allocation17_spill] sm:$0xff] %v6602_v21  ;;  %v2448_v21 = vcombine.high %v6413_v16, %v6413_v16  ;;  %v6629_v55 = vcombine.high %v6605_v56, %v6605_v56  ;;  %v6640_v15 = vcombine.high %v6619_v19, %v6619_v19 }
 0x32d   : > { %8345 = vst [vmem:[#allocation32_spill] sm:$0xff] %v6605_v56  ;;  %8346 = vst [vmem:[#allocation23_spill] sm:$0xff] %v6611_v48  ;;  %v6632_v48 = vrot.slane %v2431_v63, %v8324_v49  ;;  %v8461_v56 = vld [vmem:[#allocation27_spill] sm:$0xff] }
 0x32e   : > { %8347 = vst [vmem:[#allocation19_spill] sm:$0xff] %v6615_v51  ;;  %8348 = vst [vmem:[#allocation34_spill] sm:$0xff] %v6619_v19  ;;  %v6636_v51 = vrot.slane %v6413_v16, %v8324_v49  ;;  %v6643_v60 = vrot.slane %v2448_v21, %v8324_v49  ;;  %v6663_v21 = vrot.slane %v6417_v33, %v8324_v49 }
 0x32f   : > { %8349 = vst [vmem:[#allocation24_spill] sm:$0xff] %v6625_v46  ;;  %8350 = vst [vmem:[#allocation21_spill] sm:$0xff] %v6629_v55  ;;  %v2465_v46 = vcombine.high %v6415_v44, %v6415_v44  ;;  %v6649_v55 = vrot.slane %v6415_v44, %v8324_v49  ;;  %v6653_v63 = vcombine.high %v6632_v48, %v6632_v48 }
 0x330   : > { %8351 = vst [vmem:[#allocation36_spill] sm:$0xff] %v6632_v48  ;;  %8352 = vst [vmem:[#allocation25_spill] sm:$0xff] %v6636_v51  ;;  %v6657_v16 = vcombine.high %v6636_v51, %v6636_v51  ;;  %v6667_v19 = vcombine.high %v6643_v60, %v6643_v60 }
 0x331   : > { %8353 = vst [vmem:[#allocation26_spill] sm:$0xff] %v6640_v15  ;;  %8354 = vst [vmem:[#allocation39_spill] sm:$0xff] %v6643_v60  ;;  %v2482_v15 = vcombine.high %v6417_v33, %v6417_v33  ;;  %v6670_v44 = vrot.slane %v2465_v46, %v8324_v49  ;;  %v6683_v33 = vcombine.high %v6663_v21, %v6663_v21  ;;  %v8407_v10 = vld [vmem:[#allocation45_spill] sm:$0xff] }
 0x332   : > { %8355 = vst [vmem:[#allocation12_spill] sm:$0xff] %v6649_v55  ;;  %8356 = vst [vmem:[#allocation20_spill] sm:$0xff] %v6653_v63  ;;  %v6674_v63 = vcombine.high %v6649_v55, %v6649_v55  ;;  %v2516_v46 = vcombine.high %v6421_v2, %v6421_v2 }
 0x333   : > { %8357 = vst [vmem:[#allocation18_spill] sm:$0xff] %v6657_v16  ;;  %8358 = vst [vmem:[#allocation46_spill] sm:$0xff] %v6663_v21  ;;  %v2499_v16 = vcombine.high %v6419_v38, %v6419_v38  ;;  %v6679_v51 = vrot.slane %v2482_v15, %v8324_v49  ;;  %v6700_v15 = vrot.slane %v6421_v2, %v8324_v49 }
 0x334   : > { %8359 = vst [vmem:[#allocation47_spill] sm:$0xff] %v6667_v19  ;;  %8360 = vst [vmem:[#allocation48_spill] sm:$0xff] %v6670_v44  ;;  %v6687_v19 = vrot.slane %v6419_v38, %v8324_v49  ;;  %v8409_v29 = vld [vmem:[#allocation23_spill] sm:$0xff] }
 0x335   : > { %8361 = vst [vmem:[#allocation49_spill] sm:$0xff] %v6674_v63  ;;  %8362 = vst [vmem:[#allocation50_spill] sm:$0xff] %v6679_v51  ;;  %v6693_v63 = vcombine.high %v6670_v44, %v6670_v44  ;;  %v6696_v55 = vrot.slane %v2499_v16, %v8324_v49  ;;  %v6706_v38 = vcombine.high %v6679_v51, %v6679_v51 }
 0x336   : > { %8363 = vst [vmem:[#allocation51_spill] sm:$0xff] %v6683_v33  ;;  %8364 = vst [vmem:[#allocation52_spill] sm:$0xff] %v6687_v19  ;;  %v2533_v33 = vcombine.high %v6423_v1, %v6423_v1  ;;  %v6710_v21 = vcombine.high %v6687_v19, %v6687_v19  ;;  %v6717_v16 = vrot.slane %v6423_v1, %v8324_v49  ;;  %v8412_v61 = vld [vmem:[#allocation24_spill] sm:$0xff] }
 0x337   : > { %8365 = vst [vmem:[#allocation53_spill] sm:$0xff] %v6693_v63  ;;  %8366 = vst [vmem:[#allocation54_spill] sm:$0xff] %v6696_v55  ;;  %v6713_v63 = vrot.slane %v2516_v46, %v8324_v49  ;;  %v6721_v2 = vcombine.high %v6696_v55, %v6696_v55  ;;  %v6725_v44 = vcombine.high %v6700_v15, %v6700_v15 }
 0x338   : > { %8367 = vst [vmem:[#allocation55_spill] sm:$0xff] %v6700_v15  ;;  %8368 = vst [vmem:[#allocation56_spill] sm:$0xff] %v6706_v38  ;;  %v6728_v38 = vrot.slane %v2533_v33, %v8324_v49  ;;  %v6738_v1 = vcombine.high %v6717_v16, %v6717_v16 }
 0x339   : > { %8369 = vst [vmem:[#allocation57_spill] sm:$0xff] %v6710_v21  ;;  %8370 = vst [vmem:[#allocation58_spill] sm:$0xff] %v6713_v63  ;;  %v2550_v21 = vcombine.high %v6425_v54, %v6425_v54  ;;  %v6734_v46 = vcombine.high %v6713_v63, %v6713_v63  ;;  %v8418_v27 = vld [vmem:[#allocation20_spill] sm:$0xff] }
 0x33a   : > { %8371 = vst [vmem:[#allocation59_spill] sm:$0xff] %v6717_v16  ;;  %8372 = vst [vmem:[#allocation60_spill] sm:$0xff] %v6721_v2  ;;  %v6742_v2 = vrot.slane %v6425_v54, %v8324_v49  ;;  %v6748_v33 = vcombine.high %v6728_v38, %v6728_v38  ;;  %v8420_v45 = vld [vmem:[#allocation18_spill] sm:$0xff] }
 0x33b   : > { %8373 = vst [vmem:[#allocation61_spill] sm:$0xff] %v6725_v44  ;;  %8374 = vst [vmem:[#allocation62_spill] sm:$0xff] %v6728_v38  ;;  %v2567_v44 = vcombine.high %v6427_v58, %v6427_v58  ;;  %v6751_v15 = vrot.slane %v2550_v21, %v8324_v49  ;;  %v2601_v21 = vcombine.high %v6431_v40, %v6431_v40  ;;  %v8421_v9 = vld [vmem:[#allocation47_spill] sm:$0xff] }
 0x33c   : > { %8375 = vst [vmem:[#allocation63_spill] sm:$0xff] %v6734_v46  ;;  %8376 = vst [vmem:[#allocation64_spill] sm:$0xff] %v6738_v1  ;;  %v6755_v46 = vrot.slane %v6427_v58, %v8324_v49  ;;  %v2584_v1 = vcombine.high %v6429_v35, %v6429_v35  ;;  %v6761_v54 = vcombine.high %v6742_v2, %v6742_v2 }
 0x33d   : > { %8377 = vst [vmem:[#allocation65_spill] sm:$0xff] %v6742_v2  ;;  %8378 = vst [vmem:[#allocation66_spill] sm:$0xff] %v6748_v33  ;;  %v6764_v16 = vrot.slane %v2567_v44, %v8324_v49  ;;  %v6768_v33 = vrot.slane %v6429_v35, %v8324_v49  ;;  %v6774_v58 = vcombine.high %v6751_v15, %v6751_v15 }
 0x33e   : > { %8379 = vst [vmem:[#allocation67_spill] sm:$0xff] %v6751_v15  ;;  %8380 = vst [vmem:[#allocation68_spill] sm:$0xff] %v6755_v46  ;;  %v6778_v38 = vcombine.high %v6755_v46, %v6755_v46  ;;  %v6785_v44 = vrot.slane %v6431_v40, %v8324_v49  ;;  %v8425_v47 = vld [vmem:[#allocation53_spill] sm:$0xff] }
 0x33f   : > { %8381 = vst [vmem:[#allocation69_spill] sm:$0xff] %v6761_v54  ;;  %8382 = vst [vmem:[#allocation70_spill] sm:$0xff] %v6764_v16  ;;  %v6781_v54 = vrot.slane %v2584_v1, %v8324_v49  ;;  %v6789_v35 = vcombine.high %v6764_v16, %v6764_v16  ;;  %v6793_v2 = vcombine.high %v6768_v33, %v6768_v33 }
 0x340   : > { %8383 = vst [vmem:[#allocation71_spill] sm:$0xff] %v6768_v33  ;;  %8384 = vst [vmem:[#allocation72_spill] sm:$0xff] %v6774_v58  ;;  %v6796_v58 = vrot.slane %v2601_v21, %v8324_v49  ;;  %v6806_v40 = vcombine.high %v6785_v44, %v6785_v44 }
 0x341   : > { %8385 = vst [vmem:[#allocation73_spill] sm:$0xff] %v6778_v38  ;;  %8386 = vst [vmem:[#allocation74_spill] sm:$0xff] %v6781_v54  ;;  %v2618_v38 = vcombine.high %v6433_v28, %v6433_v28  ;;  %v6802_v1 = vcombine.high %v6781_v54, %v6781_v54  ;;  %v8430_v32 = vld [vmem:[#allocation60_spill] sm:$0xff] }
 0x342   : > { %8387 = vst [vmem:[#allocation75_spill] sm:$0xff] %v6785_v44  ;;  %8388 = vst [vmem:[#allocation76_spill] sm:$0xff] %v6789_v35  ;;  %v6810_v35 = vrot.slane %v6433_v28, %v8324_v49  ;;  %v6816_v21 = vcombine.high %v6796_v58, %v6796_v58  ;;  %v8432_v22 = vld [vmem:[#allocation61_spill] sm:$0xff] }
 0x343   : > { %8389 = vst [vmem:[#allocation77_spill] sm:$0xff] %v6793_v2  ;;  %8390 = vst [vmem:[#allocation78_spill] sm:$0xff] %v6796_v58  ;;  %v2635_v2 = vcombine.high %v6435_v36, %v6435_v36  ;;  %v6819_v33 = vrot.slane %v2618_v38, %v8324_v49  ;;  %v2669_v38 = vcombine.high %v6439_v43, %v6439_v43  ;;  %v8433_v4 = vld [vmem:[#allocation63_spill] sm:$0xff] }
 0x344   : > { %8391 = vst [vmem:[#allocation79_spill] sm:$0xff] %v6802_v1  ;;  %8392 = vst [vmem:[#allocation80_spill] sm:$0xff] %v6806_v40  ;;  %v6823_v1 = vrot.slane %v6435_v36, %v8324_v49  ;;  %v2652_v40 = vcombine.high %v6437_v41, %v6437_v41  ;;  %v6829_v28 = vcombine.high %v6810_v35, %v6810_v35  ;;  %v8437_v19 = vld [vmem:[#allocation66_spill] sm:$0xff] }
 0x345   : > { %8393 = vst [vmem:[#allocation81_spill] sm:$0xff] %v6810_v35  ;;  %8394 = vst [vmem:[#allocation82_spill] sm:$0xff] %v6816_v21  ;;  %v6832_v44 = vrot.slane %v2635_v2, %v8324_v49  ;;  %v6836_v21 = vrot.slane %v6437_v41, %v8324_v49  ;;  %v6842_v36 = vcombine.high %v6819_v33, %v6819_v33 }
 0x346   : > { %8395 = vst [vmem:[#allocation83_spill] sm:$0xff] %v6819_v33  ;;  %8396 = vst [vmem:[#allocation84_spill] sm:$0xff] %v6829_v28  ;;  %v6846_v58 = vcombine.high %v6823_v1, %v6823_v1  ;;  %v6849_v28 = vrot.slane %v2652_v40, %v8324_v49  ;;  %v6853_v2 = vrot.slane %v6439_v43, %v8324_v49 }
 0x347   : > { %8397 = vst [vmem:[#allocation85_spill] sm:$0xff] %v6836_v21  ;;  %8398 = vst [vmem:[#allocation86_spill] sm:$0xff] %v6842_v36  ;;  %v6857_v41 = vcombine.high %v6832_v44, %v6832_v44  ;;  %v6861_v35 = vcombine.high %v6836_v21, %v6836_v21  ;;  %v6864_v36 = vrot.slane %v2669_v38, %v8324_v49 }
 0x348   : > { %8399 = vst [vmem:[#allocation87_spill] sm:$0xff] %v6846_v58  ;;  %8400 = vst [vmem:[#allocation88_spill] sm:$0xff] %v6849_v28  ;;  %v2686_v58 = vcombine.high %v6441_v31, %v6441_v31  ;;  %v6870_v40 = vcombine.high %v6849_v28, %v6849_v28  ;;  %v6874_v43 = vcombine.high %v6853_v2, %v6853_v2  ;;  %v8457_v46 = vmov %v6849_v28 }
 0x349   : > { %8401 = vst [vmem:[#allocation89_spill] sm:$0xff] %v6853_v2  ;;  %8402 = vst [vmem:[#allocation90_spill] sm:$0xff] %v6857_v41  ;;  %v6878_v41 = vrot.slane %v6441_v31, %v8324_v49  ;;  %v6883_v38 = vcombine.high %v6864_v36, %v6864_v36  ;;  %v8442_v48 = vld [vmem:[#allocation76_spill] sm:$0xff]  ;;  %v8459_v16 = vmov %v6853_v2  ;;  %v8462_v2 = vrot.slane %v8461_v56, 9  ;;  %v8468_v31 = vld [vmem:[#allocation13_spill] sm:$0xff] }
 0x34a   : > { %8403 = vst [vmem:[#allocation91_spill] sm:$0xff] %v6861_v35  ;;  %8404 = vst [vmem:[#allocation92_spill] sm:$0xff] %v6870_v40  ;;  %v6886_v21 = vrot.slane %v2686_v58, %v8324_v49  ;;  %v8444_v0 = vld [vmem:[#allocation77_spill] sm:$0xff]  ;;  %v8458_v63 = vmov %v6870_v40  ;;  %v8465_v49 = vmov %v6450_v53  ;;  %v8467_v53 = vrot.slane %v6474_v39, 9 }
 0x34b   : > { %8405 = vst [vmem:[#allocation93_spill] sm:$0xff] %v6874_v43  ;;  %v6892_v43 = vcombine.high %v6878_v41, %v6878_v41  ;;  %v8445_v60 = vld [vmem:[#allocation79_spill] sm:$0xff]  ;;  %v7010_v35 = vadd.f32 %v8462_v2, %v8461_v56  ;;  %v8466_v58 = vrot.slane %v8465_v49, 9  ;;  %v8470_v2 = vld [vmem:[#allocation42_spill] sm:$0xff] }
 0x34c   : > { %v6899_v5 = vcombine.high %v6886_v21, %v6886_v21  ;;  %v7025_v28 = vadd.f32 %v8467_v53, %v6474_v39  ;;  %v8474_v39 = vrot.slane %v6453_v42, 9 }
 0x34d   : > { %8463 = vst [vmem:[#allocation45_spill] sm:$0xff] %v7010_v35  ;;  %v7020_v40 = vadd.f32 %v8466_v58, %v8465_v49  ;;  %v8471_v35 = vrot.slane %v8470_v2, 9  ;;  %v7040_v49 = vadd.f32 %v8472_v30, %v6463_v6  ;;  %v8473_v58 = vrot.slane %v6489_v11, 9 }
 0x34e   : > { %8406 = vst [vmem:[#allocation94_spill] sm:$0xff] %v6899_v5  ;;  %v8452_v51 = vld [vmem:[#allocation86_spill] sm:$0xff]  ;;  %v8455_v15 = vld [vmem:[#allocation85_spill] sm:$0xff]  ;;  %v8469_v5 = vrot.slane %v8468_v31, 9  ;;  %v8477_v30 = vrot.slane %v6493_v50, 9 }
 0x34f   : > { %v8453_v54 = vld [vmem:[#allocation87_spill] sm:$0xff]  ;;  %v7035_v34 = vadd.f32 %v8471_v35, %v8470_v2  ;;  %v7045_v53 = vadd.f32 %v8473_v58, %v6489_v11  ;;  %v8476_v2 = vrot.slane %v6470_v25, 9  ;;  %v8478_v58 = vrot.slane %v6456_v59, 9 }
 0x350   : > { %v8454_v55 = vld [vmem:[#allocation90_spill] sm:$0xff]  ;;  %v7030_v56 = vadd.f32 %v8469_v5, %v8468_v31  ;;  %v7050_v5 = vadd.f32 %v8474_v39, %v6453_v42  ;;  %v8475_v31 = vrot.slane %v6478_v13, 9  ;;  %v7065_v11 = vadd.f32 %v8477_v30, %v6493_v50 }
 0x351   : > { %v7060_v6 = vadd.f32 %v8476_v2, %v6470_v25  ;;  %v7070_v42 = vadd.f32 %v8478_v58, %v6456_v59  ;;  %v8479_v39 = vrot.slane %v6485_v17, 9  ;;  %v8481_v2 = vrot.slane %v6500_v8, 9 }
 0x352   : > { %v8460_v33 = vld [vmem:[#allocation93_spill] sm:$0xff]  ;;  %v7055_v35 = vadd.f32 %v8475_v31, %v6478_v13  ;;  %v8480_v31 = vrot.slane %v6481_v18, 9  ;;  %v8482_v30 = vrot.slane %v6496_v7, 9  ;;  %v8483_v58 = vrot.slane %v6510_v23, 9 }
 0x353   : > { %v7075_v13 = vadd.f32 %v8479_v39, %v6485_v17  ;;  %v7085_v50 = vadd.f32 %v8481_v2, %v6500_v8  ;;  %v8484_v39 = vrot.slane %v6506_v20, 9  ;;  %v8487_v2 = vrot.slane %v6503_v26, 9 }
 0x354   : > { %v7080_v25 = vadd.f32 %v8480_v31, %v6481_v18  ;;  %v7090_v59 = vadd.f32 %v8482_v30, %v6496_v7  ;;  %v7095_v17 = vadd.f32 %v8483_v58, %v6510_v23  ;;  %v8485_v31 = vrot.slane %v6530_v14, 9 }
 0x355   : > { %v7100_v18 = vadd.f32 %v8484_v39, %v6506_v20  ;;  %v7110_v7 = vadd.f32 %v8487_v2, %v6503_v26  ;;  %v8489_v30 = vrot.slane %v6520_v62, 9  ;;  %v8491_v58 = vrot.slane %v6516_v52, 9 }
 0x356   : > { %v7105_v8 = vadd.f32 %v8485_v31, %v6530_v14  ;;  %v8493_v39 = vrot.slane %v6543_v12, 9  ;;  %v8495_v31 = vld [vmem:[#allocation14_spill] sm:$0xff]  ;;  %v8497_v2 = vrot.slane %v6534_v3, 9 }
 0x357   : > { %8488 = vst [vmem:[#allocation24_spill] sm:$0xff] %v7110_v7  ;;  %v7115_v23 = vadd.f32 %v8489_v30, %v6520_v62  ;;  %v7120_v20 = vadd.f32 %v8491_v58, %v6516_v52  ;;  %v8498_v30 = vld [vmem:[#allocation31_spill] sm:$0xff]  ;;  %v8500_v58 = vrot.slane %v6547_v24, 9 }
 0x358   : > { %8486 = vst [vmem:[#allocation23_spill] sm:$0xff] %v7105_v8  ;;  %v7125_v14 = vadd.f32 %v8493_v39, %v6543_v12  ;;  %v8496_v8 = vrot.slane %v8495_v31, 9  ;;  %v7135_v62 = vadd.f32 %v8497_v2, %v6534_v3  ;;  %v8502_v39 = vld [vmem:[#allocation44_spill] sm:$0xff]  ;;  %v8508_v2 = vld [vmem:[#allocation33_spill] sm:$0xff] }
 0x359   : > { %8490 = vst [vmem:[#allocation20_spill] sm:$0xff] %v7115_v23  ;;  %8492 = vst [vmem:[#allocation18_spill] sm:$0xff] %v7120_v20  ;;  %v8499_v23 = vrot.slane %v8498_v30, 9  ;;  %v7145_v12 = vadd.f32 %v8500_v58, %v6547_v24  ;;  %v8509_v7 = vrot.slane %v8508_v2, 9  ;;  %v8512_v58 = vld [vmem:[#allocation37_spill] sm:$0xff] }
 0x35a   : > { %8494 = vst [vmem:[#allocation47_spill] sm:$0xff] %v7125_v14  ;;  %v7130_v26 = vadd.f32 %v8496_v8, %v8495_v31  ;;  %v8503_v14 = vrot.slane %v8502_v39, 9  ;;  %v8505_v31 = vld [vmem:[#allocation35_spill] sm:$0xff] }
 0x35b   : > { %v7140_v52 = vadd.f32 %v8499_v23, %v8498_v30  ;;  %8501 = vst [vmem:[#allocation53_spill] sm:$0xff] %v7145_v12  ;;  %v8506_v20 = vrot.slane %v8505_v31, 9  ;;  %v7160_v23 = vadd.f32 %v8509_v7, %v8508_v2  ;;  %v8510_v30 = vrot.slane %v6559_v57, 9 }
 0x35c   : > { %v7150_v8 = vadd.f32 %v8503_v14, %v8502_v39  ;;  %v8513_v12 = vrot.slane %v8512_v58, 9  ;;  %v8515_v39 = vld [vmem:[#allocation41_spill] sm:$0xff]  ;;  %v8521_v2 = vrot.slane %v8407_v10, 9 }
 0x35d   : > { %v7155_v3 = vadd.f32 %v8506_v20, %v8505_v31  ;;  %v7165_v24 = vadd.f32 %v8510_v30, %v6559_v57  ;;  %v8518_v31 = vld [vmem:[#allocation38_spill] sm:$0xff]  ;;  %v8523_v30 = vld [vmem:[#allocation40_spill] sm:$0xff] }
 0x35e   : > { %8504 = vst [vmem:[#allocation60_spill] sm:$0xff] %v7150_v8  ;;  %v7170_v14 = vadd.f32 %v8513_v12, %v8512_v58  ;;  %v8516_v8 = vrot.slane %v8515_v39, 9  ;;  %v7185_v57 = vadd.f32 %v8521_v2, %v8407_v10  ;;  %v8526_v58 = vld [vmem:[#allocation16_spill] sm:$0xff]  ;;  %v8534_v2 = vld [vmem:[#allocation43_spill] sm:$0xff] }
 0x35f   : > { %8507 = vst [vmem:[#allocation61_spill] sm:$0xff] %v7155_v3  ;;  %8511 = vst [vmem:[#allocation63_spill] sm:$0xff] %v7165_v24  ;;  %v8519_v3 = vrot.slane %v8518_v31, 9  ;;  %v8524_v24 = vrot.slane %v8523_v30, 9 }
 0x360   : > { %8514 = vst [vmem:[#allocation66_spill] sm:$0xff] %v7170_v14  ;;  %v7175_v20 = vadd.f32 %v8516_v8, %v8515_v39  ;;  %8522 = vst [vmem:[#allocation79_spill] sm:$0xff] %v7185_v57  ;;  %v8527_v14 = vrot.slane %v8526_v58, 9  ;;  %v8529_v39 = vld [vmem:[#allocation28_spill] sm:$0xff]  ;;  %v8535_v57 = vrot.slane %v8534_v2, 9 }
 0x361   : > { %v7180_v7 = vadd.f32 %v8519_v3, %v8518_v31  ;;  %v7190_v12 = vadd.f32 %v8524_v24, %v8523_v30  ;;  %v8532_v31 = vrot.slane %v8409_v29, 9  ;;  %v8536_v30 = vld [vmem:[#allocation17_spill] sm:$0xff] }
 0x362   : > { %8517 = vst [vmem:[#allocation76_spill] sm:$0xff] %v7175_v20  ;;  %v7195_v8 = vadd.f32 %v8527_v14, %v8526_v58  ;;  %v8530_v20 = vrot.slane %v8529_v39, 9  ;;  %v7210_v24 = vadd.f32 %v8535_v57, %v8534_v2  ;;  %v8538_v58 = vld [vmem:[#allocation22_spill] sm:$0xff]  ;;  %v8546_v2 = vld [vmem:[#allocation19_spill] sm:$0xff] }
 0x363   : > { %8520 = vst [vmem:[#allocation77_spill] sm:$0xff] %v7180_v7  ;;  %8525 = vst [vmem:[#allocation86_spill] sm:$0xff] %v7190_v12  ;;  %v7205_v10 = vadd.f32 %v8532_v31, %v8409_v29  ;;  %v8537_v12 = vrot.slane %v8536_v30, 9  ;;  %v8543_v31 = vld [vmem:[#allocation30_spill] sm:$0xff] }
 0x364   : > { %8528 = vst [vmem:[#allocation87_spill] sm:$0xff] %v7195_v8  ;;  %v7200_v3 = vadd.f32 %v8530_v20, %v8529_v39  ;;  %v8539_v8 = vrot.slane %v8538_v58, 9  ;;  %v8541_v39 = vrot.slane %v8412_v61, 9 }
 0x365   : > { %8533 = vst [vmem:[#allocation85_spill] sm:$0xff] %v7205_v10  ;;  %v7215_v14 = vadd.f32 %v8537_v12, %v8536_v30  ;;  %v8544_v10 = vrot.slane %v8543_v31, 9  ;;  %v8549_v30 = vld [vmem:[#allocation32_spill] sm:$0xff] }
 0x366   : > { %8531 = vst [vmem:[#allocation90_spill] sm:$0xff] %v7200_v3  ;;  %v7220_v20 = vadd.f32 %v8539_v8, %v8538_v58  ;;  %v7225_v29 = vadd.f32 %v8541_v39, %v8412_v61  ;;  %v8547_v3 = vrot.slane %v8546_v2, 9  ;;  %v8550_v7 = vrot.slane %v8549_v30, 9  ;;  %v8551_v58 = vld [vmem:[#allocation21_spill] sm:$0xff]  ;;  %v8554_v39 = vld [vmem:[#allocation34_spill] sm:$0xff] }
 0x367   : > { %v7230_v57 = vadd.f32 %v8544_v10, %v8543_v31  ;;  %v8556_v31 = vld [vmem:[#allocation26_spill] sm:$0xff] }
 0x368   : > { %8540 = vst [vmem:[#allocation88_spill] sm:$0xff] %v7220_v20  ;;  %8542 = vst [vmem:[#allocation92_spill] sm:$0xff] %v7225_v29  ;;  %v7235_v12 = vadd.f32 %v8547_v3, %v8546_v2  ;;  %v7240_v8 = vadd.f32 %v8550_v7, %v8549_v30  ;;  %v8552_v20 = vrot.slane %v8551_v58, 9  ;;  %v8555_v29 = vrot.slane %v8554_v39, 9  ;;  %v8559_v2 = vld [vmem:[#allocation36_spill] sm:$0xff] }
 0x369   : > { %8545 = vst [vmem:[#allocation89_spill] sm:$0xff] %v7230_v57  ;;  %v8557_v57 = vrot.slane %v8556_v31, 9  ;;  %v8562_v30 = vrot.slane %v8418_v27, 9 }
 0x36a   : > { %8548 = vst [vmem:[#allocation93_spill] sm:$0xff] %v7235_v12  ;;  %v7245_v61 = vadd.f32 %v8552_v20, %v8551_v58  ;;  %v7250_v10 = vadd.f32 %v8555_v29, %v8554_v39  ;;  %v8560_v12 = vrot.slane %v8559_v2, 9  ;;  %v8564_v58 = vld [vmem:[#allocation25_spill] sm:$0xff]  ;;  %v8567_v39 = vrot.slane %v8420_v45, 9 }
 0x36b   : > { %v7255_v3 = vadd.f32 %v8557_v57, %v8556_v31  ;;  %v7265_v20 = vadd.f32 %v8562_v30, %v8418_v27  ;;  %v8569_v31 = vld [vmem:[#allocation39_spill] sm:$0xff]  ;;  %v8574_v30 = vld [vmem:[#allocation12_spill] sm:$0xff] }
 0x36c   : > { %8553 = vst [vmem:[#allocation27_spill] sm:$0xff] %v7245_v61  ;;  %v7260_v7 = vadd.f32 %v8560_v12, %v8559_v2  ;;  %v8565_v61 = vrot.slane %v8564_v58, 9  ;;  %v7275_v57 = vadd.f32 %v8567_v39, %v8420_v45  ;;  %v8572_v2 = vrot.slane %v8421_v9, 9  ;;  %v8578_v39 = vld [vmem:[#allocation48_spill] sm:$0xff] }
 0x36d   : > { %8558 = vst [vmem:[#allocation29_spill] sm:$0xff] %v7255_v3  ;;  %8563 = vst [vmem:[#allocation42_spill] sm:$0xff] %v7265_v20  ;;  %v8570_v3 = vrot.slane %v8569_v31, 9  ;;  %v8575_v20 = vrot.slane %v8574_v30, 9 }
 0x36e   : > { %8561 = vst [vmem:[#allocation13_spill] sm:$0xff] %v7260_v7  ;;  %v7270_v29 = vadd.f32 %v8565_v61, %v8564_v58  ;;  %8568 = vst [vmem:[#allocation31_spill] sm:$0xff] %v7275_v57  ;;  %v7285_v27 = vadd.f32 %v8572_v2, %v8421_v9  ;;  %v8576_v58 = vld [vmem:[#allocation49_spill] sm:$0xff]  ;;  %v8579_v57 = vrot.slane %v8578_v39, 9  ;;  %v8583_v2 = vld [vmem:[#allocation46_spill] sm:$0xff] }
 0x36f   : > { %v7280_v12 = vadd.f32 %v8570_v3, %v8569_v31  ;;  %v7290_v61 = vadd.f32 %v8575_v20, %v8574_v30  ;;  %v8581_v31 = vrot.slane %v8425_v47, 9  ;;  %v8586_v30 = vld [vmem:[#allocation51_spill] sm:$0xff] }
 0x370   : > { %8566 = vst [vmem:[#allocation14_spill] sm:$0xff] %v7270_v29  ;;  %8573 = vst [vmem:[#allocation35_spill] sm:$0xff] %v7285_v27  ;;  %v8577_v29 = vrot.slane %v8576_v58, 9  ;;  %v7300_v3 = vadd.f32 %v8579_v57, %v8578_v39  ;;  %v8584_v27 = vrot.slane %v8583_v2, 9  ;;  %v8591_v39 = vld [vmem:[#allocation56_spill] sm:$0xff] }
 0x371   : > { %8571 = vst [vmem:[#allocation44_spill] sm:$0xff] %v7280_v12  ;;  %v7305_v9 = vadd.f32 %v8581_v31, %v8425_v47  ;;  %v8587_v12 = vrot.slane %v8586_v30, 9  ;;  %v8594_v31 = vld [vmem:[#allocation52_spill] sm:$0xff] }
 0x372   : > { %v7295_v45 = vadd.f32 %v8577_v29, %v8576_v58  ;;  %8580 = vst [vmem:[#allocation33_spill] sm:$0xff] %v7300_v3  ;;  %v7310_v20 = vadd.f32 %v8584_v27, %v8583_v2  ;;  %v8589_v58 = vld [vmem:[#allocation50_spill] sm:$0xff]  ;;  %v8592_v3 = vrot.slane %v8591_v39, 9  ;;  %v8596_v2 = vld [vmem:[#allocation57_spill] sm:$0xff] }
 0x373   : > { %8582 = vst [vmem:[#allocation37_spill] sm:$0xff] %v7305_v9  ;;  %v7315_v29 = vadd.f32 %v8587_v12, %v8586_v30  ;;  %v8590_v7 = vrot.slane %v8589_v58, 9  ;;  %v8595_v9 = vrot.slane %v8594_v31, 9  ;;  %v8599_v30 = vld [vmem:[#allocation54_spill] sm:$0xff] }
 0x374   : > { %8585 = vst [vmem:[#allocation41_spill] sm:$0xff] %v7310_v20  ;;  %v7325_v47 = vadd.f32 %v8592_v3, %v8591_v39  ;;  %v8597_v20 = vrot.slane %v8596_v2, 9  ;;  %v8604_v39 = vld [vmem:[#allocation55_spill] sm:$0xff] }
 0x375   : > { %8588 = vst [vmem:[#allocation38_spill] sm:$0xff] %v7315_v29  ;;  %v7320_v57 = vadd.f32 %v8590_v7, %v8589_v58  ;;  %v7330_v27 = vadd.f32 %v8595_v9, %v8594_v31  ;;  %v8600_v29 = vrot.slane %v8599_v30, 9  ;;  %v8602_v58 = vrot.slane %v8430_v32, 9 }
 0x376   : > { %8593 = vst [vmem:[#allocation40_spill] sm:$0xff] %v7325_v47  ;;  %v7335_v12 = vadd.f32 %v8597_v20, %v8596_v2  ;;  %v8605_v47 = vrot.slane %v8604_v39, 9  ;;  %v8607_v31 = vrot.slane %v8432_v22, 9  ;;  %v8609_v2 = vld [vmem:[#allocation58_spill] sm:$0xff] }
 0x377   : > { %v7340_v7 = vadd.f32 %v8600_v29, %v8599_v30  ;;  %v7345_v3 = vadd.f32 %v8602_v58, %v8430_v32  ;;  %v8612_v30 = vrot.slane %v8433_v4, 9  ;;  %v8614_v58 = vld [vmem:[#allocation59_spill] sm:$0xff] }
 0x378   : > { %8598 = vst [vmem:[#allocation16_spill] sm:$0xff] %v7335_v12  ;;  %v7350_v9 = vadd.f32 %v8605_v47, %v8604_v39  ;;  %v7355_v20 = vadd.f32 %v8607_v31, %v8432_v22  ;;  %v8610_v12 = vrot.slane %v8609_v2, 9  ;;  %v8616_v39 = vld [vmem:[#allocation64_spill] sm:$0xff]  ;;  %v8618_v31 = vld [vmem:[#allocation62_spill] sm:$0xff] }
 0x379   : > { %8601 = vst [vmem:[#allocation28_spill] sm:$0xff] %v7340_v7  ;;  %8603 = vst [vmem:[#allocation43_spill] sm:$0xff] %v7345_v3  ;;  %v7365_v32 = vadd.f32 %v8612_v30, %v8433_v4  ;;  %v8615_v3 = vrot.slane %v8614_v58, 9  ;;  %v8623_v30 = vld [vmem:[#allocation65_spill] sm:$0xff] }
 0x37a   : > { %8606 = vst [vmem:[#allocation17_spill] sm:$0xff] %v7350_v9  ;;  %8608 = vst [vmem:[#allocation22_spill] sm:$0xff] %v7355_v20  ;;  %v7360_v29 = vadd.f32 %v8610_v12, %v8609_v2  ;;  %v8617_v9 = vrot.slane %v8616_v39, 9  ;;  %v8619_v20 = vrot.slane %v8618_v31, 9  ;;  %v8621_v2 = vrot.slane %v8437_v19, 9 }
 0x37b   : > { %8613 = vst [vmem:[#allocation19_spill] sm:$0xff] %v7365_v32  ;;  %v7370_v47 = vadd.f32 %v8615_v3, %v8614_v58  ;;  %v8624_v32 = vrot.slane %v8623_v30, 9  ;;  %v8626_v58 = vld [vmem:[#allocation69_spill] sm:$0xff] }
 0x37c   : > { %8611 = vst [vmem:[#allocation30_spill] sm:$0xff] %v7360_v29  ;;  %v7375_v22 = vadd.f32 %v8617_v9, %v8616_v39  ;;  %v7380_v12 = vadd.f32 %v8619_v20, %v8618_v31  ;;  %v7385_v4 = vadd.f32 %v8621_v2, %v8437_v19  ;;  %v8627_v29 = vrot.slane %v8626_v58, 9  ;;  %v8629_v39 = vld [vmem:[#allocation67_spill] sm:$0xff]  ;;  %v8631_v31 = vld [vmem:[#allocation72_spill] sm:$0xff] }
 0x37d   : > { %v7390_v3 = vadd.f32 %v8624_v32, %v8623_v30  ;;  %v8630_v7 = vrot.slane %v8629_v39, 9  ;;  %v8634_v2 = vld [vmem:[#allocation68_spill] sm:$0xff]  ;;  %v8636_v30 = vld [vmem:[#allocation73_spill] sm:$0xff] }
 0x37e   : > { %8620 = vst [vmem:[#allocation32_spill] sm:$0xff] %v7380_v12  ;;  %8622 = vst [vmem:[#allocation21_spill] sm:$0xff] %v7385_v4  ;;  %v7395_v9 = vadd.f32 %v8627_v29, %v8626_v58  ;;  %v8632_v12 = vrot.slane %v8631_v31, 9  ;;  %v8635_v4 = vrot.slane %v8634_v2, 9  ;;  %v8639_v58 = vld [vmem:[#allocation70_spill] sm:$0xff] }
 0x37f   : > { %8625 = vst [vmem:[#allocation34_spill] sm:$0xff] %v7390_v3  ;;  %v7400_v20 = vadd.f32 %v8630_v7, %v8629_v39  ;;  %v8637_v3 = vrot.slane %v8636_v30, 9  ;;  %v8642_v39 = vrot.slane %v8442_v48, 9 }
 0x380   : > { %8628 = vst [vmem:[#allocation26_spill] sm:$0xff] %v7395_v9  ;;  %v7405_v19 = vadd.f32 %v8632_v12, %v8631_v31  ;;  %v7410_v32 = vadd.f32 %v8635_v4, %v8634_v2  ;;  %v8640_v9 = vrot.slane %v8639_v58, 9  ;;  %v8644_v31 = vld [vmem:[#allocation71_spill] sm:$0xff]  ;;  %v8647_v2 = vrot.slane %v8444_v0, 9 }
 0x381   : > { %v7415_v29 = vadd.f32 %v8637_v3, %v8636_v30  ;;  %v7425_v12 = vadd.f32 %v8642_v39, %v8442_v48  ;;  %v8649_v30 = vld [vmem:[#allocation74_spill] sm:$0xff]  ;;  %v8654_v39 = vld [vmem:[#allocation75_spill] sm:$0xff] }
 0x382   : > { %8633 = vst [vmem:[#allocation36_spill] sm:$0xff] %v7405_v19  ;;  %v7420_v7 = vadd.f32 %v8640_v9, %v8639_v58  ;;  %v8645_v19 = vrot.slane %v8644_v31, 9  ;;  %v7435_v3 = vadd.f32 %v8647_v2, %v8444_v0  ;;  %v8652_v58 = vrot.slane %v8445_v60, 9  ;;  %v8659_v2 = vld [vmem:[#allocation78_spill] sm:$0xff] }
 0x383   : > { %8638 = vst [vmem:[#allocation25_spill] sm:$0xff] %v7415_v29  ;;  %8643 = vst [vmem:[#allocation12_spill] sm:$0xff] %v7425_v12  ;;  %v8650_v29 = vrot.slane %v8649_v30, 9  ;;  %v8655_v12 = vrot.slane %v8654_v39, 9 }
 0x384   : > { %8641 = vst [vmem:[#allocation39_spill] sm:$0xff] %v7420_v7  ;;  %v7430_v4 = vadd.f32 %v8645_v19, %v8644_v31  ;;  %8648 = vst [vmem:[#allocation48_spill] sm:$0xff] %v7435_v3  ;;  %v7445_v48 = vadd.f32 %v8652_v58, %v8445_v60  ;;  %v8656_v31 = vld [vmem:[#allocation80_spill] sm:$0xff]  ;;  %v8660_v3 = vrot.slane %v8659_v2, 9  ;;  %v8665_v58 = vld [vmem:[#allocation81_spill] sm:$0xff] }
 0x385   : > { %v7440_v9 = vadd.f32 %v8650_v29, %v8649_v30  ;;  %v7450_v19 = vadd.f32 %v8655_v12, %v8654_v39  ;;  %v8662_v30 = vld [vmem:[#allocation82_spill] sm:$0xff]  ;;  %v8668_v39 = vld [vmem:[#allocation84_spill] sm:$0xff] }
 0x386   : > { %8646 = vst [vmem:[#allocation49_spill] sm:$0xff] %v7430_v4  ;;  %8653 = vst [vmem:[#allocation51_spill] sm:$0xff] %v7445_v48  ;;  %v8657_v4 = vrot.slane %v8656_v31, 9  ;;  %v7460_v29 = vadd.f32 %v8660_v3, %v8659_v2  ;;  %v8666_v48 = vrot.slane %v8665_v58, 9  ;;  %v8669_v7 = vrot.slane %v8668_v39, 9 }
 0x387   : > { %8651 = vst [vmem:[#allocation46_spill] sm:$0xff] %v7440_v9  ;;  %v8663_v9 = vrot.slane %v8662_v30, 9  ;;  %v8674_v2 = vrot.slane %v8452_v51, 9 }
 0x388   : > { %v7455_v0 = vadd.f32 %v8657_v4, %v8656_v31  ;;  %8661 = vst [vmem:[#allocation56_spill] sm:$0xff] %v7460_v29  ;;  %v7470_v12 = vadd.f32 %v8666_v48, %v8665_v58  ;;  %v7475_v4 = vadd.f32 %v8669_v7, %v8668_v39  ;;  %v8671_v31 = vld [vmem:[#allocation83_spill] sm:$0xff]  ;;  %v8678_v58 = vrot.slane %v8453_v54, 9  ;;  %v8746_v29 = vld [vmem:[#allocation30_spill] sm:$0xff] }
 0x389   : > { %v7465_v60 = vadd.f32 %v8663_v9, %v8662_v30  ;;  %v7485_v9 = vadd.f32 %v8674_v2, %v8452_v51  ;;  %v8676_v30 = vrot.slane %v6823_v1, 9  ;;  %v8680_v39 = vrot.slane %v6832_v44, 9 }
 0x38a   : > { %8658 = vst [vmem:[#allocation50_spill] sm:$0xff] %v7455_v0  ;;  %8667 = vst [vmem:[#allocation57_spill] sm:$0xff] %v7470_v12  ;;  %v8672_v0 = vrot.slane %v8671_v31, 9  ;;  %v7495_v7 = vadd.f32 %v8678_v58, %v8453_v54  ;;  %v8684_v2 = vrot.slane %v8455_v15, 9  ;;  %v8689_v58 = vrot.slane %v8457_v46, 9  ;;  %v8742_v12 = vld [vmem:[#allocation17_spill] sm:$0xff] }
 0x38b   : > { %8664 = vst [vmem:[#allocation52_spill] sm:$0xff] %v7465_v60  ;;  %8670 = vst [vmem:[#allocation54_spill] sm:$0xff] %v7475_v4  ;;  %v7490_v48 = vadd.f32 %v8676_v30, %v6823_v1  ;;  %v8686_v30 = vld [vmem:[#allocation91_spill] sm:$0xff]  ;;  %v8744_v60 = vld [vmem:[#allocation22_spill] sm:$0xff] }
 0x38c   : > { %v7480_v3 = vadd.f32 %v8672_v0, %v8671_v31  ;;  %8675 = vst [vmem:[#allocation58_spill] sm:$0xff] %v7485_v9  ;;  %8679 = vst [vmem:[#allocation64_spill] sm:$0xff] %v7495_v7  ;;  %v7500_v0 = vadd.f32 %v8680_v39, %v6832_v44  ;;  %v8682_v31 = vrot.slane %v8454_v55, 9  ;;  %v7510_v1 = vadd.f32 %v8684_v2, %v8455_v15  ;;  %v8730_v7 = vld [vmem:[#allocation14_spill] sm:$0xff]  ;;  %v8732_v9 = vld [vmem:[#allocation31_spill] sm:$0xff] }
 0x38d   : > { %8677 = vst [vmem:[#allocation59_spill] sm:$0xff] %v7490_v48  ;;  %v8687_v48 = vrot.slane %v8686_v30, 9  ;;  %v7520_v44 = vadd.f32 %v8689_v58, %v8457_v46  ;;  %v8691_v39 = vrot.slane %v8458_v63, 9  ;;  %v8694_v2 = vrot.slane %v8460_v33, 9  ;;  %v8740_v4 = vld [vmem:[#allocation43_spill] sm:$0xff] }
 0x38e   : > { %8673 = vst [vmem:[#allocation55_spill] sm:$0xff] %v7480_v3  ;;  %8681 = vst [vmem:[#allocation62_spill] sm:$0xff] %v7500_v0  ;;  %v7505_v51 = vadd.f32 %v8682_v31, %v8454_v55  ;;  %v8693_v31 = vrot.slane %v8459_v16, 9  ;;  %v8696_v46 = vrot.slane %v6883_v38, 9  ;;  %v8728_v0 = vld [vmem:[#allocation42_spill] sm:$0xff]  ;;  %v8734_v3 = vld [vmem:[#allocation44_spill] sm:$0xff] }
 0x38f   : > { %8685 = vst [vmem:[#allocation69_spill] sm:$0xff] %v7510_v1  ;;  %v7515_v54 = vadd.f32 %v8687_v48, %v8686_v30  ;;  %8690 = vst [vmem:[#allocation72_spill] sm:$0xff] %v7520_v44  ;;  %v7525_v55 = vadd.f32 %v8691_v39, %v8458_v63  ;;  %v3388_v1 = vadd.f32 %v8694_v2, %v8460_v33  ;;  %v8695_v48 = vrot.slane %v6864_v36, 9  ;;  %v8700_v2 = vld [vmem:[#allocation94_spill] sm:$0xff] }
 0x390   : > { %8683 = vst [vmem:[#allocation65_spill] sm:$0xff] %v7505_v51  ;;  %v3387_v15 = vadd.f32 %v8693_v31, %v8459_v16  ;;  %v3390_v58 = vadd.f32 %v8696_v46, %v6883_v38  ;;  %v8697_v63 = vrot.slane %v6878_v41, 9  ;;  %v8699_v31 = vrot.slane %v6886_v21, 9  ;;  %v8709_v46 = vld [vmem:[#allocation18_spill] sm:$0xff] }
 0x391   : > { %8688 = vst [vmem:[#allocation67_spill] sm:$0xff] %v7515_v54  ;;  %8692 = vst [vmem:[#allocation68_spill] sm:$0xff] %v7525_v55  ;;  %v3389_v30 = vadd.f32 %v8695_v48, %v6864_v36  ;;  %v8698_v55 = vrot.slane %v6892_v43, 9  ;;  %v8701_v44 = vrot.slane %v8700_v2, 9  ;;  %v8702_v48 = vld [vmem:[#allocation45_spill] sm:$0xff]  ;;  %v3412_v38 = vadd.f32 %v7055_v35, %v7015_v37  ;;  %v8703_v35 = vld [vmem:[#allocation23_spill] sm:$0xff] }
 0x392   : > { %v3391_v39 = vadd.f32 %v8697_v63, %v6878_v41  ;;  %v3393_v33 = vadd.f32 %v8699_v31, %v6886_v21  ;;  %v3411_v54 = vadd.f32 %v7050_v5, %v8702_v48  ;;  %v3413_v41 = vadd.f32 %v7060_v6, %v7020_v40  ;;  %v8712_v63 = vld [vmem:[#allocation66_spill] sm:$0xff]  ;;  %v8715_v31 = vld [vmem:[#allocation88_spill] sm:$0xff]  ;;  %v8716_v48 = vld [vmem:[#allocation79_spill] sm:$0xff] }
 0x393   : > { %v3392_v16 = vadd.f32 %v8698_v55, %v6892_v43  ;;  %v3394_v36 = vadd.f32 %v8701_v44, %v8700_v2  ;;  %v3414_v43 = vadd.f32 %v7065_v11, %v7025_v28  ;;  %v3415_v55 = vadd.f32 %v7070_v42, %v7030_v56  ;;  %v8704_v56 = vld [vmem:[#allocation53_spill] sm:$0xff]  ;;  %v8705_v11 = vld [vmem:[#allocation24_spill] sm:$0xff]  ;;  %v8722_v51 = vld [vmem:[#allocation90_spill] sm:$0xff] }
 0x394   : > { %v3416_v21 = vadd.f32 %v7075_v13, %v7035_v34  ;;  %v3417_v44 = vadd.f32 %v7080_v25, %v7040_v49  ;;  %v3418_v5 = vadd.f32 %v7085_v50, %v7045_v53  ;;  %v3419_v37 = vadd.f32 %v7130_v26, %v7090_v59  ;;  %v8706_v34 = vld [vmem:[#allocation60_spill] sm:$0xff]  ;;  %v8708_v49 = vld [vmem:[#allocation61_spill] sm:$0xff]  ;;  %v8710_v50 = vld [vmem:[#allocation47_spill] sm:$0xff] }
 0x395   : > { %v3420_v40 = vadd.f32 %v7135_v62, %v7095_v17  ;;  %v3421_v28 = vadd.f32 %v7140_v52, %v7100_v18  ;;  %v3422_v6 = vadd.f32 %v8704_v56, %v8703_v35  ;;  %v3423_v42 = vadd.f32 %v8706_v34, %v8705_v11  ;;  %v8707_v13 = vld [vmem:[#allocation20_spill] sm:$0xff]  ;;  %v8711_v59 = vld [vmem:[#allocation63_spill] sm:$0xff]  ;;  %v8714_v52 = vld [vmem:[#allocation77_spill] sm:$0xff] }
 0x396   : > { %v3424_v25 = vadd.f32 %v8708_v49, %v8707_v13  ;;  %v3425_v53 = vadd.f32 %v7160_v23, %v8709_v46  ;;  %v3426_v26 = vadd.f32 %v8711_v59, %v8710_v50  ;;  %v3427_v17 = vadd.f32 %v7210_v24, %v8712_v63  ;;  %v8713_v62 = vld [vmem:[#allocation76_spill] sm:$0xff]  ;;  %v8718_v11 = vld [vmem:[#allocation86_spill] sm:$0xff]  ;;  %v8719_v34 = vld [vmem:[#allocation89_spill] sm:$0xff] }
 0x397   : > { %v3428_v18 = vadd.f32 %v7215_v14, %v8713_v62  ;;  %v3429_v2 = vadd.f32 %v8715_v31, %v8714_v52  ;;  %v8717_v35 = vld [vmem:[#allocation92_spill] sm:$0xff]  ;;  %v3431_v13 = vadd.f32 %v8719_v34, %v8718_v11  ;;  %v8720_v49 = vld [vmem:[#allocation87_spill] sm:$0xff]  ;;  %v8721_v23 = vld [vmem:[#allocation93_spill] sm:$0xff]  ;;  %v3433_v50 = vadd.f32 %v7240_v8, %v8722_v51 }
 0x398   : > { %v3430_v56 = vadd.f32 %v8717_v35, %v8716_v48  ;;  %v3432_v46 = vadd.f32 %v8721_v23, %v8720_v49  ;;  %v8723_v59 = vld [vmem:[#allocation85_spill] sm:$0xff]  ;;  %v8724_v24 = vld [vmem:[#allocation27_spill] sm:$0xff]  ;;  %v3435_v14 = vadd.f32 %v7290_v61, %v7250_v10  ;;  %v8733_v8 = vld [vmem:[#allocation38_spill] sm:$0xff] }
 0x399   : > { %v3434_v63 = vadd.f32 %v8724_v24, %v8723_v59  ;;  %v8725_v62 = vld [vmem:[#allocation29_spill] sm:$0xff]  ;;  %v3440_v51 = vadd.f32 %v8733_v8, %v8732_v9  ;;  %v3441_v59 = vadd.f32 %v7320_v57, %v8734_v3  ;;  %v8735_v24 = vld [vmem:[#allocation35_spill] sm:$0xff]  ;;  %v8736_v10 = vld [vmem:[#allocation40_spill] sm:$0xff] }
 0x39a   : > { %v3436_v52 = vadd.f32 %v7295_v45, %v8725_v62  ;;  %v8726_v31 = vld [vmem:[#allocation13_spill] sm:$0xff]  ;;  %v3442_v61 = vadd.f32 %v8736_v10, %v8735_v24  ;;  %v3443_v45 = vadd.f32 %v7370_v47, %v7330_v27  ;;  %v8737_v62 = vld [vmem:[#allocation16_spill] sm:$0xff]  ;;  %v8743_v9 = vld [vmem:[#allocation34_spill] sm:$0xff]  ;;  %v3449_v24 = vadd.f32 %v7400_v20, %v8746_v29 }
 0x39b   : > { %v8727_v48 = vld [vmem:[#allocation33_spill] sm:$0xff]  ;;  %v3447_v8 = vadd.f32 %v8743_v9, %v8742_v12  ;;  %v8745_v57 = vld [vmem:[#allocation26_spill] sm:$0xff]  ;;  %v8747_v10 = vld [vmem:[#allocation19_spill] sm:$0xff] }
 0x39c   : > { %v3437_v35 = vadd.f32 %v8727_v48, %v8726_v31  ;;  %v8729_v11 = vld [vmem:[#allocation37_spill] sm:$0xff]  ;;  %v3444_v31 = vadd.f32 %v7375_v22, %v8737_v62  ;;  %v8738_v48 = vld [vmem:[#allocation28_spill] sm:$0xff]  ;;  %v3448_v3 = vadd.f32 %v8745_v57, %v8744_v60  ;;  %v3451_v22 = vadd.f32 %v7450_v19, %v7410_v32  ;;  %v8758_v19 = vld [vmem:[#allocation54_spill] sm:$0xff] }
 0x39d   : > { %v3438_v34 = vadd.f32 %v8729_v11, %v8728_v0  ;;  %v8731_v49 = vld [vmem:[#allocation41_spill] sm:$0xff]  ;;  %v8739_v0 = vld [vmem:[#allocation32_spill] sm:$0xff] }
 0x39e   : > { %v3439_v23 = vadd.f32 %v8731_v49, %v8730_v7  ;;  %v3445_v11 = vadd.f32 %v8739_v0, %v8738_v48  ;;  %v8741_v7 = vld [vmem:[#allocation21_spill] sm:$0xff]  ;;  %v8748_v27 = vld [vmem:[#allocation36_spill] sm:$0xff]  ;;  %v8750_v48 = vld [vmem:[#allocation50_spill] sm:$0xff] }
 0x39f   : > { %v3446_v49 = vadd.f32 %v8741_v7, %v8740_v4  ;;  %v3450_v47 = vadd.f32 %v8748_v27, %v8747_v10  ;;  %v8749_v62 = vld [vmem:[#allocation25_spill] sm:$0xff]  ;;  %v8751_v4 = vld [vmem:[#allocation39_spill] sm:$0xff]  ;;  %v8752_v7 = vld [vmem:[#allocation56_spill] sm:$0xff] }
 0x3a0   : > { %v3452_v0 = vadd.f32 %v8750_v48, %v8749_v62  ;;  %v3453_v9 = vadd.f32 %v8752_v7, %v8751_v4  ;;  %v8753_v12 = vld [vmem:[#allocation12_spill] sm:$0xff]  ;;  %v8755_v20 = vld [vmem:[#allocation49_spill] sm:$0xff]  ;;  %v8759_v48 = vld [vmem:[#allocation46_spill] sm:$0xff] }
 0x3a1   : > { %v8754_v57 = vld [vmem:[#allocation52_spill] sm:$0xff]  ;;  %v8756_v29 = vld [vmem:[#allocation57_spill] sm:$0xff]  ;;  %v8760_v62 = vld [vmem:[#allocation55_spill] sm:$0xff] }
 0x3a2   : > { %v3454_v60 = vadd.f32 %v8754_v57, %v8753_v12  ;;  %v3455_v10 = vadd.f32 %v8756_v29, %v8755_v20  ;;  %v8757_v27 = vld [vmem:[#allocation48_spill] sm:$0xff]  ;;  %v3457_v4 = vadd.f32 %v8760_v62, %v8759_v48  ;;  %v8761_v7 = vld [vmem:[#allocation51_spill] sm:$0xff]  ;;  %v8762_v12 = vld [vmem:[#allocation58_spill] sm:$0xff] }
 0x3a3   : > { %v3456_v32 = vadd.f32 %v8758_v19, %v8757_v27  ;;  %v3458_v57 = vadd.f32 %v8762_v12, %v8761_v7  ;;  %v8763_v20 = vld [vmem:[#allocation59_spill] sm:$0xff]  ;;  %v8764_v19 = vld [vmem:[#allocation64_spill] sm:$0xff]  ;;  %v8765_v48 = vld [vmem:[#allocation62_spill] sm:$0xff] }
 0x3a4   : > { %v3459_v29 = vadd.f32 %v3387_v15, %v8763_v20  ;;  %v3460_v27 = vadd.f32 %v3388_v1, %v8764_v19  ;;  %v3461_v62 = vadd.f32 %v3389_v30, %v8765_v48  ;;  %v8766_v7 = vld [vmem:[#allocation65_spill] sm:$0xff]  ;;  %v8768_v1 = vld [vmem:[#allocation67_spill] sm:$0xff]  ;;  %v8769_v30 = vld [vmem:[#allocation72_spill] sm:$0xff] }
 0x3a5   : > { %v3462_v12 = vadd.f32 %v3390_v58, %v8766_v7  ;;  %v8767_v15 = vld [vmem:[#allocation69_spill] sm:$0xff]  ;;  %v3464_v19 = vadd.f32 %v3392_v16, %v8768_v1  ;;  %v3465_v48 = vadd.f32 %v3393_v33, %v8769_v30  ;;  %v8770_v7 = vld [vmem:[#allocation68_spill] sm:$0xff]  ;;  %v7659_v1 = vmul.f32 0.25, %v3413_v41 }
 0x3a6   : > { %v3463_v20 = vadd.f32 %v3391_v39, %v8767_v15  ;;  %v3466_v58 = vadd.f32 %v3394_v36, %v8770_v7  ;;  %v7655_v15 = vmul.f32 0.25, %v3411_v54  ;;  %v7657_v39 = vmul.f32 0.25, %v3412_v38 }
 0x3a7   : > { %v7661_v16 = vmul.f32 0.25, %v3414_v43  ;;  %v7663_v30 = vmul.f32 0.25, %v3415_v55  ;;  %v7665_v33 = vmul.f32 0.25, %v3416_v21  ;;  %v7667_v7 = vmul.f32 0.25, %v3417_v44 }
 0x3a8   : > { %8771 = vst [vmem:[#allocation73_spill] sm:$0xff] %v7655_v15  ;;  %8772 = vst [vmem:[#allocation70_spill] sm:$0xff] %v7657_v39  ;;  %v7669_v36 = vmul.f32 0.25, %v3418_v5  ;;  %v7671_v54 = vmul.f32 0.25, %v3419_v37  ;;  %v7673_v15 = vmul.f32 0.25, %v3420_v40  ;;  %v7675_v38 = vmul.f32 0.25, %v3421_v28 }
 0x3a9   : > { %v7677_v39 = vmul.f32 0.25, %v3422_v6  ;;  %v7679_v41 = vmul.f32 0.25, %v3423_v42  ;;  %v7681_v43 = vmul.f32 0.25, %v3424_v25  ;;  %v7683_v55 = vmul.f32 0.25, %v3425_v53 }
 0x3aa   : > { %v7685_v21 = vmul.f32 0.25, %v3426_v26  ;;  %v7687_v44 = vmul.f32 0.25, %v3427_v17  ;;  %v7689_v5 = vmul.f32 0.25, %v3428_v18  ;;  %v7691_v37 = vmul.f32 0.25, %v3429_v2 }
 0x3ab   : > { %v7693_v40 = vmul.f32 0.25, %v3430_v56  ;;  %v7695_v28 = vmul.f32 0.25, %v3431_v13  ;;  %v7697_v6 = vmul.f32 0.25, %v3432_v46  ;;  %v7699_v42 = vmul.f32 0.25, %v3433_v50 }
 0x3ac   : > { %v7701_v25 = vmul.f32 0.25, %v3434_v63  ;;  %v7703_v53 = vmul.f32 0.25, %v3435_v14  ;;  %v7705_v26 = vmul.f32 0.25, %v3436_v52  ;;  %v7707_v17 = vmul.f32 0.25, %v3437_v35 }
 0x3ad   : > { %v7709_v18 = vmul.f32 0.25, %v3438_v34  ;;  %v7711_v2 = vmul.f32 0.25, %v3439_v23  ;;  %v7713_v56 = vmul.f32 0.25, %v3440_v51  ;;  %v7715_v13 = vmul.f32 0.25, %v3441_v59 }
 0x3ae   : > { %v7717_v46 = vmul.f32 0.25, %v3442_v61  ;;  %v7719_v50 = vmul.f32 0.25, %v3443_v45  ;;  %v7721_v63 = vmul.f32 0.25, %v3444_v31  ;;  %v7723_v14 = vmul.f32 0.25, %v3445_v11 }
 0x3af   : > { %v7725_v52 = vmul.f32 0.25, %v3446_v49  ;;  %v7727_v35 = vmul.f32 0.25, %v3447_v8  ;;  %v7729_v34 = vmul.f32 0.25, %v3448_v3  ;;  %v7731_v23 = vmul.f32 0.25, %v3449_v24 }
 0x3b0   : > { %v7733_v51 = vmul.f32 0.25, %v3450_v47  ;;  %v7735_v59 = vmul.f32 0.25, %v3451_v22  ;;  %v7737_v61 = vmul.f32 0.25, %v3452_v0  ;;  %v7739_v45 = vmul.f32 0.25, %v3453_v9 }
 0x3b1   : > { %v7741_v31 = vmul.f32 0.25, %v3454_v60  ;;  %v7743_v11 = vmul.f32 0.25, %v3455_v10  ;;  %v7745_v49 = vmul.f32 0.25, %v3456_v32  ;;  %v7747_v8 = vmul.f32 0.25, %v3457_v4  ;;  %v8776_v4 = vld [vmem:[#allocation15_spill] sm:$0xff] }
 0x3b2   : > { %8773 = vst [vmem:[#allocation71_spill] sm:$0xff] %v7733_v51  ;;  %v7749_v3 = vmul.f32 0.25, %v3458_v57  ;;  %v7751_v24 = vmul.f32 0.25, %v3459_v29  ;;  %v7753_v47 = vmul.f32 0.25, %v3460_v27  ;;  %v7755_v22 = vmul.f32 0.25, %v3461_v62  ;;  %v8778_v29 = vld [vmem:[#allocation70_spill] sm:$0xff] }
 0x3b3   : > { %8774 = vst [vmem:[#allocation74_spill] sm:$0xff] %v7747_v8  ;;  %v7757_v0 = vmul.f32 0.25, %v3462_v12  ;;  %v7759_v9 = vmul.f32 0.25, %v3463_v20  ;;  %v7761_v60 = vmul.f32 0.25, %v3464_v19  ;;  %v7763_v10 = vmul.f32 0.25, %v3465_v48  ;;  %v8777_v8 = vld [vmem:[#allocation73_spill] sm:$0xff] }
 0x3b4   : > { %8775 = vst [vmem:[#allocation75_spill] sm:$0xff] %v7749_v3  ;;  %v7765_v32 = vmul.f32 0.25, %v3466_v58  ;;  %v3606_v57 = vrot.slane %v8777_v8, %v8776_v4  ;;  %v3610_v3 = vrot.slane %v8778_v29, %v8776_v4  ;;  %v3614_v27 = vrot.slane %v7659_v1, %v8776_v4 }
 0x3b5   : > { %v3618_v62 = vrot.slane %v7661_v16, %v8776_v4  ;;  %v3622_v12 = vrot.slane %v7663_v30, %v8776_v4  ;;  %v3626_v20 = vrot.slane %v7665_v33, %v8776_v4  ;;  %v3638_v58 = vrot.slane %v7671_v54, %v8776_v4 }
 0x3b6   : > { %v3642_v1 = vrot.slane %v7673_v15, %v8776_v4  ;;  %v3646_v16 = vrot.slane %v7675_v38, %v8776_v4  ;;  %v3650_v30 = vrot.slane %v7677_v39, %v8776_v4  ;;  %v3654_v33 = vrot.slane %v7679_v41, %v8776_v4 }
 0x3b7   : > { %v3658_v8 = vrot.slane %v7681_v43, %v8776_v4  ;;  %v3662_v29 = vrot.slane %v7683_v55, %v8776_v4  ;;  %v3666_v54 = vrot.slane %v7685_v21, %v8776_v4  ;;  %v3670_v15 = vrot.slane %v7687_v44, %v8776_v4 }
 0x3b8   : > { %v3674_v38 = vrot.slane %v7689_v5, %v8776_v4  ;;  %v3678_v39 = vrot.slane %v7691_v37, %v8776_v4  ;;  %v3682_v41 = vrot.slane %v7693_v40, %v8776_v4  ;;  %v3686_v43 = vrot.slane %v7695_v28, %v8776_v4 }
 0x3b9   : > { %v3690_v55 = vrot.slane %v7697_v6, %v8776_v4  ;;  %v3694_v21 = vrot.slane %v7699_v42, %v8776_v4  ;;  %v3698_v44 = vrot.slane %v7701_v25, %v8776_v4  ;;  %v3702_v5 = vrot.slane %v7703_v53, %v8776_v4 }
 0x3ba   : > { %v3706_v37 = vrot.slane %v7705_v26, %v8776_v4  ;;  %v3710_v40 = vrot.slane %v7707_v17, %v8776_v4  ;;  %v3714_v28 = vrot.slane %v7709_v18, %v8776_v4  ;;  %v3718_v6 = vrot.slane %v7711_v2, %v8776_v4 }
 0x3bb   : > { %v3722_v42 = vrot.slane %v7713_v56, %v8776_v4  ;;  %v3726_v25 = vrot.slane %v7715_v13, %v8776_v4  ;;  %v3730_v53 = vrot.slane %v7717_v46, %v8776_v4  ;;  %v3734_v26 = vrot.slane %v7719_v50, %v8776_v4 }
 0x3bc   : > { %v3738_v17 = vrot.slane %v7721_v63, %v8776_v4  ;;  %v3742_v18 = vrot.slane %v7723_v14, %v8776_v4  ;;  %v3746_v2 = vrot.slane %v7725_v52, %v8776_v4  ;;  %v3750_v56 = vrot.slane %v7727_v35, %v8776_v4 }
 0x3bd   : > { %v3766_v63 = vrot.slane %v7735_v59, %v8776_v4  ;;  %v3770_v14 = vrot.slane %v7737_v61, %v8776_v4  ;;  %v3774_v52 = vrot.slane %v7739_v45, %v8776_v4  ;;  %v3778_v35 = vrot.slane %v7741_v31, %v8776_v4 }
 0x3be   : > { %v3782_v13 = vrot.slane %v7743_v11, %v8776_v4  ;;  %v3786_v46 = vrot.slane %v7745_v49, %v8776_v4  ;;  %v3798_v59 = vrot.slane %v7751_v24, %v8776_v4  ;;  %v3802_v61 = vrot.slane %v7753_v47, %v8776_v4 }
 0x3bf   : > { %v3806_v45 = vrot.slane %v7755_v22, %v8776_v4  ;;  %v3810_v31 = vrot.slane %v7757_v0, %v8776_v4  ;;  %v3860_v11 = vsel %vm3859_vm0, %v3610_v3, %v3606_v57  ;;  %v3873_v49 = vsel %vm3859_vm0, %v3642_v1, %v3638_v58 }
 0x3c0   : > { %v3862_v19 = vsel %vm3861_vm1, %v3614_v27, %v3860_v11  ;;  %v3880_v48 = vsel %vm3859_vm0, %v3674_v38, %v3670_v15  ;;  %v3887_v50 = vsel %vm3859_vm0, %v3706_v37, %v3702_v5  ;;  %v3874_v47 = vsel %vm3861_vm1, %v3646_v16, %v3873_v49 }
 0x3c1   : > { %v3864_v24 = vsel %vm3863_vm2, %v3618_v62, %v3862_v19  ;;  %v3881_v51 = vsel %vm3861_vm1, %v3678_v39, %v3880_v48  ;;  %v3888_v22 = vsel %vm3861_vm1, %v3710_v40, %v3887_v50  ;;  %v3875_v3 = vsel %vm3863_vm2, %v3650_v30, %v3874_v47  ;;  %v8787_v50 = vld [vmem:[#allocation74_spill] sm:$0xff] }
 0x3c2   : > { %v3866_v0 = vsel %vm3865_vm3, %v3622_v12, %v3864_v24  ;;  %v3882_v57 = vsel %vm3863_vm2, %v3682_v41, %v3881_v51  ;;  %v3889_v27 = vsel %vm3863_vm2, %v3714_v28, %v3888_v22  ;;  %v3876_v1 = vsel %vm3865_vm3, %v3654_v33, %v3875_v3 }
 0x3c3   : > { %v3868_v58 = vsel %vm3867_vm4, %v3626_v20, %v3866_v0  ;;  %v3883_v62 = vsel %vm3865_vm3, %v3686_v43, %v3882_v57  ;;  %v3890_v19 = vsel %vm3865_vm3, %v3718_v6, %v3889_v27  ;;  %v8780_v48 = vrot.slane %v7667_v7, %v8776_v4 }
 0x3c4   : > { %v3877_v16 = vsel %vm3867_vm4, %v3658_v8, %v3876_v1  ;;  %v3884_v51 = vsel %vm3867_vm4, %v3690_v55, %v3883_v62  ;;  %v3891_v20 = vsel %vm3867_vm4, %v3722_v42, %v3890_v19  ;;  %v8781_v30 = vrot.slane %v7669_v36, %v8776_v4  ;;  %v8782_v36 = vld [vmem:[#allocation75_spill] sm:$0xff] }
 0x3c5   : > { %v3870_v12 = vsel %vm3869_vm5, %v8780_v48, %v3868_v58  ;;  %v3878_v15 = vsel %vm3869_vm5, %v3662_v29, %v3877_v16  ;;  %v3885_v7 = vsel %vm3869_vm5, %v3694_v21, %v3884_v51  ;;  %v3892_v38 = vsel %vm3869_vm5, %v3726_v25, %v3891_v20 }
 0x3c6   : > { %v3872_v33 = vsel %vm3871_vm6, %v8781_v30, %v3870_v12  ;;  %v3879_v8 = vsel %vm3871_vm6, %v3666_v54, %v3878_v15  ;;  %v3886_v39 = vsel %vm3871_vm6, %v3698_v44, %v3885_v7  ;;  %v3893_v41 = vsel %vm3871_vm6, %v3730_v53, %v3892_v38 }
 0x3c7   : > { %v3894_v43 = vsel %vm3859_vm0, %v3738_v17, %v3734_v26  ;;  %3930 = vst [vmem:[%s6346_s28] sm:$0xff] %v3872_v33  ;;  %v3794_v55 = vrot.slane %v8782_v36, %v8776_v4  ;;  %v3901_v21 = vsel %vm3859_vm0, %v3770_v14, %v3766_v63  ;;  %v3908_v5 = vsel %vm3859_vm0, %v3802_v61, %v3798_v59 }
 0x3c8   : > { %v3895_v29 = vsel %vm3861_vm1, %v3742_v18, %v3894_v43  ;;  %3931 = vst [vmem:[%s6346_s28 + $0x8] sm:$0xff] %v3879_v8  ;;  %3932 = vst [vmem:[%s6346_s28 + $0x10] sm:$0xff] %v3886_v39  ;;  %v3814_v54 = vrot.slane %v7759_v9, %v8776_v4  ;;  %v3902_v37 = vsel %vm3861_vm1, %v3774_v52, %v3901_v21 }
 0x3c9   : > { %3933 = vst [vmem:[%s6346_s28 + $0x18] sm:$0xff] %v3893_v41  ;;  %v3896_v44 = vsel %vm3863_vm2, %v3746_v2, %v3895_v29  ;;  %v3909_v40 = vsel %vm3861_vm1, %v3806_v45, %v3908_v5  ;;  %v3818_v28 = vrot.slane %v7761_v60, %v8776_v4  ;;  %v3903_v42 = vsel %vm3863_vm2, %v3778_v35, %v3902_v37 }
 0x3ca   : > { %v3897_v6 = vsel %vm3865_vm3, %v3750_v56, %v3896_v44  ;;  %v3910_v25 = vsel %vm3863_vm2, %v3810_v31, %v3909_v40  ;;  %v3822_v9 = vrot.slane %v7763_v10, %v8776_v4  ;;  %v8783_v53 = vrot.slane %v7729_v34, %v8776_v4 }
 0x3cb   : > { %v3904_v17 = vsel %vm3865_vm3, %v3782_v13, %v3903_v42  ;;  %v3911_v60 = vsel %vm3865_vm3, %v3814_v54, %v3910_v25  ;;  %v3826_v18 = vrot.slane %v7765_v32, %v8776_v4  ;;  %v8784_v2 = vrot.slane %v7731_v23, %v8776_v4  ;;  %v8785_v13 = vld [vmem:[#allocation71_spill] sm:$0xff] }
 0x3cc   : > { %v3898_v26 = vsel %vm3867_vm4, %v8783_v53, %v3897_v6  ;;  %v3905_v34 = vsel %vm3867_vm4, %v3786_v46, %v3904_v17  ;;  %v3912_v56 = vsel %vm3867_vm4, %v3818_v28, %v3911_v60  ;;  %v8786_v32 = vrot.slane %v8785_v13, %v8776_v4 }
 0x3cd   : > { %v3899_v10 = vsel %vm3869_vm5, %v8784_v2, %v3898_v26  ;;  %v8788_v63 = vrot.slane %v8787_v50, %v8776_v4  ;;  %v3913_v14 = vsel %vm3869_vm5, %v3822_v9, %v3912_v56 }
 0x3ce   : > { %v3900_v23 = vsel %vm3871_vm6, %v8786_v32, %v3899_v10  ;;  %v3914_v35 = vsel %vm3871_vm6, %v3826_v18, %v3913_v14 }
 0x3cf   : > { %v3906_v46 = vsel %vm3869_vm5, %v8788_v63, %v3905_v34  ;;  %3934 = vst [vmem:[%s6346_s28 + $0x20] sm:$0xff] %v3900_v23  ;;  %3936 = vst [vmem:[%s6346_s28 + $0x30] sm:$0xff] %v3914_v35 }
 0x3d0   : > { %v3907_v52 = vsel %vm3871_vm6, %v3794_v55, %v3906_v46 }
 0x3d1   : > { %3935 = vst [vmem:[%s6346_s28 + $0x28] sm:$0xff] %v3907_v52 }
 0x3d2   : > { %4873 = shalt.err (!%p4870_p7)
}
 0x3d3   : > { %s4874_s6 = scalar_lea.hbm %s7944_s26, 1024  ;;  %s4878_s12 = scalar_lea.hbm %s8008_s4, 2048 }
 0x3d4   : > { %p4875_p9 = scmp.ne.s32.totalorder %s7944_s26, %s4874_s6  ;;  %p4879_p5 = scmp.lt.u32.totalorder %s7944_s26, %s8008_s4 }
 0x3d5   : > { %p4880_p11 = scmp.lt.u32.totalorder %s4878_s12, %s4874_s6  ;;  %p4882_p4 = scmp.lt.u32.totalorder %s4874_s6, %s7944_s26 }
 0x3d6   : > { %p4876_p1 = pnand %p4875_p9, %p5061_p12 }
 0x3d7   : > { %p4881_p2 = por %p4880_p11, %p4879_p5 }
 0x3d8   : > { %p4877_p0 = pneg %p4876_p1 }
 0x3d9   : > { %p4883_p6 = por %p4882_p4, %p4881_p2 }
 0x3db   : > { %p4884_p8 = pnand %p4883_p6, %p4877_p0 }
 0x3dd   : > { %4887 = shalt.err (!%p4884_p8)
}
 0x3de   : > { %s4940_s28 = smov 128   ;;  %s4941_s29 = smov 8  }
 0x3df   : > { %4709 = dma.vmem_to_hbm [thread:$0]  (%p5061_p12), %s7946_s10, 1024, %s7944_s26, %s3939_s8, %s4940_s28, %s4940_s28, %s4941_s29  }
 0x3e0 PF: > { %s3967_s19 = sand.u32 1, %s4918_s15   ;;  %p8789_p10 = scmp.ne.s32.totalorder %s8197_s22, 0 }
 0x3e1   : > { %p8790_p13 = scmp.ge.s32.totalorder %s4930_s18, 2  ;;  %s3968_s7 = scalar_lea.sflag [#allocation5], %s3967_s19 }
 0x3e3   : > { %p4720_p3 = pnand %p8790_p13, %p8789_p10 }
 0x3e5   : > { %4913 = dma.done.wait (!%p4720_p3), %s3968_s7, 1024  }
 0x3e6   : > { %4915 = vsyncadd (!%p4720_p3), %s3968_s7, 4294966272  ;;  %p18_p7 = scmp.ge.s32.totalorder %s5023_s27, 4   ;;  %s8791_s15 = smov %s4922_s16 }
 0x3e7   : > { %s8792_s16 = smov %s4926_s17  ;;  %s8793_s17 = smov %s5057_s24 }
 0x3e8   : > { %s8794_s18 = smov %s5023_s27  ;;  %20 = sbr.rel (!%p18_p7) target bundleno = 6 (0x6), region = 87 }
 0x3ef   :  { %3973 = vsyncpa [#allocation4], 1 }
 0x3f0   :  { %3975 = vsyncpa [#allocation4 + $0x1], 1 }
 0x3f1   :  { %3976 = vsyncpa [#allocation7], 1 }
 0x3f2   :  { %3977 = vsyncpa [#allocation5], 1 }
 0x3f3   :  { %3979 = vsyncpa [#allocation5 + $0x1], 1 }

</bundles_post_ra>
